<compile_context>
chip_gen: v5e
topology: v5e:2x2
jax: 0.10.0
libtpu: 0.0.40
codegen_flags: <defaults>
</compile_context>

<pallas_src>
import numpy as np

import jax
import jax.numpy as jnp
from jax import lax
from jax.experimental import pallas as pl
from jax.experimental.pallas import tpu as pltpu

# ---------------- configuration (small, consistent with the module) ----------------
WORD_VOCAB = 50          # fast_text_matrix.shape[0]
D = 64                   # word_embedding_dim = fast_text_matrix.shape[1]
NUM_ACTORS = 16          # actor_matrix.shape[0]
CHAR_VOCAB = 30
CHAR_PAD_IDX = 0
CHAR_EMB = 8             # char_embedding_dim
NUM_EFEAT = 10           # num_efeatures
EFEAT_EMB = 16           # efeature_embedding_dim
FILTERS = 8              # filters_per_channel
KERNELS = (2, 3)         # kernels
FFNN_HID = 32            # ffnn_hidden_dim (num_ffnn_layers = 1)
LSTM_HID = D // 2        # lstm_hidden_dim = word_embedding_dim / 2
T = 12                   # sequence length
L = 7                    # max chars per word
SPAN_P = 3 * D + 2 * EFEAT_EMB   # span_encoding_dim = 224

T_PAD = 16               # time axis padded to a sublane-tile multiple
S_PAD = 8                # span axis padded to a sublane-tile multiple
W2 = L - 2 + 1           # windows for kernel size 2  (6)
W3 = L - 3 + 1           # windows for kernel size 3  (5)
IN_DIM = D + FILTERS * len(KERNELS)   # 80 = LSTM input dim
GATE = 4 * LSTM_HID                   # 128
CHFLAT = L * CHAR_EMB                 # 56

# ---- parameter-slab row offsets (all 8-row aligned) ----
O_CONVW = 0                      # (56, 128)  combined shifted conv weight
O_WIHF = O_CONVW + CHFLAT        # 56:  (80, 128)  fwd Wih^T
O_WHHF = O_WIHF + IN_DIM         # 136: (32, 128)  fwd Whh^T
O_WIHB = O_WHHF + LSTM_HID       # 168: (80, 128)  bwd Wih^T
O_WHHB = O_WIHB + IN_DIM         # 248: (32, 128)  bwd Whh^T
O_BF = O_WHHB + LSTM_HID         # 280: (1, 128)   fwd bih+bhh
O_BB = O_BF + 8                  # 288: (1, 128)   bwd bih+bhh
O_MISC = O_BB + 8                # 296: (1, 128)   [b2|b3|alpha_b1|alpha_b2]
O_AFFB = O_MISC + 8              # 304: (1, 64)    affine_ent bias
O_A1 = O_AFFB + 8                # 312: (64, 32)   alpha FFNN w1
O_A2 = O_A1 + D                  # 376: (32, 1)    alpha FFNN w2
O_AFFW = O_A2 + FFNN_HID         # 408: (224, 64)  affine_ent weight^T
O_ACT = O_AFFW + SPAN_P          # 632: (16, 64)   renormed actor matrix
P_ROWS = O_ACT + NUM_ACTORS      # 648

# misc-row lane offsets
M_B2 = 0
M_B3 = FILTERS
M_A1B = 16
M_A2B = 48

_VMEM = pl.BlockSpec(memory_space=pltpu.MemorySpace.VMEM)


def _sigmoid(x):
    # exp-based sigmoid (guaranteed Mosaic lowering; EUP exp + VPU divide)
    return 1.0 / (1.0 + jnp.exp(-x))


# ---------------- the single fused Model1 kernel ----------------
def _model1_kernel(ft_ref, ch_ref, sel_ref, fs_ref, prm_ref, out_ref, we_scr):
    """ft: (T_PAD, D) fastText rows; ch: (T_PAD, L*E) flattened char embeddings;
    sel: (3*S_PAD, T_PAD) = [one-hot span starts | one-hot span ends | span masks];
    fs: (S_PAD, 2*EFEAT) entity feature embeddings; prm: (P_ROWS, 128) param slab.
    out: (S_PAD, 128) with actor scores in lanes 0..15 and logsumexp in lane 16."""
    f32 = jnp.float32
    ft = ft_ref[...]                                         # (T_PAD, D)
    misc = prm_ref[O_MISC:O_MISC + 1, :]                     # (1, 128)

    # ---- char CNN: ONE matmul over window-shifted block weights, then max-pool ----
    conv = jnp.dot(ch_ref[...], prm_ref[O_CONVW:O_CONVW + CHFLAT, :],
                   preferred_element_type=f32)               # (T_PAD, 128)

    def pool(off, nwin, bias):
        m = conv[:, off:off + FILTERS]
        for wi in range(1, nwin):
            m = jnp.maximum(m, conv[:, off + wi * FILTERS:off + (wi + 1) * FILTERS])
        # bias + ReLU hoisted out of the pool: relu(max_w(y) + b) == max_w(relu(y + b))
        return jnp.maximum(m + bias, 0.0)                    # (T_PAD, FILTERS)

    c2 = pool(0, W2, misc[:, M_B2:M_B2 + FILTERS])
    c3 = pool(W2 * FILTERS, W3, misc[:, M_B3:M_B3 + FILTERS])

    # ---- BiLSTM input projections: x = [ft|c2|c3]; split weight rows, no concat ----
    def in_proj(o_w, o_b):
        w = prm_ref[o_w:o_w + IN_DIM, :]                     # (80, 128) = Wih^T
        return (jnp.dot(ft, w[0:D, :], preferred_element_type=f32)
                + jnp.dot(c2, w[D:D + FILTERS, :], preferred_element_type=f32)
                + jnp.dot(c3, w[D + FILTERS:IN_DIM, :], preferred_element_type=f32)
                + prm_ref[o_b:o_b + 1, :])                   # (T_PAD, 128)

    gf = in_proj(O_WIHF, O_BF)
    gb = in_proj(O_WIHB, O_BB)

    # ---- BiLSTM recurrence: fully unrolled; h/c replicated over 8 sublanes ----
    we_scr[...] = jnp.zeros((T_PAD, D), f32)                 # padded rows stay zero

    def lstm_dir(gates, o_whh, steps, col0):
        whh_t = prm_ref[o_whh:o_whh + LSTM_HID, :]           # (32, 128) = Whh^T
        h = jnp.zeros((8, LSTM_HID), f32)
        c = jnp.zeros((8, LSTM_HID), f32)
        for t in steps:
            g = gates[t:t + 1, :] + jnp.dot(h, whh_t, preferred_element_type=f32)
            i_g = _sigmoid(g[:, 0:LSTM_HID])
            f_g = _sigmoid(g[:, LSTM_HID:2 * LSTM_HID])
            g_g = jnp.tanh(g[:, 2 * LSTM_HID:3 * LSTM_HID])
            o_g = _sigmoid(g[:, 3 * LSTM_HID:4 * LSTM_HID])
            c = f_g * c + i_g * g_g
            h = o_g * jnp.tanh(c)
            we_scr[t:t + 1, col0:col0 + LSTM_HID] = h[0:1, :]

    lstm_dir(gf, O_WHHF, range(T), 0)                        # forward hidden -> cols 0..31
    lstm_dir(gb, O_WHHB, range(T - 1, -1, -1), LSTM_HID)     # backward hidden -> cols 32..63
    we = we_scr[...]                                         # (T_PAD, D) word embeddings

    # ---- SingleQueryEncoder FFNN scorer over ALL positions at once ----
    a1 = prm_ref[O_A1:O_A1 + D, 0:FFNN_HID]                  # (64, 32)
    a2 = prm_ref[O_A2:O_A2 + FFNN_HID, 0:1]                  # (32, 1)
    hdn = jnp.maximum(jnp.dot(we, a1, preferred_element_type=f32)
                      + misc[:, M_A1B:M_A1B + FFNN_HID], 0.0)          # (T_PAD, 32)
    sc = jnp.dot(hdn, a2, preferred_element_type=f32) + misc[:, M_A2B:M_A2B + 1]
    rows = lax.broadcasted_iota(jnp.int32, (T_PAD, 1), 0)
    sc = jnp.where(rows < T, sc, -1e30)                      # exclude padded time rows
    e = jnp.exp(sc - jnp.max(sc, axis=0, keepdims=True))     # (T_PAD, 1)

    # per-span softmax attention via mask matmuls (values = fastText embeddings)
    mask = sel_ref[2 * S_PAD:3 * S_PAD, :]                   # (S_PAD, T_PAD)
    num = jnp.dot(mask, e * ft, preferred_element_type=f32)  # (S_PAD, D)
    den = jnp.dot(mask, e, preferred_element_type=f32)       # (S_PAD, 1)
    xh = num * pl.reciprocal(jnp.maximum(den, 1e-30), approx=True)

    # span boundary embeddings via one-hot selection matmuls
    xf = jnp.dot(sel_ref[0:S_PAD, :], we, preferred_element_type=f32)        # (S_PAD, D)
    xl = jnp.dot(sel_ref[S_PAD:2 * S_PAD, :], we, preferred_element_type=f32)

    # affine_ent on [xf | xl | xh | fs]: split weight rows -> no in-kernel concat
    small = (jnp.dot(xf, prm_ref[O_AFFW:O_AFFW + D, 0:D], preferred_element_type=f32)
             + jnp.dot(xl, prm_ref[O_AFFW + D:O_AFFW + 2 * D, 0:D],
                       preferred_element_type=f32)
             + jnp.dot(xh, prm_ref[O_AFFW + 2 * D:O_AFFW + 3 * D, 0:D],
                       preferred_element_type=f32)
             + jnp.dot(fs_ref[...], prm_ref[O_AFFW + 3 * D:O_AFFW + SPAN_P, 0:D],
                       preferred_element_type=f32)
             + prm_ref[O_AFFB:O_AFFB + 1, 0:D])              # (S_PAD, D)

    # DotProduct.simpel: contract over D (actors stay (A, D)); Maximum.lse over actors
    actors = prm_ref[O_ACT:O_ACT + NUM_ACTORS, 0:D]
    scores = lax.dot_general(small, actors, (((1,), (1,)), ((), ())),
                             preferred_element_type=f32)     # (S_PAD, A)
    m = jnp.max(scores, axis=1, keepdims=True)
    lse = m + jnp.log(jnp.sum(jnp.exp(scores - m), axis=1, keepdims=True))

    # lane-dense packed output: lanes 0..15 scores, lane 16 logsumexp, rest zeros
    out_ref[...] = jnp.concatenate(
        [scores, lse, jnp.zeros((S_PAD, 128 - NUM_ACTORS - 1), f32)], axis=1)


# ---------------- wrapper (embedding gathers + static span matrices) ----------------
def model1_forward(p, word_ids, char_ids, espans):
    ft = p["fasttext"][word_ids]                             # (T, D)
    ce = p["char_emb"][char_ids].reshape(T, CHFLAT)          # (T, 56)
    ft_pad = jnp.zeros((T_PAD, D), jnp.float32).at[:T].set(ft)
    ch_pad = jnp.zeros((T_PAD, CHFLAT), jnp.float32).at[:T].set(ce)

    S = len(espans)
    # static (trace-time) selection / mask matrices, packed into ONE (24,16) slab
    sel = np.zeros((3 * S_PAD, T_PAD), np.float32)
    feat_idx = np.zeros((S, 2), np.int32)
    for i, (s, e, feats) in enumerate(espans):
        sel[i, s] = 1.0                      # span start one-hot
        sel[S_PAD + i, e - 1] = 1.0          # span end one-hot
        sel[2 * S_PAD + i, s:e] = 1.0        # span mask
        feat_idx[i] = feats

    fs = p["efeat_emb"][jnp.asarray(feat_idx)].reshape(S, 2 * EFEAT_EMB)
    fs_pad = jnp.zeros((S_PAD, 2 * EFEAT_EMB), jnp.float32).at[:S].set(fs)

    out = pl.pallas_call(
        _model1_kernel,
        out_shape=jax.ShapeDtypeStruct((S_PAD, 128), jnp.float32),
        in_specs=[_VMEM] * 5,
        out_specs=_VMEM,
        scratch_shapes=[pltpu.VMEM((T_PAD, D), jnp.float32)],
    )(ft_pad, ch_pad, jnp.asarray(sel), fs_pad, p["slab"])

    score_link = out[:S, :NUM_ACTORS]
    score_1 = out[:S, NUM_ACTORS]
    return score_1, (score_link,)


# ---------------- deterministic parameter initialization ----------------
def renorm(table, max_norm=1.0):
    # nn.Embedding(max_norm=1.0) lookup-time renormalization (eval-equivalent)
    n = jnp.linalg.norm(table, axis=-1, keepdims=True)
    return table * jnp.minimum(1.0, max_norm / jnp.maximum(n, 1e-7))


def init_params(key):
    ks = jax.random.split(key, 16)
    p = {}
    p["fasttext"] = 0.1 * jax.random.normal(ks[0], (WORD_VOCAB, D), jnp.float32)
    actor = 0.5 * jax.random.normal(ks[1], (NUM_ACTORS, D), jnp.float32)
    char_emb = 0.1 * jax.random.normal(ks[2], (CHAR_VOCAB, CHAR_EMB), jnp.float32)
    p["char_emb"] = char_emb.at[CHAR_PAD_IDX].set(0.0)

    conv_w2 = 0.2 * jax.random.normal(ks[3], (2 * CHAR_EMB, FILTERS), jnp.float32)
    conv_w3 = 0.2 * jax.random.normal(ks[4], (3 * CHAR_EMB, FILTERS), jnp.float32)
    conv_b2 = jnp.zeros((FILTERS,), jnp.float32)
    conv_b3 = jnp.zeros((FILTERS,), jnp.float32)

    def lstm_weights(k1, k2):
        Wih = 0.1 * jax.random.normal(k1, (GATE, IN_DIM), jnp.float32)
        Whh = 0.1 * jax.random.normal(k2, (GATE, LSTM_HID), jnp.float32)
        b = jnp.zeros((GATE,), jnp.float32)        # fused bih + bhh
        return Wih, Whh, b

    Wih_f, Whh_f, b_f = lstm_weights(ks[5], ks[6])
    Wih_b, Whh_b, b_b = lstm_weights(ks[7], ks[8])

    # entity_feature_embedding: xavier_uniform gain sqrt(2); max_norm precomputed (eval)
    bound = float(np.sqrt(2.0) * np.sqrt(6.0 / (NUM_EFEAT + EFEAT_EMB)))
    efeat = jax.random.uniform(ks[9], (NUM_EFEAT, EFEAT_EMB), jnp.float32,
                               minval=-bound, maxval=bound)
    p["efeat_emb"] = renorm(efeat, 1.0)

    alpha_w1 = 0.1 * jax.random.normal(ks[10], (D, FFNN_HID), jnp.float32)
    alpha_b1 = jnp.zeros((FFNN_HID,), jnp.float32)
    alpha_w2 = 0.1 * jax.random.normal(ks[11], (FFNN_HID, 1), jnp.float32)
    alpha_b2 = jnp.zeros((1,), jnp.float32)

    aff_w = (1.0 / np.sqrt(SPAN_P)) * jax.random.normal(ks[12], (SPAN_P, D), jnp.float32)
    aff_b = jnp.zeros((D,), jnp.float32)

    # ---- window-shifted combined conv weight: (56, 128) ----
    conv_big = jnp.zeros((CHFLAT, 128), jnp.float32)
    for wi in range(W2):
        conv_big = conv_big.at[wi * CHAR_EMB:(wi + 2) * CHAR_EMB,
                               wi * FILTERS:(wi + 1) * FILTERS].set(conv_w2)
    off3 = W2 * FILTERS
    for wi in range(W3):
        conv_big = conv_big.at[wi * CHAR_EMB:(wi + 3) * CHAR_EMB,
                               off3 + wi * FILTERS:off3 + (wi + 1) * FILTERS].set(conv_w3)

    misc = jnp.zeros((128,), jnp.float32)
    misc = misc.at[M_B2:M_B2 + FILTERS].set(conv_b2)
    misc = misc.at[M_B3:M_B3 + FILTERS].set(conv_b3)
    misc = misc.at[M_A1B:M_A1B + FFNN_HID].set(alpha_b1)
    misc = misc.at[M_A2B:M_A2B + 1].set(alpha_b2)

    # ---- pack everything into one lane-dense (P_ROWS, 128) slab ----
    slab = jnp.zeros((P_ROWS, 128), jnp.float32)
    slab = slab.at[O_CONVW:O_CONVW + CHFLAT].set(conv_big)
    slab = slab.at[O_WIHF:O_WIHF + IN_DIM].set(Wih_f.T)
    slab = slab.at[O_WHHF:O_WHHF + LSTM_HID].set(Whh_f.T)
    slab = slab.at[O_WIHB:O_WIHB + IN_DIM].set(Wih_b.T)
    slab = slab.at[O_WHHB:O_WHHB + LSTM_HID].set(Whh_b.T)
    slab = slab.at[O_BF].set(b_f)
    slab = slab.at[O_BB].set(b_b)
    slab = slab.at[O_MISC].set(misc)
    slab = slab.at[O_AFFB, 0:D].set(aff_b)
    slab = slab.at[O_A1:O_A1 + D, 0:FFNN_HID].set(alpha_w1)
    slab = slab.at[O_A2:O_A2 + FFNN_HID, 0:1].set(alpha_w2)
    slab = slab.at[O_AFFW:O_AFFW + SPAN_P, 0:D].set(aff_w)
    slab = slab.at[O_ACT:O_ACT + NUM_ACTORS, 0:D].set(renorm(actor, 1.0))
    p["slab"] = slab
    return p


if __name__ == "__main__":
    key = jax.random.PRNGKey(0)
    pkey, dkey1, dkey2 = jax.random.split(key, 3)
    params = init_params(pkey)

    word_ids = jax.random.randint(dkey1, (T,), 0, WORD_VOCAB, dtype=jnp.int32)
    char_ids = jax.random.randint(dkey2, (T, L), 1, CHAR_VOCAB, dtype=jnp.int32)
    char_ids = char_ids.at[:, 5:].set(CHAR_PAD_IDX)        # simulate padded char positions

    # espans: (start, end, (feature_id_1, feature_id_2)) -- static Python structure
    espans = [(0, 2, (1, 2)), (3, 6, (0, 3)), (7, 10, (4, 1))]

    # jit the whole forward (spans static) so the tiny glue fuses into one XLA program
    fwd = jax.jit(lambda p, w, c: model1_forward(p, w, c, espans))

    score_1, (score_link,) = fwd(params, word_ids, char_ids)
    jax.block_until_ready((score_1, score_link))

    assert score_link.shape == (len(espans), NUM_ACTORS)
    assert score_1.shape == (len(espans),)
    assert bool(jnp.all(jnp.isfinite(score_link))) and bool(jnp.all(jnp.isfinite(score_1)))
    print("KERNEL_OK")
</pallas_src>

<mosaic_0001>
module attributes {stable_mosaic.version = 11 : i64} {
  func.func @_model1_kernel(%arg0: memref<16x64xf32, #tpu.memory_space<vmem>>, %arg1: memref<16x56xf32, #tpu.memory_space<vmem>>, %arg2: memref<24x16xf32, #tpu.memory_space<vmem>>, %arg3: memref<8x32xf32, #tpu.memory_space<vmem>>, %arg4: memref<648x128xf32, #tpu.memory_space<vmem>>, %arg5: memref<8x128xf32, #tpu.memory_space<vmem>>, %arg6: memref<16x64xf32, #tpu.memory_space<vmem>>) attributes {dimension_semantics = [], scalar_prefetch = 0 : i64, scratch_operands = 1 : i64, tpu.core_type = #tpu.core_type<tc>} {
    %c0 = arith.constant 0 : index
    %c0_0 = arith.constant 0 : index
    %0 = vector.load %arg0[%c0, %c0_0] : memref<16x64xf32, #tpu.memory_space<vmem>>, vector<16x64xf32>
    %c296 = arith.constant 296 : index
    %c0_1 = arith.constant 0 : index
    %1 = vector.load %arg4[%c296, %c0_1] : memref<648x128xf32, #tpu.memory_space<vmem>>, vector<1x128xf32>
    %c0_2 = arith.constant 0 : index
    %c0_3 = arith.constant 0 : index
    %2 = vector.load %arg1[%c0_2, %c0_3] : memref<16x56xf32, #tpu.memory_space<vmem>>, vector<16x56xf32>
    %c0_4 = arith.constant 0 : index
    %c0_5 = arith.constant 0 : index
    %3 = vector.load %arg4[%c0_4, %c0_5] : memref<648x128xf32, #tpu.memory_space<vmem>>, vector<56x128xf32>
    %cst = arith.constant dense<0.000000e+00> : vector<16x128xf32>
    %4 = tpu.matmul %2, %3, %cst {dimension_numbers = #tpu.dot_dimension_numbers<[1], [0], [0], [1], [0, 0, 1, 1], [], []>} : vector<16x56xf32>, vector<56x128xf32>, vector<16x128xf32> -> vector<16x128xf32>
    %5 = vector.extract_strided_slice %1 {offsets = [0, 0], sizes = [1, 8], strides = [1, 1]} : vector<1x128xf32> to vector<1x8xf32>
    %6 = vector.extract_strided_slice %4 {offsets = [0, 0], sizes = [16, 8], strides = [1, 1]} : vector<16x128xf32> to vector<16x8xf32>
    %7 = vector.extract_strided_slice %4 {offsets = [0, 8], sizes = [16, 8], strides = [1, 1]} : vector<16x128xf32> to vector<16x8xf32>
    %8 = arith.maximumf %6, %7 : vector<16x8xf32>
    %9 = vector.extract_strided_slice %4 {offsets = [0, 16], sizes = [16, 8], strides = [1, 1]} : vector<16x128xf32> to vector<16x8xf32>
    %10 = arith.maximumf %8, %9 : vector<16x8xf32>
    %11 = vector.extract_strided_slice %4 {offsets = [0, 24], sizes = [16, 8], strides = [1, 1]} : vector<16x128xf32> to vector<16x8xf32>
    %12 = arith.maximumf %10, %11 : vector<16x8xf32>
    %13 = vector.extract_strided_slice %4 {offsets = [0, 32], sizes = [16, 8], strides = [1, 1]} : vector<16x128xf32> to vector<16x8xf32>
    %14 = arith.maximumf %12, %13 : vector<16x8xf32>
    %15 = vector.extract_strided_slice %4 {offsets = [0, 40], sizes = [16, 8], strides = [1, 1]} : vector<16x128xf32> to vector<16x8xf32>
    %16 = arith.maximumf %14, %15 : vector<16x8xf32>
    %17 = vector.broadcast %5 : vector<1x8xf32> to vector<16x8xf32>
    %18 = arith.addf %16, %17 : vector<16x8xf32>
    %cst_6 = arith.constant 0.000000e+00 : f32
    %19 = vector.broadcast %cst_6 : f32 to vector<16x8xf32>
    %20 = arith.maximumf %18, %19 : vector<16x8xf32>
    %21 = vector.extract_strided_slice %1 {offsets = [0, 8], sizes = [1, 8], strides = [1, 1]} : vector<1x128xf32> to vector<1x8xf32>
    %22 = vector.extract_strided_slice %4 {offsets = [0, 48], sizes = [16, 8], strides = [1, 1]} : vector<16x128xf32> to vector<16x8xf32>
    %23 = vector.extract_strided_slice %4 {offsets = [0, 56], sizes = [16, 8], strides = [1, 1]} : vector<16x128xf32> to vector<16x8xf32>
    %24 = arith.maximumf %22, %23 : vector<16x8xf32>
    %25 = vector.extract_strided_slice %4 {offsets = [0, 64], sizes = [16, 8], strides = [1, 1]} : vector<16x128xf32> to vector<16x8xf32>
    %26 = arith.maximumf %24, %25 : vector<16x8xf32>
    %27 = vector.extract_strided_slice %4 {offsets = [0, 72], sizes = [16, 8], strides = [1, 1]} : vector<16x128xf32> to vector<16x8xf32>
    %28 = arith.maximumf %26, %27 : vector<16x8xf32>
    %29 = vector.extract_strided_slice %4 {offsets = [0, 80], sizes = [16, 8], strides = [1, 1]} : vector<16x128xf32> to vector<16x8xf32>
    %30 = arith.maximumf %28, %29 : vector<16x8xf32>
    %31 = vector.broadcast %21 : vector<1x8xf32> to vector<16x8xf32>
    %32 = arith.addf %30, %31 : vector<16x8xf32>
    %cst_7 = arith.constant 0.000000e+00 : f32
    %33 = vector.broadcast %cst_7 : f32 to vector<16x8xf32>
    %34 = arith.maximumf %32, %33 : vector<16x8xf32>
    %c56 = arith.constant 56 : index
    %c0_8 = arith.constant 0 : index
    %35 = vector.load %arg4[%c56, %c0_8] : memref<648x128xf32, #tpu.memory_space<vmem>>, vector<80x128xf32>
    %36 = vector.extract_strided_slice %35 {offsets = [0, 0], sizes = [64, 128], strides = [1, 1]} : vector<80x128xf32> to vector<64x128xf32>
    %cst_9 = arith.constant dense<0.000000e+00> : vector<16x128xf32>
    %37 = tpu.matmul %0, %36, %cst_9 {dimension_numbers = #tpu.dot_dimension_numbers<[1], [0], [0], [1], [0, 0, 1, 1], [], []>} : vector<16x64xf32>, vector<64x128xf32>, vector<16x128xf32> -> vector<16x128xf32>
    %38 = vector.extract_strided_slice %35 {offsets = [64, 0], sizes = [8, 128], strides = [1, 1]} : vector<80x128xf32> to vector<8x128xf32>
    %cst_10 = arith.constant dense<0.000000e+00> : vector<16x128xf32>
    %39 = tpu.matmul %20, %38, %cst_10 {dimension_numbers = #tpu.dot_dimension_numbers<[1], [0], [0], [1], [0, 0, 1, 1], [], []>} : vector<16x8xf32>, vector<8x128xf32>, vector<16x128xf32> -> vector<16x128xf32>
    %40 = arith.addf %37, %39 : vector<16x128xf32>
    %41 = vector.extract_strided_slice %35 {offsets = [72, 0], sizes = [8, 128], strides = [1, 1]} : vector<80x128xf32> to vector<8x128xf32>
    %cst_11 = arith.constant dense<0.000000e+00> : vector<16x128xf32>
    %42 = tpu.matmul %34, %41, %cst_11 {dimension_numbers = #tpu.dot_dimension_numbers<[1], [0], [0], [1], [0, 0, 1, 1], [], []>} : vector<16x8xf32>, vector<8x128xf32>, vector<16x128xf32> -> vector<16x128xf32>
    %43 = arith.addf %40, %42 : vector<16x128xf32>
    %c280 = arith.constant 280 : index
    %c0_12 = arith.constant 0 : index
    %44 = vector.load %arg4[%c280, %c0_12] : memref<648x128xf32, #tpu.memory_space<vmem>>, vector<1x128xf32>
    %45 = vector.broadcast %44 : vector<1x128xf32> to vector<16x128xf32>
    %46 = arith.addf %43, %45 : vector<16x128xf32>
    %c168 = arith.constant 168 : index
    %c0_13 = arith.constant 0 : index
    %47 = vector.load %arg4[%c168, %c0_13] : memref<648x128xf32, #tpu.memory_space<vmem>>, vector<80x128xf32>
    %48 = vector.extract_strided_slice %47 {offsets = [0, 0], sizes = [64, 128], strides = [1, 1]} : vector<80x128xf32> to vector<64x128xf32>
    %cst_14 = arith.constant dense<0.000000e+00> : vector<16x128xf32>
    %49 = tpu.matmul %0, %48, %cst_14 {dimension_numbers = #tpu.dot_dimension_numbers<[1], [0], [0], [1], [0, 0, 1, 1], [], []>} : vector<16x64xf32>, vector<64x128xf32>, vector<16x128xf32> -> vector<16x128xf32>
    %50 = vector.extract_strided_slice %47 {offsets = [64, 0], sizes = [8, 128], strides = [1, 1]} : vector<80x128xf32> to vector<8x128xf32>
    %cst_15 = arith.constant dense<0.000000e+00> : vector<16x128xf32>
    %51 = tpu.matmul %20, %50, %cst_15 {dimension_numbers = #tpu.dot_dimension_numbers<[1], [0], [0], [1], [0, 0, 1, 1], [], []>} : vector<16x8xf32>, vector<8x128xf32>, vector<16x128xf32> -> vector<16x128xf32>
    %52 = arith.addf %49, %51 : vector<16x128xf32>
    %53 = vector.extract_strided_slice %47 {offsets = [72, 0], sizes = [8, 128], strides = [1, 1]} : vector<80x128xf32> to vector<8x128xf32>
    %cst_16 = arith.constant dense<0.000000e+00> : vector<16x128xf32>
    %54 = tpu.matmul %34, %53, %cst_16 {dimension_numbers = #tpu.dot_dimension_numbers<[1], [0], [0], [1], [0, 0, 1, 1], [], []>} : vector<16x8xf32>, vector<8x128xf32>, vector<16x128xf32> -> vector<16x128xf32>
    %55 = arith.addf %52, %54 : vector<16x128xf32>
    %c288 = arith.constant 288 : index
    %c0_17 = arith.constant 0 : index
    %56 = vector.load %arg4[%c288, %c0_17] : memref<648x128xf32, #tpu.memory_space<vmem>>, vector<1x128xf32>
    %57 = vector.broadcast %56 : vector<1x128xf32> to vector<16x128xf32>
    %58 = arith.addf %55, %57 : vector<16x128xf32>
    %cst_18 = arith.constant 0.000000e+00 : f32
    %59 = vector.broadcast %cst_18 : f32 to vector<16x64xf32>
    %c0_19 = arith.constant 0 : index
    %c0_20 = arith.constant 0 : index
    %60 = vector.load %arg6[%c0_19, %c0_20] : memref<16x64xf32, #tpu.memory_space<vmem>>, vector<16x64xf32>
    tpu.vector_store %arg6[%c0_19, %c0_20], %59 {strides = array<i32>} : memref<16x64xf32, #tpu.memory_space<vmem>>, vector<16x64xf32>,
    %c136 = arith.constant 136 : index
    %c0_21 = arith.constant 0 : index
    %61 = vector.load %arg4[%c136, %c0_21] : memref<648x128xf32, #tpu.memory_space<vmem>>, vector<32x128xf32>
    %cst_22 = arith.constant 0.000000e+00 : f32
    %62 = vector.broadcast %cst_22 : f32 to vector<8x32xf32>
    %cst_23 = arith.constant 0.000000e+00 : f32
    %63 = vector.broadcast %cst_23 : f32 to vector<8x32xf32>
    %64 = vector.extract_strided_slice %46 {offsets = [0, 0], sizes = [1, 128], strides = [1, 1]} : vector<16x128xf32> to vector<1x128xf32>
    %cst_24 = arith.constant dense<0.000000e+00> : vector<8x128xf32>
    %65 = tpu.matmul %62, %61, %cst_24 {dimension_numbers = #tpu.dot_dimension_numbers<[1], [0], [0], [1], [0, 0, 1, 1], [], []>} : vector<8x32xf32>, vector<32x128xf32>, vector<8x128xf32> -> vector<8x128xf32>
    %66 = vector.broadcast %64 : vector<1x128xf32> to vector<8x128xf32>
    %67 = arith.addf %66, %65 : vector<8x128xf32>
    %68 = vector.extract_strided_slice %67 {offsets = [0, 0], sizes = [8, 32], strides = [1, 1]} : vector<8x128xf32> to vector<8x32xf32>
    %cst_25 = arith.constant 0.000000e+00 : f32
    %69 = vector.broadcast %cst_25 : f32 to vector<8x32xf32>
    %70 = arith.subf %69, %68 : vector<8x32xf32>
    %71 = math.exp %70 : vector<8x32xf32>
    %cst_26 = arith.constant 1.000000e+00 : f32
    %72 = vector.broadcast %cst_26 : f32 to vector<8x32xf32>
    %73 = arith.addf %72, %71 : vector<8x32xf32>
    %cst_27 = arith.constant 1.000000e+00 : f32
    %74 = vector.broadcast %cst_27 : f32 to vector<8x32xf32>
    %75 = arith.divf %74, %73 : vector<8x32xf32>
    %76 = vector.extract_strided_slice %67 {offsets = [0, 32], sizes = [8, 32], strides = [1, 1]} : vector<8x128xf32> to vector<8x32xf32>
    %cst_28 = arith.constant 0.000000e+00 : f32
    %77 = vector.broadcast %cst_28 : f32 to vector<8x32xf32>
    %78 = arith.subf %77, %76 : vector<8x32xf32>
    %79 = math.exp %78 : vector<8x32xf32>
    %cst_29 = arith.constant 1.000000e+00 : f32
    %80 = vector.broadcast %cst_29 : f32 to vector<8x32xf32>
    %81 = arith.addf %80, %79 : vector<8x32xf32>
    %cst_30 = arith.constant 1.000000e+00 : f32
    %82 = vector.broadcast %cst_30 : f32 to vector<8x32xf32>
    %83 = arith.divf %82, %81 : vector<8x32xf32>
    %84 = vector.extract_strided_slice %67 {offsets = [0, 64], sizes = [8, 32], strides = [1, 1]} : vector<8x128xf32> to vector<8x32xf32>
    %85 = math.tanh %84 : vector<8x32xf32>
    %86 = vector.extract_strided_slice %67 {offsets = [0, 96], sizes = [8, 32], strides = [1, 1]} : vector<8x128xf32> to vector<8x32xf32>
    %cst_31 = arith.constant 0.000000e+00 : f32
    %87 = vector.broadcast %cst_31 : f32 to vector<8x32xf32>
    %88 = arith.subf %87, %86 : vector<8x32xf32>
    %89 = math.exp %88 : vector<8x32xf32>
    %cst_32 = arith.constant 1.000000e+00 : f32
    %90 = vector.broadcast %cst_32 : f32 to vector<8x32xf32>
    %91 = arith.addf %90, %89 : vector<8x32xf32>
    %cst_33 = arith.constant 1.000000e+00 : f32
    %92 = vector.broadcast %cst_33 : f32 to vector<8x32xf32>
    %93 = arith.divf %92, %91 : vector<8x32xf32>
    %94 = arith.mulf %83, %63 : vector<8x32xf32>
    %95 = arith.mulf %75, %85 : vector<8x32xf32>
    %96 = arith.addf %94, %95 : vector<8x32xf32>
    %97 = math.tanh %96 : vector<8x32xf32>
    %98 = arith.mulf %93, %97 : vector<8x32xf32>
    %99 = vector.extract_strided_slice %98 {offsets = [0, 0], sizes = [1, 32], strides = [1, 1]} : vector<8x32xf32> to vector<1x32xf32>
    %c0_34 = arith.constant 0 : index
    %c0_35 = arith.constant 0 : index
    %100 = vector.load %arg6[%c0_34, %c0_35] : memref<16x64xf32, #tpu.memory_space<vmem>>, vector<1x32xf32>
    tpu.vector_store %arg6[%c0_34, %c0_35], %99 {strides = array<i32>} : memref<16x64xf32, #tpu.memory_space<vmem>>, vector<1x32xf32>,
    %101 = vector.extract_strided_slice %46 {offsets = [1, 0], sizes = [1, 128], strides = [1, 1]} : vector<16x128xf32> to vector<1x128xf32>
    %cst_36 = arith.constant dense<0.000000e+00> : vector<8x128xf32>
    %102 = tpu.matmul %98, %61, %cst_36 {dimension_numbers = #tpu.dot_dimension_numbers<[1], [0], [0], [1], [0, 0, 1, 1], [], []>} : vector<8x32xf32>, vector<32x128xf32>, vector<8x128xf32> -> vector<8x128xf32>
    %103 = vector.broadcast %101 : vector<1x128xf32> to vector<8x128xf32>
    %104 = arith.addf %103, %102 : vector<8x128xf32>
    %105 = vector.extract_strided_slice %104 {offsets = [0, 0], sizes = [8, 32], strides = [1, 1]} : vector<8x128xf32> to vector<8x32xf32>
    %cst_37 = arith.constant 0.000000e+00 : f32
    %106 = vector.broadcast %cst_37 : f32 to vector<8x32xf32>
    %107 = arith.subf %106, %105 : vector<8x32xf32>
    %108 = math.exp %107 : vector<8x32xf32>
    %cst_38 = arith.constant 1.000000e+00 : f32
    %109 = vector.broadcast %cst_38 : f32 to vector<8x32xf32>
    %110 = arith.addf %109, %108 : vector<8x32xf32>
    %cst_39 = arith.constant 1.000000e+00 : f32
    %111 = vector.broadcast %cst_39 : f32 to vector<8x32xf32>
    %112 = arith.divf %111, %110 : vector<8x32xf32>
    %113 = vector.extract_strided_slice %104 {offsets = [0, 32], sizes = [8, 32], strides = [1, 1]} : vector<8x128xf32> to vector<8x32xf32>
    %cst_40 = arith.constant 0.000000e+00 : f32
    %114 = vector.broadcast %cst_40 : f32 to vector<8x32xf32>
    %115 = arith.subf %114, %113 : vector<8x32xf32>
    %116 = math.exp %115 : vector<8x32xf32>
    %cst_41 = arith.constant 1.000000e+00 : f32
    %117 = vector.broadcast %cst_41 : f32 to vector<8x32xf32>
    %118 = arith.addf %117, %116 : vector<8x32xf32>
    %cst_42 = arith.constant 1.000000e+00 : f32
    %119 = vector.broadcast %cst_42 : f32 to vector<8x32xf32>
    %120 = arith.divf %119, %118 : vector<8x32xf32>
    %121 = vector.extract_strided_slice %104 {offsets = [0, 64], sizes = [8, 32], strides = [1, 1]} : vector<8x128xf32> to vector<8x32xf32>
    %122 = math.tanh %121 : vector<8x32xf32>
    %123 = vector.extract_strided_slice %104 {offsets = [0, 96], sizes = [8, 32], strides = [1, 1]} : vector<8x128xf32> to vector<8x32xf32>
    %cst_43 = arith.constant 0.000000e+00 : f32
    %124 = vector.broadcast %cst_43 : f32 to vector<8x32xf32>
    %125 = arith.subf %124, %123 : vector<8x32xf32>
    %126 = math.exp %125 : vector<8x32xf32>
    %cst_44 = arith.constant 1.000000e+00 : f32
    %127 = vector.broadcast %cst_44 : f32 to vector<8x32xf32>
    %128 = arith.addf %127, %126 : vector<8x32xf32>
    %cst_45 = arith.constant 1.000000e+00 : f32
    %129 = vector.broadcast %cst_45 : f32 to vector<8x32xf32>
    %130 = arith.divf %129, %128 : vector<8x32xf32>
    %131 = arith.mulf %120, %96 : vector<8x32xf32>
    %132 = arith.mulf %112, %122 : vector<8x32xf32>
    %133 = arith.addf %131, %132 : vector<8x32xf32>
    %134 = math.tanh %133 : vector<8x32xf32>
    %135 = arith.mulf %130, %134 : vector<8x32xf32>
    %136 = vector.extract_strided_slice %135 {offsets = [0, 0], sizes = [1, 32], strides = [1, 1]} : vector<8x32xf32> to vector<1x32xf32>
    %c1 = arith.constant 1 : index
    %c0_46 = arith.constant 0 : index
    %137 = vector.load %arg6[%c1, %c0_46] : memref<16x64xf32, #tpu.memory_space<vmem>>, vector<1x32xf32>
    tpu.vector_store %arg6[%c1, %c0_46], %136 {strides = array<i32>} : memref<16x64xf32, #tpu.memory_space<vmem>>, vector<1x32xf32>,
    %138 = vector.extract_strided_slice %46 {offsets = [2, 0], sizes = [1, 128], strides = [1, 1]} : vector<16x128xf32> to vector<1x128xf32>
    %cst_47 = arith.constant dense<0.000000e+00> : vector<8x128xf32>
    %139 = tpu.matmul %135, %61, %cst_47 {dimension_numbers = #tpu.dot_dimension_numbers<[1], [0], [0], [1], [0, 0, 1, 1], [], []>} : vector<8x32xf32>, vector<32x128xf32>, vector<8x128xf32> -> vector<8x128xf32>
    %140 = vector.broadcast %138 : vector<1x128xf32> to vector<8x128xf32>
    %141 = arith.addf %140, %139 : vector<8x128xf32>
    %142 = vector.extract_strided_slice %141 {offsets = [0, 0], sizes = [8, 32], strides = [1, 1]} : vector<8x128xf32> to vector<8x32xf32>
    %cst_48 = arith.constant 0.000000e+00 : f32
    %143 = vector.broadcast %cst_48 : f32 to vector<8x32xf32>
    %144 = arith.subf %143, %142 : vector<8x32xf32>
    %145 = math.exp %144 : vector<8x32xf32>
    %cst_49 = arith.constant 1.000000e+00 : f32
    %146 = vector.broadcast %cst_49 : f32 to vector<8x32xf32>
    %147 = arith.addf %146, %145 : vector<8x32xf32>
    %cst_50 = arith.constant 1.000000e+00 : f32
    %148 = vector.broadcast %cst_50 : f32 to vector<8x32xf32>
    %149 = arith.divf %148, %147 : vector<8x32xf32>
    %150 = vector.extract_strided_slice %141 {offsets = [0, 32], sizes = [8, 32], strides = [1, 1]} : vector<8x128xf32> to vector<8x32xf32>
    %cst_51 = arith.constant 0.000000e+00 : f32
    %151 = vector.broadcast %cst_51 : f32 to vector<8x32xf32>
    %152 = arith.subf %151, %150 : vector<8x32xf32>
    %153 = math.exp %152 : vector<8x32xf32>
    %cst_52 = arith.constant 1.000000e+00 : f32
    %154 = vector.broadcast %cst_52 : f32 to vector<8x32xf32>
    %155 = arith.addf %154, %153 : vector<8x32xf32>
    %cst_53 = arith.constant 1.000000e+00 : f32
    %156 = vector.broadcast %cst_53 : f32 to vector<8x32xf32>
    %157 = arith.divf %156, %155 : vector<8x32xf32>
    %158 = vector.extract_strided_slice %141 {offsets = [0, 64], sizes = [8, 32], strides = [1, 1]} : vector<8x128xf32> to vector<8x32xf32>
    %159 = math.tanh %158 : vector<8x32xf32>
    %160 = vector.extract_strided_slice %141 {offsets = [0, 96], sizes = [8, 32], strides = [1, 1]} : vector<8x128xf32> to vector<8x32xf32>
    %cst_54 = arith.constant 0.000000e+00 : f32
    %161 = vector.broadcast %cst_54 : f32 to vector<8x32xf32>
    %162 = arith.subf %161, %160 : vector<8x32xf32>
    %163 = math.exp %162 : vector<8x32xf32>
    %cst_55 = arith.constant 1.000000e+00 : f32
    %164 = vector.broadcast %cst_55 : f32 to vector<8x32xf32>
    %165 = arith.addf %164, %163 : vector<8x32xf32>
    %cst_56 = arith.constant 1.000000e+00 : f32
    %166 = vector.broadcast %cst_56 : f32 to vector<8x32xf32>
    %167 = arith.divf %166, %165 : vector<8x32xf32>
    %168 = arith.mulf %157, %133 : vector<8x32xf32>
    %169 = arith.mulf %149, %159 : vector<8x32xf32>
    %170 = arith.addf %168, %169 : vector<8x32xf32>
    %171 = math.tanh %170 : vector<8x32xf32>
    %172 = arith.mulf %167, %171 : vector<8x32xf32>
    %173 = vector.extract_strided_slice %172 {offsets = [0, 0], sizes = [1, 32], strides = [1, 1]} : vector<8x32xf32> to vector<1x32xf32>
    %c2 = arith.constant 2 : index
    %c0_57 = arith.constant 0 : index
    %174 = vector.load %arg6[%c2, %c0_57] : memref<16x64xf32, #tpu.memory_space<vmem>>, vector<1x32xf32>
    tpu.vector_store %arg6[%c2, %c0_57], %173 {strides = array<i32>} : memref<16x64xf32, #tpu.memory_space<vmem>>, vector<1x32xf32>,
    %175 = vector.extract_strided_slice %46 {offsets = [3, 0], sizes = [1, 128], strides = [1, 1]} : vector<16x128xf32> to vector<1x128xf32>
    %cst_58 = arith.constant dense<0.000000e+00> : vector<8x128xf32>
    %176 = tpu.matmul %172, %61, %cst_58 {dimension_numbers = #tpu.dot_dimension_numbers<[1], [0], [0], [1], [0, 0, 1, 1], [], []>} : vector<8x32xf32>, vector<32x128xf32>, vector<8x128xf32> -> vector<8x128xf32>
    %177 = vector.broadcast %175 : vector<1x128xf32> to vector<8x128xf32>
    %178 = arith.addf %177, %176 : vector<8x128xf32>
    %179 = vector.extract_strided_slice %178 {offsets = [0, 0], sizes = [8, 32], strides = [1, 1]} : vector<8x128xf32> to vector<8x32xf32>
    %cst_59 = arith.constant 0.000000e+00 : f32
    %180 = vector.broadcast %cst_59 : f32 to vector<8x32xf32>
    %181 = arith.subf %180, %179 : vector<8x32xf32>
    %182 = math.exp %181 : vector<8x32xf32>
    %cst_60 = arith.constant 1.000000e+00 : f32
    %183 = vector.broadcast %cst_60 : f32 to vector<8x32xf32>
    %184 = arith.addf %183, %182 : vector<8x32xf32>
    %cst_61 = arith.constant 1.000000e+00 : f32
    %185 = vector.broadcast %cst_61 : f32 to vector<8x32xf32>
    %186 = arith.divf %185, %184 : vector<8x32xf32>
    %187 = vector.extract_strided_slice %178 {offsets = [0, 32], sizes = [8, 32], strides = [1, 1]} : vector<8x128xf32> to vector<8x32xf32>
    %cst_62 = arith.constant 0.000000e+00 : f32
    %188 = vector.broadcast %cst_62 : f32 to vector<8x32xf32>
    %189 = arith.subf %188, %187 : vector<8x32xf32>
    %190 = math.exp %189 : vector<8x32xf32>
    %cst_63 = arith.constant 1.000000e+00 : f32
    %191 = vector.broadcast %cst_63 : f32 to vector<8x32xf32>
    %192 = arith.addf %191, %190 : vector<8x32xf32>
    %cst_64 = arith.constant 1.000000e+00 : f32
    %193 = vector.broadcast %cst_64 : f32 to vector<8x32xf32>
    %194 = arith.divf %193, %192 : vector<8x32xf32>
    %195 = vector.extract_strided_slice %178 {offsets = [0, 64], sizes = [8, 32], strides = [1, 1]} : vector<8x128xf32> to vector<8x32xf32>
    %196 = math.tanh %195 : vector<8x32xf32>
    %197 = vector.extract_strided_slice %178 {offsets = [0, 96], sizes = [8, 32], strides = [1, 1]} : vector<8x128xf32> to vector<8x32xf32>
    %cst_65 = arith.constant 0.000000e+00 : f32
    %198 = vector.broadcast %cst_65 : f32 to vector<8x32xf32>
    %199 = arith.subf %198, %197 : vector<8x32xf32>
    %200 = math.exp %199 : vector<8x32xf32>
    %cst_66 = arith.constant 1.000000e+00 : f32
    %201 = vector.broadcast %cst_66 : f32 to vector<8x32xf32>
    %202 = arith.addf %201, %200 : vector<8x32xf32>
    %cst_67 = arith.constant 1.000000e+00 : f32
    %203 = vector.broadcast %cst_67 : f32 to vector<8x32xf32>
    %204 = arith.divf %203, %202 : vector<8x32xf32>
    %205 = arith.mulf %194, %170 : vector<8x32xf32>
    %206 = arith.mulf %186, %196 : vector<8x32xf32>
    %207 = arith.addf %205, %206 : vector<8x32xf32>
    %208 = math.tanh %207 : vector<8x32xf32>
    %209 = arith.mulf %204, %208 : vector<8x32xf32>
    %210 = vector.extract_strided_slice %209 {offsets = [0, 0], sizes = [1, 32], strides = [1, 1]} : vector<8x32xf32> to vector<1x32xf32>
    %c3 = arith.constant 3 : index
    %c0_68 = arith.constant 0 : index
    %211 = vector.load %arg6[%c3, %c0_68] : memref<16x64xf32, #tpu.memory_space<vmem>>, vector<1x32xf32>
    tpu.vector_store %arg6[%c3, %c0_68], %210 {strides = array<i32>} : memref<16x64xf32, #tpu.memory_space<vmem>>, vector<1x32xf32>,
    %212 = vector.extract_strided_slice %46 {offsets = [4, 0], sizes = [1, 128], strides = [1, 1]} : vector<16x128xf32> to vector<1x128xf32>
    %cst_69 = arith.constant dense<0.000000e+00> : vector<8x128xf32>
    %213 = tpu.matmul %209, %61, %cst_69 {dimension_numbers = #tpu.dot_dimension_numbers<[1], [0], [0], [1], [0, 0, 1, 1], [], []>} : vector<8x32xf32>, vector<32x128xf32>, vector<8x128xf32> -> vector<8x128xf32>
    %214 = vector.broadcast %212 : vector<1x128xf32> to vector<8x128xf32>
    %215 = arith.addf %214, %213 : vector<8x128xf32>
    %216 = vector.extract_strided_slice %215 {offsets = [0, 0], sizes = [8, 32], strides = [1, 1]} : vector<8x128xf32> to vector<8x32xf32>
    %cst_70 = arith.constant 0.000000e+00 : f32
    %217 = vector.broadcast %cst_70 : f32 to vector<8x32xf32>
    %218 = arith.subf %217, %216 : vector<8x32xf32>
    %219 = math.exp %218 : vector<8x32xf32>
    %cst_71 = arith.constant 1.000000e+00 : f32
    %220 = vector.broadcast %cst_71 : f32 to vector<8x32xf32>
    %221 = arith.addf %220, %219 : vector<8x32xf32>
    %cst_72 = arith.constant 1.000000e+00 : f32
    %222 = vector.broadcast %cst_72 : f32 to vector<8x32xf32>
    %223 = arith.divf %222, %221 : vector<8x32xf32>
    %224 = vector.extract_strided_slice %215 {offsets = [0, 32], sizes = [8, 32], strides = [1, 1]} : vector<8x128xf32> to vector<8x32xf32>
    %cst_73 = arith.constant 0.000000e+00 : f32
    %225 = vector.broadcast %cst_73 : f32 to vector<8x32xf32>
    %226 = arith.subf %225, %224 : vector<8x32xf32>
    %227 = math.exp %226 : vector<8x32xf32>
    %cst_74 = arith.constant 1.000000e+00 : f32
    %228 = vector.broadcast %cst_74 : f32 to vector<8x32xf32>
    %229 = arith.addf %228, %227 : vector<8x32xf32>
    %cst_75 = arith.constant 1.000000e+00 : f32
    %230 = vector.broadcast %cst_75 : f32 to vector<8x32xf32>
    %231 = arith.divf %230, %229 : vector<8x32xf32>
    %232 = vector.extract_strided_slice %215 {offsets = [0, 64], sizes = [8, 32], strides = [1, 1]} : vector<8x128xf32> to vector<8x32xf32>
    %233 = math.tanh %232 : vector<8x32xf32>
    %234 = vector.extract_strided_slice %215 {offsets = [0, 96], sizes = [8, 32], strides = [1, 1]} : vector<8x128xf32> to vector<8x32xf32>
    %cst_76 = arith.constant 0.000000e+00 : f32
    %235 = vector.broadcast %cst_76 : f32 to vector<8x32xf32>
    %236 = arith.subf %235, %234 : vector<8x32xf32>
    %237 = math.exp %236 : vector<8x32xf32>
    %cst_77 = arith.constant 1.000000e+00 : f32
    %238 = vector.broadcast %cst_77 : f32 to vector<8x32xf32>
    %239 = arith.addf %238, %237 : vector<8x32xf32>
    %cst_78 = arith.constant 1.000000e+00 : f32
    %240 = vector.broadcast %cst_78 : f32 to vector<8x32xf32>
    %241 = arith.divf %240, %239 : vector<8x32xf32>
    %242 = arith.mulf %231, %207 : vector<8x32xf32>
    %243 = arith.mulf %223, %233 : vector<8x32xf32>
    %244 = arith.addf %242, %243 : vector<8x32xf32>
    %245 = math.tanh %244 : vector<8x32xf32>
    %246 = arith.mulf %241, %245 : vector<8x32xf32>
    %247 = vector.extract_strided_slice %246 {offsets = [0, 0], sizes = [1, 32], strides = [1, 1]} : vector<8x32xf32> to vector<1x32xf32>
    %c4 = arith.constant 4 : index
    %c0_79 = arith.constant 0 : index
    %248 = vector.load %arg6[%c4, %c0_79] : memref<16x64xf32, #tpu.memory_space<vmem>>, vector<1x32xf32>
    tpu.vector_store %arg6[%c4, %c0_79], %247 {strides = array<i32>} : memref<16x64xf32, #tpu.memory_space<vmem>>, vector<1x32xf32>,
    %249 = vector.extract_strided_slice %46 {offsets = [5, 0], sizes = [1, 128], strides = [1, 1]} : vector<16x128xf32> to vector<1x128xf32>
    %cst_80 = arith.constant dense<0.000000e+00> : vector<8x128xf32>
    %250 = tpu.matmul %246, %61, %cst_80 {dimension_numbers = #tpu.dot_dimension_numbers<[1], [0], [0], [1], [0, 0, 1, 1], [], []>} : vector<8x32xf32>, vector<32x128xf32>, vector<8x128xf32> -> vector<8x128xf32>
    %251 = vector.broadcast %249 : vector<1x128xf32> to vector<8x128xf32>
    %252 = arith.addf %251, %250 : vector<8x128xf32>
    %253 = vector.extract_strided_slice %252 {offsets = [0, 0], sizes = [8, 32], strides = [1, 1]} : vector<8x128xf32> to vector<8x32xf32>
    %cst_81 = arith.constant 0.000000e+00 : f32
    %254 = vector.broadcast %cst_81 : f32 to vector<8x32xf32>
    %255 = arith.subf %254, %253 : vector<8x32xf32>
    %256 = math.exp %255 : vector<8x32xf32>
    %cst_82 = arith.constant 1.000000e+00 : f32
    %257 = vector.broadcast %cst_82 : f32 to vector<8x32xf32>
    %258 = arith.addf %257, %256 : vector<8x32xf32>
    %cst_83 = arith.constant 1.000000e+00 : f32
    %259 = vector.broadcast %cst_83 : f32 to vector<8x32xf32>
    %260 = arith.divf %259, %258 : vector<8x32xf32>
    %261 = vector.extract_strided_slice %252 {offsets = [0, 32], sizes = [8, 32], strides = [1, 1]} : vector<8x128xf32> to vector<8x32xf32>
    %cst_84 = arith.constant 0.000000e+00 : f32
    %262 = vector.broadcast %cst_84 : f32 to vector<8x32xf32>
    %263 = arith.subf %262, %261 : vector<8x32xf32>
    %264 = math.exp %263 : vector<8x32xf32>
    %cst_85 = arith.constant 1.000000e+00 : f32
    %265 = vector.broadcast %cst_85 : f32 to vector<8x32xf32>
    %266 = arith.addf %265, %264 : vector<8x32xf32>
    %cst_86 = arith.constant 1.000000e+00 : f32
    %267 = vector.broadcast %cst_86 : f32 to vector<8x32xf32>
    %268 = arith.divf %267, %266 : vector<8x32xf32>
    %269 = vector.extract_strided_slice %252 {offsets = [0, 64], sizes = [8, 32], strides = [1, 1]} : vector<8x128xf32> to vector<8x32xf32>
    %270 = math.tanh %269 : vector<8x32xf32>
    %271 = vector.extract_strided_slice %252 {offsets = [0, 96], sizes = [8, 32], strides = [1, 1]} : vector<8x128xf32> to vector<8x32xf32>
    %cst_87 = arith.constant 0.000000e+00 : f32
    %272 = vector.broadcast %cst_87 : f32 to vector<8x32xf32>
    %273 = arith.subf %272, %271 : vector<8x32xf32>
    %274 = math.exp %273 : vector<8x32xf32>
    %cst_88 = arith.constant 1.000000e+00 : f32
    %275 = vector.broadcast %cst_88 : f32 to vector<8x32xf32>
    %276 = arith.addf %275, %274 : vector<8x32xf32>
    %cst_89 = arith.constant 1.000000e+00 : f32
    %277 = vector.broadcast %cst_89 : f32 to vector<8x32xf32>
    %278 = arith.divf %277, %276 : vector<8x32xf32>
    %279 = arith.mulf %268, %244 : vector<8x32xf32>
    %280 = arith.mulf %260, %270 : vector<8x32xf32>
    %281 = arith.addf %279, %280 : vector<8x32xf32>
    %282 = math.tanh %281 : vector<8x32xf32>
    %283 = arith.mulf %278, %282 : vector<8x32xf32>
    %284 = vector.extract_strided_slice %283 {offsets = [0, 0], sizes = [1, 32], strides = [1, 1]} : vector<8x32xf32> to vector<1x32xf32>
    %c5 = arith.constant 5 : index
    %c0_90 = arith.constant 0 : index
    %285 = vector.load %arg6[%c5, %c0_90] : memref<16x64xf32, #tpu.memory_space<vmem>>, vector<1x32xf32>
    tpu.vector_store %arg6[%c5, %c0_90], %284 {strides = array<i32>} : memref<16x64xf32, #tpu.memory_space<vmem>>, vector<1x32xf32>,
    %286 = vector.extract_strided_slice %46 {offsets = [6, 0], sizes = [1, 128], strides = [1, 1]} : vector<16x128xf32> to vector<1x128xf32>
    %cst_91 = arith.constant dense<0.000000e+00> : vector<8x128xf32>
    %287 = tpu.matmul %283, %61, %cst_91 {dimension_numbers = #tpu.dot_dimension_numbers<[1], [0], [0], [1], [0, 0, 1, 1], [], []>} : vector<8x32xf32>, vector<32x128xf32>, vector<8x128xf32> -> vector<8x128xf32>
    %288 = vector.broadcast %286 : vector<1x128xf32> to vector<8x128xf32>
    %289 = arith.addf %288, %287 : vector<8x128xf32>
    %290 = vector.extract_strided_slice %289 {offsets = [0, 0], sizes = [8, 32], strides = [1, 1]} : vector<8x128xf32> to vector<8x32xf32>
    %cst_92 = arith.constant 0.000000e+00 : f32
    %291 = vector.broadcast %cst_92 : f32 to vector<8x32xf32>
    %292 = arith.subf %291, %290 : vector<8x32xf32>
    %293 = math.exp %292 : vector<8x32xf32>
    %cst_93 = arith.constant 1.000000e+00 : f32
    %294 = vector.broadcast %cst_93 : f32 to vector<8x32xf32>
    %295 = arith.addf %294, %293 : vector<8x32xf32>
    %cst_94 = arith.constant 1.000000e+00 : f32
    %296 = vector.broadcast %cst_94 : f32 to vector<8x32xf32>
    %297 = arith.divf %296, %295 : vector<8x32xf32>
    %298 = vector.extract_strided_slice %289 {offsets = [0, 32], sizes = [8, 32], strides = [1, 1]} : vector<8x128xf32> to vector<8x32xf32>
    %cst_95 = arith.constant 0.000000e+00 : f32
    %299 = vector.broadcast %cst_95 : f32 to vector<8x32xf32>
    %300 = arith.subf %299, %298 : vector<8x32xf32>
    %301 = math.exp %300 : vector<8x32xf32>
    %cst_96 = arith.constant 1.000000e+00 : f32
    %302 = vector.broadcast %cst_96 : f32 to vector<8x32xf32>
    %303 = arith.addf %302, %301 : vector<8x32xf32>
    %cst_97 = arith.constant 1.000000e+00 : f32
    %304 = vector.broadcast %cst_97 : f32 to vector<8x32xf32>
    %305 = arith.divf %304, %303 : vector<8x32xf32>
    %306 = vector.extract_strided_slice %289 {offsets = [0, 64], sizes = [8, 32], strides = [1, 1]} : vector<8x128xf32> to vector<8x32xf32>
    %307 = math.tanh %306 : vector<8x32xf32>
    %308 = vector.extract_strided_slice %289 {offsets = [0, 96], sizes = [8, 32], strides = [1, 1]} : vector<8x128xf32> to vector<8x32xf32>
    %cst_98 = arith.constant 0.000000e+00 : f32
    %309 = vector.broadcast %cst_98 : f32 to vector<8x32xf32>
    %310 = arith.subf %309, %308 : vector<8x32xf32>
    %311 = math.exp %310 : vector<8x32xf32>
    %cst_99 = arith.constant 1.000000e+00 : f32
    %312 = vector.broadcast %cst_99 : f32 to vector<8x32xf32>
    %313 = arith.addf %312, %311 : vector<8x32xf32>
    %cst_100 = arith.constant 1.000000e+00 : f32
    %314 = vector.broadcast %cst_100 : f32 to vector<8x32xf32>
    %315 = arith.divf %314, %313 : vector<8x32xf32>
    %316 = arith.mulf %305, %281 : vector<8x32xf32>
    %317 = arith.mulf %297, %307 : vector<8x32xf32>
    %318 = arith.addf %316, %317 : vector<8x32xf32>
    %319 = math.tanh %318 : vector<8x32xf32>
    %320 = arith.mulf %315, %319 : vector<8x32xf32>
    %321 = vector.extract_strided_slice %320 {offsets = [0, 0], sizes = [1, 32], strides = [1, 1]} : vector<8x32xf32> to vector<1x32xf32>
    %c6 = arith.constant 6 : index
    %c0_101 = arith.constant 0 : index
    %322 = vector.load %arg6[%c6, %c0_101] : memref<16x64xf32, #tpu.memory_space<vmem>>, vector<1x32xf32>
    tpu.vector_store %arg6[%c6, %c0_101], %321 {strides = array<i32>} : memref<16x64xf32, #tpu.memory_space<vmem>>, vector<1x32xf32>,
    %323 = vector.extract_strided_slice %46 {offsets = [7, 0], sizes = [1, 128], strides = [1, 1]} : vector<16x128xf32> to vector<1x128xf32>
    %cst_102 = arith.constant dense<0.000000e+00> : vector<8x128xf32>
    %324 = tpu.matmul %320, %61, %cst_102 {dimension_numbers = #tpu.dot_dimension_numbers<[1], [0], [0], [1], [0, 0, 1, 1], [], []>} : vector<8x32xf32>, vector<32x128xf32>, vector<8x128xf32> -> vector<8x128xf32>
    %325 = vector.broadcast %323 : vector<1x128xf32> to vector<8x128xf32>
    %326 = arith.addf %325, %324 : vector<8x128xf32>
    %327 = vector.extract_strided_slice %326 {offsets = [0, 0], sizes = [8, 32], strides = [1, 1]} : vector<8x128xf32> to vector<8x32xf32>
    %cst_103 = arith.constant 0.000000e+00 : f32
    %328 = vector.broadcast %cst_103 : f32 to vector<8x32xf32>
    %329 = arith.subf %328, %327 : vector<8x32xf32>
    %330 = math.exp %329 : vector<8x32xf32>
    %cst_104 = arith.constant 1.000000e+00 : f32
    %331 = vector.broadcast %cst_104 : f32 to vector<8x32xf32>
    %332 = arith.addf %331, %330 : vector<8x32xf32>
    %cst_105 = arith.constant 1.000000e+00 : f32
    %333 = vector.broadcast %cst_105 : f32 to vector<8x32xf32>
    %334 = arith.divf %333, %332 : vector<8x32xf32>
    %335 = vector.extract_strided_slice %326 {offsets = [0, 32], sizes = [8, 32], strides = [1, 1]} : vector<8x128xf32> to vector<8x32xf32>
    %cst_106 = arith.constant 0.000000e+00 : f32
    %336 = vector.broadcast %cst_106 : f32 to vector<8x32xf32>
    %337 = arith.subf %336, %335 : vector<8x32xf32>
    %338 = math.exp %337 : vector<8x32xf32>
    %cst_107 = arith.constant 1.000000e+00 : f32
    %339 = vector.broadcast %cst_107 : f32 to vector<8x32xf32>
    %340 = arith.addf %339, %338 : vector<8x32xf32>
    %cst_108 = arith.constant 1.000000e+00 : f32
    %341 = vector.broadcast %cst_108 : f32 to vector<8x32xf32>
    %342 = arith.divf %341, %340 : vector<8x32xf32>
    %343 = vector.extract_strided_slice %326 {offsets = [0, 64], sizes = [8, 32], strides = [1, 1]} : vector<8x128xf32> to vector<8x32xf32>
    %344 = math.tanh %343 : vector<8x32xf32>
    %345 = vector.extract_strided_slice %326 {offsets = [0, 96], sizes = [8, 32], strides = [1, 1]} : vector<8x128xf32> to vector<8x32xf32>
    %cst_109 = arith.constant 0.000000e+00 : f32
    %346 = vector.broadcast %cst_109 : f32 to vector<8x32xf32>
    %347 = arith.subf %346, %345 : vector<8x32xf32>
    %348 = math.exp %347 : vector<8x32xf32>
    %cst_110 = arith.constant 1.000000e+00 : f32
    %349 = vector.broadcast %cst_110 : f32 to vector<8x32xf32>
    %350 = arith.addf %349, %348 : vector<8x32xf32>
    %cst_111 = arith.constant 1.000000e+00 : f32
    %351 = vector.broadcast %cst_111 : f32 to vector<8x32xf32>
    %352 = arith.divf %351, %350 : vector<8x32xf32>
    %353 = arith.mulf %342, %318 : vector<8x32xf32>
    %354 = arith.mulf %334, %344 : vector<8x32xf32>
    %355 = arith.addf %353, %354 : vector<8x32xf32>
    %356 = math.tanh %355 : vector<8x32xf32>
    %357 = arith.mulf %352, %356 : vector<8x32xf32>
    %358 = vector.extract_strided_slice %357 {offsets = [0, 0], sizes = [1, 32], strides = [1, 1]} : vector<8x32xf32> to vector<1x32xf32>
    %c7 = arith.constant 7 : index
    %c0_112 = arith.constant 0 : index
    %359 = vector.load %arg6[%c7, %c0_112] : memref<16x64xf32, #tpu.memory_space<vmem>>, vector<1x32xf32>
    tpu.vector_store %arg6[%c7, %c0_112], %358 {strides = array<i32>} : memref<16x64xf32, #tpu.memory_space<vmem>>, vector<1x32xf32>,
    %360 = vector.extract_strided_slice %46 {offsets = [8, 0], sizes = [1, 128], strides = [1, 1]} : vector<16x128xf32> to vector<1x128xf32>
    %cst_113 = arith.constant dense<0.000000e+00> : vector<8x128xf32>
    %361 = tpu.matmul %357, %61, %cst_113 {dimension_numbers = #tpu.dot_dimension_numbers<[1], [0], [0], [1], [0, 0, 1, 1], [], []>} : vector<8x32xf32>, vector<32x128xf32>, vector<8x128xf32> -> vector<8x128xf32>
    %362 = vector.broadcast %360 : vector<1x128xf32> to vector<8x128xf32>
    %363 = arith.addf %362, %361 : vector<8x128xf32>
    %364 = vector.extract_strided_slice %363 {offsets = [0, 0], sizes = [8, 32], strides = [1, 1]} : vector<8x128xf32> to vector<8x32xf32>
    %cst_114 = arith.constant 0.000000e+00 : f32
    %365 = vector.broadcast %cst_114 : f32 to vector<8x32xf32>
    %366 = arith.subf %365, %364 : vector<8x32xf32>
    %367 = math.exp %366 : vector<8x32xf32>
    %cst_115 = arith.constant 1.000000e+00 : f32
    %368 = vector.broadcast %cst_115 : f32 to vector<8x32xf32>
    %369 = arith.addf %368, %367 : vector<8x32xf32>
    %cst_116 = arith.constant 1.000000e+00 : f32
    %370 = vector.broadcast %cst_116 : f32 to vector<8x32xf32>
    %371 = arith.divf %370, %369 : vector<8x32xf32>
    %372 = vector.extract_strided_slice %363 {offsets = [0, 32], sizes = [8, 32], strides = [1, 1]} : vector<8x128xf32> to vector<8x32xf32>
    %cst_117 = arith.constant 0.000000e+00 : f32
    %373 = vector.broadcast %cst_117 : f32 to vector<8x32xf32>
    %374 = arith.subf %373, %372 : vector<8x32xf32>
    %375 = math.exp %374 : vector<8x32xf32>
    %cst_118 = arith.constant 1.000000e+00 : f32
    %376 = vector.broadcast %cst_118 : f32 to vector<8x32xf32>
    %377 = arith.addf %376, %375 : vector<8x32xf32>
    %cst_119 = arith.constant 1.000000e+00 : f32
    %378 = vector.broadcast %cst_119 : f32 to vector<8x32xf32>
    %379 = arith.divf %378, %377 : vector<8x32xf32>
    %380 = vector.extract_strided_slice %363 {offsets = [0, 64], sizes = [8, 32], strides = [1, 1]} : vector<8x128xf32> to vector<8x32xf32>
    %381 = math.tanh %380 : vector<8x32xf32>
    %382 = vector.extract_strided_slice %363 {offsets = [0, 96], sizes = [8, 32], strides = [1, 1]} : vector<8x128xf32> to vector<8x32xf32>
    %cst_120 = arith.constant 0.000000e+00 : f32
    %383 = vector.broadcast %cst_120 : f32 to vector<8x32xf32>
    %384 = arith.subf %383, %382 : vector<8x32xf32>
    %385 = math.exp %384 : vector<8x32xf32>
    %cst_121 = arith.constant 1.000000e+00 : f32
    %386 = vector.broadcast %cst_121 : f32 to vector<8x32xf32>
    %387 = arith.addf %386, %385 : vector<8x32xf32>
    %cst_122 = arith.constant 1.000000e+00 : f32
    %388 = vector.broadcast %cst_122 : f32 to vector<8x32xf32>
    %389 = arith.divf %388, %387 : vector<8x32xf32>
    %390 = arith.mulf %379, %355 : vector<8x32xf32>
    %391 = arith.mulf %371, %381 : vector<8x32xf32>
    %392 = arith.addf %390, %391 : vector<8x32xf32>
    %393 = math.tanh %392 : vector<8x32xf32>
    %394 = arith.mulf %389, %393 : vector<8x32xf32>
    %395 = vector.extract_strided_slice %394 {offsets = [0, 0], sizes = [1, 32], strides = [1, 1]} : vector<8x32xf32> to vector<1x32xf32>
    %c8 = arith.constant 8 : index
    %c0_123 = arith.constant 0 : index
    %396 = vector.load %arg6[%c8, %c0_123] : memref<16x64xf32, #tpu.memory_space<vmem>>, vector<1x32xf32>
    tpu.vector_store %arg6[%c8, %c0_123], %395 {strides = array<i32>} : memref<16x64xf32, #tpu.memory_space<vmem>>, vector<1x32xf32>,
    %397 = vector.extract_strided_slice %46 {offsets = [9, 0], sizes = [1, 128], strides = [1, 1]} : vector<16x128xf32> to vector<1x128xf32>
    %cst_124 = arith.constant dense<0.000000e+00> : vector<8x128xf32>
    %398 = tpu.matmul %394, %61, %cst_124 {dimension_numbers = #tpu.dot_dimension_numbers<[1], [0], [0], [1], [0, 0, 1, 1], [], []>} : vector<8x32xf32>, vector<32x128xf32>, vector<8x128xf32> -> vector<8x128xf32>
    %399 = vector.broadcast %397 : vector<1x128xf32> to vector<8x128xf32>
    %400 = arith.addf %399, %398 : vector<8x128xf32>
    %401 = vector.extract_strided_slice %400 {offsets = [0, 0], sizes = [8, 32], strides = [1, 1]} : vector<8x128xf32> to vector<8x32xf32>
    %cst_125 = arith.constant 0.000000e+00 : f32
    %402 = vector.broadcast %cst_125 : f32 to vector<8x32xf32>
    %403 = arith.subf %402, %401 : vector<8x32xf32>
    %404 = math.exp %403 : vector<8x32xf32>
    %cst_126 = arith.constant 1.000000e+00 : f32
    %405 = vector.broadcast %cst_126 : f32 to vector<8x32xf32>
    %406 = arith.addf %405, %404 : vector<8x32xf32>
    %cst_127 = arith.constant 1.000000e+00 : f32
    %407 = vector.broadcast %cst_127 : f32 to vector<8x32xf32>
    %408 = arith.divf %407, %406 : vector<8x32xf32>
    %409 = vector.extract_strided_slice %400 {offsets = [0, 32], sizes = [8, 32], strides = [1, 1]} : vector<8x128xf32> to vector<8x32xf32>
    %cst_128 = arith.constant 0.000000e+00 : f32
    %410 = vector.broadcast %cst_128 : f32 to vector<8x32xf32>
    %411 = arith.subf %410, %409 : vector<8x32xf32>
    %412 = math.exp %411 : vector<8x32xf32>
    %cst_129 = arith.constant 1.000000e+00 : f32
    %413 = vector.broadcast %cst_129 : f32 to vector<8x32xf32>
    %414 = arith.addf %413, %412 : vector<8x32xf32>
    %cst_130 = arith.constant 1.000000e+00 : f32
    %415 = vector.broadcast %cst_130 : f32 to vector<8x32xf32>
    %416 = arith.divf %415, %414 : vector<8x32xf32>
    %417 = vector.extract_strided_slice %400 {offsets = [0, 64], sizes = [8, 32], strides = [1, 1]} : vector<8x128xf32> to vector<8x32xf32>
    %418 = math.tanh %417 : vector<8x32xf32>
    %419 = vector.extract_strided_slice %400 {offsets = [0, 96], sizes = [8, 32], strides = [1, 1]} : vector<8x128xf32> to vector<8x32xf32>
    %cst_131 = arith.constant 0.000000e+00 : f32
    %420 = vector.broadcast %cst_131 : f32 to vector<8x32xf32>
    %421 = arith.subf %420, %419 : vector<8x32xf32>
    %422 = math.exp %421 : vector<8x32xf32>
    %cst_132 = arith.constant 1.000000e+00 : f32
    %423 = vector.broadcast %cst_132 : f32 to vector<8x32xf32>
    %424 = arith.addf %423, %422 : vector<8x32xf32>
    %cst_133 = arith.constant 1.000000e+00 : f32
    %425 = vector.broadcast %cst_133 : f32 to vector<8x32xf32>
    %426 = arith.divf %425, %424 : vector<8x32xf32>
    %427 = arith.mulf %416, %392 : vector<8x32xf32>
    %428 = arith.mulf %408, %418 : vector<8x32xf32>
    %429 = arith.addf %427, %428 : vector<8x32xf32>
    %430 = math.tanh %429 : vector<8x32xf32>
    %431 = arith.mulf %426, %430 : vector<8x32xf32>
    %432 = vector.extract_strided_slice %431 {offsets = [0, 0], sizes = [1, 32], strides = [1, 1]} : vector<8x32xf32> to vector<1x32xf32>
    %c9 = arith.constant 9 : index
    %c0_134 = arith.constant 0 : index
    %433 = vector.load %arg6[%c9, %c0_134] : memref<16x64xf32, #tpu.memory_space<vmem>>, vector<1x32xf32>
    tpu.vector_store %arg6[%c9, %c0_134], %432 {strides = array<i32>} : memref<16x64xf32, #tpu.memory_space<vmem>>, vector<1x32xf32>,
    %434 = vector.extract_strided_slice %46 {offsets = [10, 0], sizes = [1, 128], strides = [1, 1]} : vector<16x128xf32> to vector<1x128xf32>
    %cst_135 = arith.constant dense<0.000000e+00> : vector<8x128xf32>
    %435 = tpu.matmul %431, %61, %cst_135 {dimension_numbers = #tpu.dot_dimension_numbers<[1], [0], [0], [1], [0, 0, 1, 1], [], []>} : vector<8x32xf32>, vector<32x128xf32>, vector<8x128xf32> -> vector<8x128xf32>
    %436 = vector.broadcast %434 : vector<1x128xf32> to vector<8x128xf32>
    %437 = arith.addf %436, %435 : vector<8x128xf32>
    %438 = vector.extract_strided_slice %437 {offsets = [0, 0], sizes = [8, 32], strides = [1, 1]} : vector<8x128xf32> to vector<8x32xf32>
    %cst_136 = arith.constant 0.000000e+00 : f32
    %439 = vector.broadcast %cst_136 : f32 to vector<8x32xf32>
    %440 = arith.subf %439, %438 : vector<8x32xf32>
    %441 = math.exp %440 : vector<8x32xf32>
    %cst_137 = arith.constant 1.000000e+00 : f32
    %442 = vector.broadcast %cst_137 : f32 to vector<8x32xf32>
    %443 = arith.addf %442, %441 : vector<8x32xf32>
    %cst_138 = arith.constant 1.000000e+00 : f32
    %444 = vector.broadcast %cst_138 : f32 to vector<8x32xf32>
    %445 = arith.divf %444, %443 : vector<8x32xf32>
    %446 = vector.extract_strided_slice %437 {offsets = [0, 32], sizes = [8, 32], strides = [1, 1]} : vector<8x128xf32> to vector<8x32xf32>
    %cst_139 = arith.constant 0.000000e+00 : f32
    %447 = vector.broadcast %cst_139 : f32 to vector<8x32xf32>
    %448 = arith.subf %447, %446 : vector<8x32xf32>
    %449 = math.exp %448 : vector<8x32xf32>
    %cst_140 = arith.constant 1.000000e+00 : f32
    %450 = vector.broadcast %cst_140 : f32 to vector<8x32xf32>
    %451 = arith.addf %450, %449 : vector<8x32xf32>
    %cst_141 = arith.constant 1.000000e+00 : f32
    %452 = vector.broadcast %cst_141 : f32 to vector<8x32xf32>
    %453 = arith.divf %452, %451 : vector<8x32xf32>
    %454 = vector.extract_strided_slice %437 {offsets = [0, 64], sizes = [8, 32], strides = [1, 1]} : vector<8x128xf32> to vector<8x32xf32>
    %455 = math.tanh %454 : vector<8x32xf32>
    %456 = vector.extract_strided_slice %437 {offsets = [0, 96], sizes = [8, 32], strides = [1, 1]} : vector<8x128xf32> to vector<8x32xf32>
    %cst_142 = arith.constant 0.000000e+00 : f32
    %457 = vector.broadcast %cst_142 : f32 to vector<8x32xf32>
    %458 = arith.subf %457, %456 : vector<8x32xf32>
    %459 = math.exp %458 : vector<8x32xf32>
    %cst_143 = arith.constant 1.000000e+00 : f32
    %460 = vector.broadcast %cst_143 : f32 to vector<8x32xf32>
    %461 = arith.addf %460, %459 : vector<8x32xf32>
    %cst_144 = arith.constant 1.000000e+00 : f32
    %462 = vector.broadcast %cst_144 : f32 to vector<8x32xf32>
    %463 = arith.divf %462, %461 : vector<8x32xf32>
    %464 = arith.mulf %453, %429 : vector<8x32xf32>
    %465 = arith.mulf %445, %455 : vector<8x32xf32>
    %466 = arith.addf %464, %465 : vector<8x32xf32>
    %467 = math.tanh %466 : vector<8x32xf32>
    %468 = arith.mulf %463, %467 : vector<8x32xf32>
    %469 = vector.extract_strided_slice %468 {offsets = [0, 0], sizes = [1, 32], strides = [1, 1]} : vector<8x32xf32> to vector<1x32xf32>
    %c10 = arith.constant 10 : index
    %c0_145 = arith.constant 0 : index
    %470 = vector.load %arg6[%c10, %c0_145] : memref<16x64xf32, #tpu.memory_space<vmem>>, vector<1x32xf32>
    tpu.vector_store %arg6[%c10, %c0_145], %469 {strides = array<i32>} : memref<16x64xf32, #tpu.memory_space<vmem>>, vector<1x32xf32>,
    %471 = vector.extract_strided_slice %46 {offsets = [11, 0], sizes = [1, 128], strides = [1, 1]} : vector<16x128xf32> to vector<1x128xf32>
    %cst_146 = arith.constant dense<0.000000e+00> : vector<8x128xf32>
    %472 = tpu.matmul %468, %61, %cst_146 {dimension_numbers = #tpu.dot_dimension_numbers<[1], [0], [0], [1], [0, 0, 1, 1], [], []>} : vector<8x32xf32>, vector<32x128xf32>, vector<8x128xf32> -> vector<8x128xf32>
    %473 = vector.broadcast %471 : vector<1x128xf32> to vector<8x128xf32>
    %474 = arith.addf %473, %472 : vector<8x128xf32>
    %475 = vector.extract_strided_slice %474 {offsets = [0, 0], sizes = [8, 32], strides = [1, 1]} : vector<8x128xf32> to vector<8x32xf32>
    %cst_147 = arith.constant 0.000000e+00 : f32
    %476 = vector.broadcast %cst_147 : f32 to vector<8x32xf32>
    %477 = arith.subf %476, %475 : vector<8x32xf32>
    %478 = math.exp %477 : vector<8x32xf32>
    %cst_148 = arith.constant 1.000000e+00 : f32
    %479 = vector.broadcast %cst_148 : f32 to vector<8x32xf32>
    %480 = arith.addf %479, %478 : vector<8x32xf32>
    %cst_149 = arith.constant 1.000000e+00 : f32
    %481 = vector.broadcast %cst_149 : f32 to vector<8x32xf32>
    %482 = arith.divf %481, %480 : vector<8x32xf32>
    %483 = vector.extract_strided_slice %474 {offsets = [0, 32], sizes = [8, 32], strides = [1, 1]} : vector<8x128xf32> to vector<8x32xf32>
    %cst_150 = arith.constant 0.000000e+00 : f32
    %484 = vector.broadcast %cst_150 : f32 to vector<8x32xf32>
    %485 = arith.subf %484, %483 : vector<8x32xf32>
    %486 = math.exp %485 : vector<8x32xf32>
    %cst_151 = arith.constant 1.000000e+00 : f32
    %487 = vector.broadcast %cst_151 : f32 to vector<8x32xf32>
    %488 = arith.addf %487, %486 : vector<8x32xf32>
    %cst_152 = arith.constant 1.000000e+00 : f32
    %489 = vector.broadcast %cst_152 : f32 to vector<8x32xf32>
    %490 = arith.divf %489, %488 : vector<8x32xf32>
    %491 = vector.extract_strided_slice %474 {offsets = [0, 64], sizes = [8, 32], strides = [1, 1]} : vector<8x128xf32> to vector<8x32xf32>
    %492 = math.tanh %491 : vector<8x32xf32>
    %493 = vector.extract_strided_slice %474 {offsets = [0, 96], sizes = [8, 32], strides = [1, 1]} : vector<8x128xf32> to vector<8x32xf32>
    %cst_153 = arith.constant 0.000000e+00 : f32
    %494 = vector.broadcast %cst_153 : f32 to vector<8x32xf32>
    %495 = arith.subf %494, %493 : vector<8x32xf32>
    %496 = math.exp %495 : vector<8x32xf32>
    %cst_154 = arith.constant 1.000000e+00 : f32
    %497 = vector.broadcast %cst_154 : f32 to vector<8x32xf32>
    %498 = arith.addf %497, %496 : vector<8x32xf32>
    %cst_155 = arith.constant 1.000000e+00 : f32
    %499 = vector.broadcast %cst_155 : f32 to vector<8x32xf32>
    %500 = arith.divf %499, %498 : vector<8x32xf32>
    %501 = arith.mulf %490, %466 : vector<8x32xf32>
    %502 = arith.mulf %482, %492 : vector<8x32xf32>
    %503 = arith.addf %501, %502 : vector<8x32xf32>
    %504 = math.tanh %503 : vector<8x32xf32>
    %505 = arith.mulf %500, %504 : vector<8x32xf32>
    %506 = vector.extract_strided_slice %505 {offsets = [0, 0], sizes = [1, 32], strides = [1, 1]} : vector<8x32xf32> to vector<1x32xf32>
    %c11 = arith.constant 11 : index
    %c0_156 = arith.constant 0 : index
    %507 = vector.load %arg6[%c11, %c0_156] : memref<16x64xf32, #tpu.memory_space<vmem>>, vector<1x32xf32>
    tpu.vector_store %arg6[%c11, %c0_156], %506 {strides = array<i32>} : memref<16x64xf32, #tpu.memory_space<vmem>>, vector<1x32xf32>,
    %c248 = arith.constant 248 : index
    %c0_157 = arith.constant 0 : index
    %508 = vector.load %arg4[%c248, %c0_157] : memref<648x128xf32, #tpu.memory_space<vmem>>, vector<32x128xf32>
    %cst_158 = arith.constant 0.000000e+00 : f32
    %509 = vector.broadcast %cst_158 : f32 to vector<8x32xf32>
    %cst_159 = arith.constant 0.000000e+00 : f32
    %510 = vector.broadcast %cst_159 : f32 to vector<8x32xf32>
    %511 = vector.extract_strided_slice %58 {offsets = [11, 0], sizes = [1, 128], strides = [1, 1]} : vector<16x128xf32> to vector<1x128xf32>
    %cst_160 = arith.constant dense<0.000000e+00> : vector<8x128xf32>
    %512 = tpu.matmul %509, %508, %cst_160 {dimension_numbers = #tpu.dot_dimension_numbers<[1], [0], [0], [1], [0, 0, 1, 1], [], []>} : vector<8x32xf32>, vector<32x128xf32>, vector<8x128xf32> -> vector<8x128xf32>
    %513 = vector.broadcast %511 : vector<1x128xf32> to vector<8x128xf32>
    %514 = arith.addf %513, %512 : vector<8x128xf32>
    %515 = vector.extract_strided_slice %514 {offsets = [0, 0], sizes = [8, 32], strides = [1, 1]} : vector<8x128xf32> to vector<8x32xf32>
    %cst_161 = arith.constant 0.000000e+00 : f32
    %516 = vector.broadcast %cst_161 : f32 to vector<8x32xf32>
    %517 = arith.subf %516, %515 : vector<8x32xf32>
    %518 = math.exp %517 : vector<8x32xf32>
    %cst_162 = arith.constant 1.000000e+00 : f32
    %519 = vector.broadcast %cst_162 : f32 to vector<8x32xf32>
    %520 = arith.addf %519, %518 : vector<8x32xf32>
    %cst_163 = arith.constant 1.000000e+00 : f32
    %521 = vector.broadcast %cst_163 : f32 to vector<8x32xf32>
    %522 = arith.divf %521, %520 : vector<8x32xf32>
    %523 = vector.extract_strided_slice %514 {offsets = [0, 32], sizes = [8, 32], strides = [1, 1]} : vector<8x128xf32> to vector<8x32xf32>
    %cst_164 = arith.constant 0.000000e+00 : f32
    %524 = vector.broadcast %cst_164 : f32 to vector<8x32xf32>
    %525 = arith.subf %524, %523 : vector<8x32xf32>
    %526 = math.exp %525 : vector<8x32xf32>
    %cst_165 = arith.constant 1.000000e+00 : f32
    %527 = vector.broadcast %cst_165 : f32 to vector<8x32xf32>
    %528 = arith.addf %527, %526 : vector<8x32xf32>
    %cst_166 = arith.constant 1.000000e+00 : f32
    %529 = vector.broadcast %cst_166 : f32 to vector<8x32xf32>
    %530 = arith.divf %529, %528 : vector<8x32xf32>
    %531 = vector.extract_strided_slice %514 {offsets = [0, 64], sizes = [8, 32], strides = [1, 1]} : vector<8x128xf32> to vector<8x32xf32>
    %532 = math.tanh %531 : vector<8x32xf32>
    %533 = vector.extract_strided_slice %514 {offsets = [0, 96], sizes = [8, 32], strides = [1, 1]} : vector<8x128xf32> to vector<8x32xf32>
    %cst_167 = arith.constant 0.000000e+00 : f32
    %534 = vector.broadcast %cst_167 : f32 to vector<8x32xf32>
    %535 = arith.subf %534, %533 : vector<8x32xf32>
    %536 = math.exp %535 : vector<8x32xf32>
    %cst_168 = arith.constant 1.000000e+00 : f32
    %537 = vector.broadcast %cst_168 : f32 to vector<8x32xf32>
    %538 = arith.addf %537, %536 : vector<8x32xf32>
    %cst_169 = arith.constant 1.000000e+00 : f32
    %539 = vector.broadcast %cst_169 : f32 to vector<8x32xf32>
    %540 = arith.divf %539, %538 : vector<8x32xf32>
    %541 = arith.mulf %530, %510 : vector<8x32xf32>
    %542 = arith.mulf %522, %532 : vector<8x32xf32>
    %543 = arith.addf %541, %542 : vector<8x32xf32>
    %544 = math.tanh %543 : vector<8x32xf32>
    %545 = arith.mulf %540, %544 : vector<8x32xf32>
    %546 = vector.extract_strided_slice %545 {offsets = [0, 0], sizes = [1, 32], strides = [1, 1]} : vector<8x32xf32> to vector<1x32xf32>
    %c11_170 = arith.constant 11 : index
    %c32 = arith.constant 32 : index
    %547 = vector.load %arg6[%c11_170, %c32] : memref<16x64xf32, #tpu.memory_space<vmem>>, vector<1x32xf32>
    tpu.vector_store %arg6[%c11_170, %c32], %546 {strides = array<i32>} : memref<16x64xf32, #tpu.memory_space<vmem>>, vector<1x32xf32>,
    %548 = vector.extract_strided_slice %58 {offsets = [10, 0], sizes = [1, 128], strides = [1, 1]} : vector<16x128xf32> to vector<1x128xf32>
    %cst_171 = arith.constant dense<0.000000e+00> : vector<8x128xf32>
    %549 = tpu.matmul %545, %508, %cst_171 {dimension_numbers = #tpu.dot_dimension_numbers<[1], [0], [0], [1], [0, 0, 1, 1], [], []>} : vector<8x32xf32>, vector<32x128xf32>, vector<8x128xf32> -> vector<8x128xf32>
    %550 = vector.broadcast %548 : vector<1x128xf32> to vector<8x128xf32>
    %551 = arith.addf %550, %549 : vector<8x128xf32>
    %552 = vector.extract_strided_slice %551 {offsets = [0, 0], sizes = [8, 32], strides = [1, 1]} : vector<8x128xf32> to vector<8x32xf32>
    %cst_172 = arith.constant 0.000000e+00 : f32
    %553 = vector.broadcast %cst_172 : f32 to vector<8x32xf32>
    %554 = arith.subf %553, %552 : vector<8x32xf32>
    %555 = math.exp %554 : vector<8x32xf32>
    %cst_173 = arith.constant 1.000000e+00 : f32
    %556 = vector.broadcast %cst_173 : f32 to vector<8x32xf32>
    %557 = arith.addf %556, %555 : vector<8x32xf32>
    %cst_174 = arith.constant 1.000000e+00 : f32
    %558 = vector.broadcast %cst_174 : f32 to vector<8x32xf32>
    %559 = arith.divf %558, %557 : vector<8x32xf32>
    %560 = vector.extract_strided_slice %551 {offsets = [0, 32], sizes = [8, 32], strides = [1, 1]} : vector<8x128xf32> to vector<8x32xf32>
    %cst_175 = arith.constant 0.000000e+00 : f32
    %561 = vector.broadcast %cst_175 : f32 to vector<8x32xf32>
    %562 = arith.subf %561, %560 : vector<8x32xf32>
    %563 = math.exp %562 : vector<8x32xf32>
    %cst_176 = arith.constant 1.000000e+00 : f32
    %564 = vector.broadcast %cst_176 : f32 to vector<8x32xf32>
    %565 = arith.addf %564, %563 : vector<8x32xf32>
    %cst_177 = arith.constant 1.000000e+00 : f32
    %566 = vector.broadcast %cst_177 : f32 to vector<8x32xf32>
    %567 = arith.divf %566, %565 : vector<8x32xf32>
    %568 = vector.extract_strided_slice %551 {offsets = [0, 64], sizes = [8, 32], strides = [1, 1]} : vector<8x128xf32> to vector<8x32xf32>
    %569 = math.tanh %568 : vector<8x32xf32>
    %570 = vector.extract_strided_slice %551 {offsets = [0, 96], sizes = [8, 32], strides = [1, 1]} : vector<8x128xf32> to vector<8x32xf32>
    %cst_178 = arith.constant 0.000000e+00 : f32
    %571 = vector.broadcast %cst_178 : f32 to vector<8x32xf32>
    %572 = arith.subf %571, %570 : vector<8x32xf32>
    %573 = math.exp %572 : vector<8x32xf32>
    %cst_179 = arith.constant 1.000000e+00 : f32
    %574 = vector.broadcast %cst_179 : f32 to vector<8x32xf32>
    %575 = arith.addf %574, %573 : vector<8x32xf32>
    %cst_180 = arith.constant 1.000000e+00 : f32
    %576 = vector.broadcast %cst_180 : f32 to vector<8x32xf32>
    %577 = arith.divf %576, %575 : vector<8x32xf32>
    %578 = arith.mulf %567, %543 : vector<8x32xf32>
    %579 = arith.mulf %559, %569 : vector<8x32xf32>
    %580 = arith.addf %578, %579 : vector<8x32xf32>
    %581 = math.tanh %580 : vector<8x32xf32>
    %582 = arith.mulf %577, %581 : vector<8x32xf32>
    %583 = vector.extract_strided_slice %582 {offsets = [0, 0], sizes = [1, 32], strides = [1, 1]} : vector<8x32xf32> to vector<1x32xf32>
    %c10_181 = arith.constant 10 : index
    %c32_182 = arith.constant 32 : index
    %584 = vector.load %arg6[%c10_181, %c32_182] : memref<16x64xf32, #tpu.memory_space<vmem>>, vector<1x32xf32>
    tpu.vector_store %arg6[%c10_181, %c32_182], %583 {strides = array<i32>} : memref<16x64xf32, #tpu.memory_space<vmem>>, vector<1x32xf32>,
    %585 = vector.extract_strided_slice %58 {offsets = [9, 0], sizes = [1, 128], strides = [1, 1]} : vector<16x128xf32> to vector<1x128xf32>
    %cst_183 = arith.constant dense<0.000000e+00> : vector<8x128xf32>
    %586 = tpu.matmul %582, %508, %cst_183 {dimension_numbers = #tpu.dot_dimension_numbers<[1], [0], [0], [1], [0, 0, 1, 1], [], []>} : vector<8x32xf32>, vector<32x128xf32>, vector<8x128xf32> -> vector<8x128xf32>
    %587 = vector.broadcast %585 : vector<1x128xf32> to vector<8x128xf32>
    %588 = arith.addf %587, %586 : vector<8x128xf32>
    %589 = vector.extract_strided_slice %588 {offsets = [0, 0], sizes = [8, 32], strides = [1, 1]} : vector<8x128xf32> to vector<8x32xf32>
    %cst_184 = arith.constant 0.000000e+00 : f32
    %590 = vector.broadcast %cst_184 : f32 to vector<8x32xf32>
    %591 = arith.subf %590, %589 : vector<8x32xf32>
    %592 = math.exp %591 : vector<8x32xf32>
    %cst_185 = arith.constant 1.000000e+00 : f32
    %593 = vector.broadcast %cst_185 : f32 to vector<8x32xf32>
    %594 = arith.addf %593, %592 : vector<8x32xf32>
    %cst_186 = arith.constant 1.000000e+00 : f32
    %595 = vector.broadcast %cst_186 : f32 to vector<8x32xf32>
    %596 = arith.divf %595, %594 : vector<8x32xf32>
    %597 = vector.extract_strided_slice %588 {offsets = [0, 32], sizes = [8, 32], strides = [1, 1]} : vector<8x128xf32> to vector<8x32xf32>
    %cst_187 = arith.constant 0.000000e+00 : f32
    %598 = vector.broadcast %cst_187 : f32 to vector<8x32xf32>
    %599 = arith.subf %598, %597 : vector<8x32xf32>
    %600 = math.exp %599 : vector<8x32xf32>
    %cst_188 = arith.constant 1.000000e+00 : f32
    %601 = vector.broadcast %cst_188 : f32 to vector<8x32xf32>
    %602 = arith.addf %601, %600 : vector<8x32xf32>
    %cst_189 = arith.constant 1.000000e+00 : f32
    %603 = vector.broadcast %cst_189 : f32 to vector<8x32xf32>
    %604 = arith.divf %603, %602 : vector<8x32xf32>
    %605 = vector.extract_strided_slice %588 {offsets = [0, 64], sizes = [8, 32], strides = [1, 1]} : vector<8x128xf32> to vector<8x32xf32>
    %606 = math.tanh %605 : vector<8x32xf32>
    %607 = vector.extract_strided_slice %588 {offsets = [0, 96], sizes = [8, 32], strides = [1, 1]} : vector<8x128xf32> to vector<8x32xf32>
    %cst_190 = arith.constant 0.000000e+00 : f32
    %608 = vector.broadcast %cst_190 : f32 to vector<8x32xf32>
    %609 = arith.subf %608, %607 : vector<8x32xf32>
    %610 = math.exp %609 : vector<8x32xf32>
    %cst_191 = arith.constant 1.000000e+00 : f32
    %611 = vector.broadcast %cst_191 : f32 to vector<8x32xf32>
    %612 = arith.addf %611, %610 : vector<8x32xf32>
    %cst_192 = arith.constant 1.000000e+00 : f32
    %613 = vector.broadcast %cst_192 : f32 to vector<8x32xf32>
    %614 = arith.divf %613, %612 : vector<8x32xf32>
    %615 = arith.mulf %604, %580 : vector<8x32xf32>
    %616 = arith.mulf %596, %606 : vector<8x32xf32>
    %617 = arith.addf %615, %616 : vector<8x32xf32>
    %618 = math.tanh %617 : vector<8x32xf32>
    %619 = arith.mulf %614, %618 : vector<8x32xf32>
    %620 = vector.extract_strided_slice %619 {offsets = [0, 0], sizes = [1, 32], strides = [1, 1]} : vector<8x32xf32> to vector<1x32xf32>
    %c9_193 = arith.constant 9 : index
    %c32_194 = arith.constant 32 : index
    %621 = vector.load %arg6[%c9_193, %c32_194] : memref<16x64xf32, #tpu.memory_space<vmem>>, vector<1x32xf32>
    tpu.vector_store %arg6[%c9_193, %c32_194], %620 {strides = array<i32>} : memref<16x64xf32, #tpu.memory_space<vmem>>, vector<1x32xf32>,
    %622 = vector.extract_strided_slice %58 {offsets = [8, 0], sizes = [1, 128], strides = [1, 1]} : vector<16x128xf32> to vector<1x128xf32>
    %cst_195 = arith.constant dense<0.000000e+00> : vector<8x128xf32>
    %623 = tpu.matmul %619, %508, %cst_195 {dimension_numbers = #tpu.dot_dimension_numbers<[1], [0], [0], [1], [0, 0, 1, 1], [], []>} : vector<8x32xf32>, vector<32x128xf32>, vector<8x128xf32> -> vector<8x128xf32>
    %624 = vector.broadcast %622 : vector<1x128xf32> to vector<8x128xf32>
    %625 = arith.addf %624, %623 : vector<8x128xf32>
    %626 = vector.extract_strided_slice %625 {offsets = [0, 0], sizes = [8, 32], strides = [1, 1]} : vector<8x128xf32> to vector<8x32xf32>
    %cst_196 = arith.constant 0.000000e+00 : f32
    %627 = vector.broadcast %cst_196 : f32 to vector<8x32xf32>
    %628 = arith.subf %627, %626 : vector<8x32xf32>
    %629 = math.exp %628 : vector<8x32xf32>
    %cst_197 = arith.constant 1.000000e+00 : f32
    %630 = vector.broadcast %cst_197 : f32 to vector<8x32xf32>
    %631 = arith.addf %630, %629 : vector<8x32xf32>
    %cst_198 = arith.constant 1.000000e+00 : f32
    %632 = vector.broadcast %cst_198 : f32 to vector<8x32xf32>
    %633 = arith.divf %632, %631 : vector<8x32xf32>
    %634 = vector.extract_strided_slice %625 {offsets = [0, 32], sizes = [8, 32], strides = [1, 1]} : vector<8x128xf32> to vector<8x32xf32>
    %cst_199 = arith.constant 0.000000e+00 : f32
    %635 = vector.broadcast %cst_199 : f32 to vector<8x32xf32>
    %636 = arith.subf %635, %634 : vector<8x32xf32>
    %637 = math.exp %636 : vector<8x32xf32>
    %cst_200 = arith.constant 1.000000e+00 : f32
    %638 = vector.broadcast %cst_200 : f32 to vector<8x32xf32>
    %639 = arith.addf %638, %637 : vector<8x32xf32>
    %cst_201 = arith.constant 1.000000e+00 : f32
    %640 = vector.broadcast %cst_201 : f32 to vector<8x32xf32>
    %641 = arith.divf %640, %639 : vector<8x32xf32>
    %642 = vector.extract_strided_slice %625 {offsets = [0, 64], sizes = [8, 32], strides = [1, 1]} : vector<8x128xf32> to vector<8x32xf32>
    %643 = math.tanh %642 : vector<8x32xf32>
    %644 = vector.extract_strided_slice %625 {offsets = [0, 96], sizes = [8, 32], strides = [1, 1]} : vector<8x128xf32> to vector<8x32xf32>
    %cst_202 = arith.constant 0.000000e+00 : f32
    %645 = vector.broadcast %cst_202 : f32 to vector<8x32xf32>
    %646 = arith.subf %645, %644 : vector<8x32xf32>
    %647 = math.exp %646 : vector<8x32xf32>
    %cst_203 = arith.constant 1.000000e+00 : f32
    %648 = vector.broadcast %cst_203 : f32 to vector<8x32xf32>
    %649 = arith.addf %648, %647 : vector<8x32xf32>
    %cst_204 = arith.constant 1.000000e+00 : f32
    %650 = vector.broadcast %cst_204 : f32 to vector<8x32xf32>
    %651 = arith.divf %650, %649 : vector<8x32xf32>
    %652 = arith.mulf %641, %617 : vector<8x32xf32>
    %653 = arith.mulf %633, %643 : vector<8x32xf32>
    %654 = arith.addf %652, %653 : vector<8x32xf32>
    %655 = math.tanh %654 : vector<8x32xf32>
    %656 = arith.mulf %651, %655 : vector<8x32xf32>
    %657 = vector.extract_strided_slice %656 {offsets = [0, 0], sizes = [1, 32], strides = [1, 1]} : vector<8x32xf32> to vector<1x32xf32>
    %c8_205 = arith.constant 8 : index
    %c32_206 = arith.constant 32 : index
    %658 = vector.load %arg6[%c8_205, %c32_206] : memref<16x64xf32, #tpu.memory_space<vmem>>, vector<1x32xf32>
    tpu.vector_store %arg6[%c8_205, %c32_206], %657 {strides = array<i32>} : memref<16x64xf32, #tpu.memory_space<vmem>>, vector<1x32xf32>,
    %659 = vector.extract_strided_slice %58 {offsets = [7, 0], sizes = [1, 128], strides = [1, 1]} : vector<16x128xf32> to vector<1x128xf32>
    %cst_207 = arith.constant dense<0.000000e+00> : vector<8x128xf32>
    %660 = tpu.matmul %656, %508, %cst_207 {dimension_numbers = #tpu.dot_dimension_numbers<[1], [0], [0], [1], [0, 0, 1, 1], [], []>} : vector<8x32xf32>, vector<32x128xf32>, vector<8x128xf32> -> vector<8x128xf32>
    %661 = vector.broadcast %659 : vector<1x128xf32> to vector<8x128xf32>
    %662 = arith.addf %661, %660 : vector<8x128xf32>
    %663 = vector.extract_strided_slice %662 {offsets = [0, 0], sizes = [8, 32], strides = [1, 1]} : vector<8x128xf32> to vector<8x32xf32>
    %cst_208 = arith.constant 0.000000e+00 : f32
    %664 = vector.broadcast %cst_208 : f32 to vector<8x32xf32>
    %665 = arith.subf %664, %663 : vector<8x32xf32>
    %666 = math.exp %665 : vector<8x32xf32>
    %cst_209 = arith.constant 1.000000e+00 : f32
    %667 = vector.broadcast %cst_209 : f32 to vector<8x32xf32>
    %668 = arith.addf %667, %666 : vector<8x32xf32>
    %cst_210 = arith.constant 1.000000e+00 : f32
    %669 = vector.broadcast %cst_210 : f32 to vector<8x32xf32>
    %670 = arith.divf %669, %668 : vector<8x32xf32>
    %671 = vector.extract_strided_slice %662 {offsets = [0, 32], sizes = [8, 32], strides = [1, 1]} : vector<8x128xf32> to vector<8x32xf32>
    %cst_211 = arith.constant 0.000000e+00 : f32
    %672 = vector.broadcast %cst_211 : f32 to vector<8x32xf32>
    %673 = arith.subf %672, %671 : vector<8x32xf32>
    %674 = math.exp %673 : vector<8x32xf32>
    %cst_212 = arith.constant 1.000000e+00 : f32
    %675 = vector.broadcast %cst_212 : f32 to vector<8x32xf32>
    %676 = arith.addf %675, %674 : vector<8x32xf32>
    %cst_213 = arith.constant 1.000000e+00 : f32
    %677 = vector.broadcast %cst_213 : f32 to vector<8x32xf32>
    %678 = arith.divf %677, %676 : vector<8x32xf32>
    %679 = vector.extract_strided_slice %662 {offsets = [0, 64], sizes = [8, 32], strides = [1, 1]} : vector<8x128xf32> to vector<8x32xf32>
    %680 = math.tanh %679 : vector<8x32xf32>
    %681 = vector.extract_strided_slice %662 {offsets = [0, 96], sizes = [8, 32], strides = [1, 1]} : vector<8x128xf32> to vector<8x32xf32>
    %cst_214 = arith.constant 0.000000e+00 : f32
    %682 = vector.broadcast %cst_214 : f32 to vector<8x32xf32>
    %683 = arith.subf %682, %681 : vector<8x32xf32>
    %684 = math.exp %683 : vector<8x32xf32>
    %cst_215 = arith.constant 1.000000e+00 : f32
    %685 = vector.broadcast %cst_215 : f32 to vector<8x32xf32>
    %686 = arith.addf %685, %684 : vector<8x32xf32>
    %cst_216 = arith.constant 1.000000e+00 : f32
    %687 = vector.broadcast %cst_216 : f32 to vector<8x32xf32>
    %688 = arith.divf %687, %686 : vector<8x32xf32>
    %689 = arith.mulf %678, %654 : vector<8x32xf32>
    %690 = arith.mulf %670, %680 : vector<8x32xf32>
    %691 = arith.addf %689, %690 : vector<8x32xf32>
    %692 = math.tanh %691 : vector<8x32xf32>
    %693 = arith.mulf %688, %692 : vector<8x32xf32>
    %694 = vector.extract_strided_slice %693 {offsets = [0, 0], sizes = [1, 32], strides = [1, 1]} : vector<8x32xf32> to vector<1x32xf32>
    %c7_217 = arith.constant 7 : index
    %c32_218 = arith.constant 32 : index
    %695 = vector.load %arg6[%c7_217, %c32_218] : memref<16x64xf32, #tpu.memory_space<vmem>>, vector<1x32xf32>
    tpu.vector_store %arg6[%c7_217, %c32_218], %694 {strides = array<i32>} : memref<16x64xf32, #tpu.memory_space<vmem>>, vector<1x32xf32>,
    %696 = vector.extract_strided_slice %58 {offsets = [6, 0], sizes = [1, 128], strides = [1, 1]} : vector<16x128xf32> to vector<1x128xf32>
    %cst_219 = arith.constant dense<0.000000e+00> : vector<8x128xf32>
    %697 = tpu.matmul %693, %508, %cst_219 {dimension_numbers = #tpu.dot_dimension_numbers<[1], [0], [0], [1], [0, 0, 1, 1], [], []>} : vector<8x32xf32>, vector<32x128xf32>, vector<8x128xf32> -> vector<8x128xf32>
    %698 = vector.broadcast %696 : vector<1x128xf32> to vector<8x128xf32>
    %699 = arith.addf %698, %697 : vector<8x128xf32>
    %700 = vector.extract_strided_slice %699 {offsets = [0, 0], sizes = [8, 32], strides = [1, 1]} : vector<8x128xf32> to vector<8x32xf32>
    %cst_220 = arith.constant 0.000000e+00 : f32
    %701 = vector.broadcast %cst_220 : f32 to vector<8x32xf32>
    %702 = arith.subf %701, %700 : vector<8x32xf32>
    %703 = math.exp %702 : vector<8x32xf32>
    %cst_221 = arith.constant 1.000000e+00 : f32
    %704 = vector.broadcast %cst_221 : f32 to vector<8x32xf32>
    %705 = arith.addf %704, %703 : vector<8x32xf32>
    %cst_222 = arith.constant 1.000000e+00 : f32
    %706 = vector.broadcast %cst_222 : f32 to vector<8x32xf32>
    %707 = arith.divf %706, %705 : vector<8x32xf32>
    %708 = vector.extract_strided_slice %699 {offsets = [0, 32], sizes = [8, 32], strides = [1, 1]} : vector<8x128xf32> to vector<8x32xf32>
    %cst_223 = arith.constant 0.000000e+00 : f32
    %709 = vector.broadcast %cst_223 : f32 to vector<8x32xf32>
    %710 = arith.subf %709, %708 : vector<8x32xf32>
    %711 = math.exp %710 : vector<8x32xf32>
    %cst_224 = arith.constant 1.000000e+00 : f32
    %712 = vector.broadcast %cst_224 : f32 to vector<8x32xf32>
    %713 = arith.addf %712, %711 : vector<8x32xf32>
    %cst_225 = arith.constant 1.000000e+00 : f32
    %714 = vector.broadcast %cst_225 : f32 to vector<8x32xf32>
    %715 = arith.divf %714, %713 : vector<8x32xf32>
    %716 = vector.extract_strided_slice %699 {offsets = [0, 64], sizes = [8, 32], strides = [1, 1]} : vector<8x128xf32> to vector<8x32xf32>
    %717 = math.tanh %716 : vector<8x32xf32>
    %718 = vector.extract_strided_slice %699 {offsets = [0, 96], sizes = [8, 32], strides = [1, 1]} : vector<8x128xf32> to vector<8x32xf32>
    %cst_226 = arith.constant 0.000000e+00 : f32
    %719 = vector.broadcast %cst_226 : f32 to vector<8x32xf32>
    %720 = arith.subf %719, %718 : vector<8x32xf32>
    %721 = math.exp %720 : vector<8x32xf32>
    %cst_227 = arith.constant 1.000000e+00 : f32
    %722 = vector.broadcast %cst_227 : f32 to vector<8x32xf32>
    %723 = arith.addf %722, %721 : vector<8x32xf32>
    %cst_228 = arith.constant 1.000000e+00 : f32
    %724 = vector.broadcast %cst_228 : f32 to vector<8x32xf32>
    %725 = arith.divf %724, %723 : vector<8x32xf32>
    %726 = arith.mulf %715, %691 : vector<8x32xf32>
    %727 = arith.mulf %707, %717 : vector<8x32xf32>
    %728 = arith.addf %726, %727 : vector<8x32xf32>
    %729 = math.tanh %728 : vector<8x32xf32>
    %730 = arith.mulf %725, %729 : vector<8x32xf32>
    %731 = vector.extract_strided_slice %730 {offsets = [0, 0], sizes = [1, 32], strides = [1, 1]} : vector<8x32xf32> to vector<1x32xf32>
    %c6_229 = arith.constant 6 : index
    %c32_230 = arith.constant 32 : index
    %732 = vector.load %arg6[%c6_229, %c32_230] : memref<16x64xf32, #tpu.memory_space<vmem>>, vector<1x32xf32>
    tpu.vector_store %arg6[%c6_229, %c32_230], %731 {strides = array<i32>} : memref<16x64xf32, #tpu.memory_space<vmem>>, vector<1x32xf32>,
    %733 = vector.extract_strided_slice %58 {offsets = [5, 0], sizes = [1, 128], strides = [1, 1]} : vector<16x128xf32> to vector<1x128xf32>
    %cst_231 = arith.constant dense<0.000000e+00> : vector<8x128xf32>
    %734 = tpu.matmul %730, %508, %cst_231 {dimension_numbers = #tpu.dot_dimension_numbers<[1], [0], [0], [1], [0, 0, 1, 1], [], []>} : vector<8x32xf32>, vector<32x128xf32>, vector<8x128xf32> -> vector<8x128xf32>
    %735 = vector.broadcast %733 : vector<1x128xf32> to vector<8x128xf32>
    %736 = arith.addf %735, %734 : vector<8x128xf32>
    %737 = vector.extract_strided_slice %736 {offsets = [0, 0], sizes = [8, 32], strides = [1, 1]} : vector<8x128xf32> to vector<8x32xf32>
    %cst_232 = arith.constant 0.000000e+00 : f32
    %738 = vector.broadcast %cst_232 : f32 to vector<8x32xf32>
    %739 = arith.subf %738, %737 : vector<8x32xf32>
    %740 = math.exp %739 : vector<8x32xf32>
    %cst_233 = arith.constant 1.000000e+00 : f32
    %741 = vector.broadcast %cst_233 : f32 to vector<8x32xf32>
    %742 = arith.addf %741, %740 : vector<8x32xf32>
    %cst_234 = arith.constant 1.000000e+00 : f32
    %743 = vector.broadcast %cst_234 : f32 to vector<8x32xf32>
    %744 = arith.divf %743, %742 : vector<8x32xf32>
    %745 = vector.extract_strided_slice %736 {offsets = [0, 32], sizes = [8, 32], strides = [1, 1]} : vector<8x128xf32> to vector<8x32xf32>
    %cst_235 = arith.constant 0.000000e+00 : f32
    %746 = vector.broadcast %cst_235 : f32 to vector<8x32xf32>
    %747 = arith.subf %746, %745 : vector<8x32xf32>
    %748 = math.exp %747 : vector<8x32xf32>
    %cst_236 = arith.constant 1.000000e+00 : f32
    %749 = vector.broadcast %cst_236 : f32 to vector<8x32xf32>
    %750 = arith.addf %749, %748 : vector<8x32xf32>
    %cst_237 = arith.constant 1.000000e+00 : f32
    %751 = vector.broadcast %cst_237 : f32 to vector<8x32xf32>
    %752 = arith.divf %751, %750 : vector<8x32xf32>
    %753 = vector.extract_strided_slice %736 {offsets = [0, 64], sizes = [8, 32], strides = [1, 1]} : vector<8x128xf32> to vector<8x32xf32>
    %754 = math.tanh %753 : vector<8x32xf32>
    %755 = vector.extract_strided_slice %736 {offsets = [0, 96], sizes = [8, 32], strides = [1, 1]} : vector<8x128xf32> to vector<8x32xf32>
    %cst_238 = arith.constant 0.000000e+00 : f32
    %756 = vector.broadcast %cst_238 : f32 to vector<8x32xf32>
    %757 = arith.subf %756, %755 : vector<8x32xf32>
    %758 = math.exp %757 : vector<8x32xf32>
    %cst_239 = arith.constant 1.000000e+00 : f32
    %759 = vector.broadcast %cst_239 : f32 to vector<8x32xf32>
    %760 = arith.addf %759, %758 : vector<8x32xf32>
    %cst_240 = arith.constant 1.000000e+00 : f32
    %761 = vector.broadcast %cst_240 : f32 to vector<8x32xf32>
    %762 = arith.divf %761, %760 : vector<8x32xf32>
    %763 = arith.mulf %752, %728 : vector<8x32xf32>
    %764 = arith.mulf %744, %754 : vector<8x32xf32>
    %765 = arith.addf %763, %764 : vector<8x32xf32>
    %766 = math.tanh %765 : vector<8x32xf32>
    %767 = arith.mulf %762, %766 : vector<8x32xf32>
    %768 = vector.extract_strided_slice %767 {offsets = [0, 0], sizes = [1, 32], strides = [1, 1]} : vector<8x32xf32> to vector<1x32xf32>
    %c5_241 = arith.constant 5 : index
    %c32_242 = arith.constant 32 : index
    %769 = vector.load %arg6[%c5_241, %c32_242] : memref<16x64xf32, #tpu.memory_space<vmem>>, vector<1x32xf32>
    tpu.vector_store %arg6[%c5_241, %c32_242], %768 {strides = array<i32>} : memref<16x64xf32, #tpu.memory_space<vmem>>, vector<1x32xf32>,
    %770 = vector.extract_strided_slice %58 {offsets = [4, 0], sizes = [1, 128], strides = [1, 1]} : vector<16x128xf32> to vector<1x128xf32>
    %cst_243 = arith.constant dense<0.000000e+00> : vector<8x128xf32>
    %771 = tpu.matmul %767, %508, %cst_243 {dimension_numbers = #tpu.dot_dimension_numbers<[1], [0], [0], [1], [0, 0, 1, 1], [], []>} : vector<8x32xf32>, vector<32x128xf32>, vector<8x128xf32> -> vector<8x128xf32>
    %772 = vector.broadcast %770 : vector<1x128xf32> to vector<8x128xf32>
    %773 = arith.addf %772, %771 : vector<8x128xf32>
    %774 = vector.extract_strided_slice %773 {offsets = [0, 0], sizes = [8, 32], strides = [1, 1]} : vector<8x128xf32> to vector<8x32xf32>
    %cst_244 = arith.constant 0.000000e+00 : f32
    %775 = vector.broadcast %cst_244 : f32 to vector<8x32xf32>
    %776 = arith.subf %775, %774 : vector<8x32xf32>
    %777 = math.exp %776 : vector<8x32xf32>
    %cst_245 = arith.constant 1.000000e+00 : f32
    %778 = vector.broadcast %cst_245 : f32 to vector<8x32xf32>
    %779 = arith.addf %778, %777 : vector<8x32xf32>
    %cst_246 = arith.constant 1.000000e+00 : f32
    %780 = vector.broadcast %cst_246 : f32 to vector<8x32xf32>
    %781 = arith.divf %780, %779 : vector<8x32xf32>
    %782 = vector.extract_strided_slice %773 {offsets = [0, 32], sizes = [8, 32], strides = [1, 1]} : vector<8x128xf32> to vector<8x32xf32>
    %cst_247 = arith.constant 0.000000e+00 : f32
    %783 = vector.broadcast %cst_247 : f32 to vector<8x32xf32>
    %784 = arith.subf %783, %782 : vector<8x32xf32>
    %785 = math.exp %784 : vector<8x32xf32>
    %cst_248 = arith.constant 1.000000e+00 : f32
    %786 = vector.broadcast %cst_248 : f32 to vector<8x32xf32>
    %787 = arith.addf %786, %785 : vector<8x32xf32>
    %cst_249 = arith.constant 1.000000e+00 : f32
    %788 = vector.broadcast %cst_249 : f32 to vector<8x32xf32>
    %789 = arith.divf %788, %787 : vector<8x32xf32>
    %790 = vector.extract_strided_slice %773 {offsets = [0, 64], sizes = [8, 32], strides = [1, 1]} : vector<8x128xf32> to vector<8x32xf32>
    %791 = math.tanh %790 : vector<8x32xf32>
    %792 = vector.extract_strided_slice %773 {offsets = [0, 96], sizes = [8, 32], strides = [1, 1]} : vector<8x128xf32> to vector<8x32xf32>
    %cst_250 = arith.constant 0.000000e+00 : f32
    %793 = vector.broadcast %cst_250 : f32 to vector<8x32xf32>
    %794 = arith.subf %793, %792 : vector<8x32xf32>
    %795 = math.exp %794 : vector<8x32xf32>
    %cst_251 = arith.constant 1.000000e+00 : f32
    %796 = vector.broadcast %cst_251 : f32 to vector<8x32xf32>
    %797 = arith.addf %796, %795 : vector<8x32xf32>
    %cst_252 = arith.constant 1.000000e+00 : f32
    %798 = vector.broadcast %cst_252 : f32 to vector<8x32xf32>
    %799 = arith.divf %798, %797 : vector<8x32xf32>
    %800 = arith.mulf %789, %765 : vector<8x32xf32>
    %801 = arith.mulf %781, %791 : vector<8x32xf32>
    %802 = arith.addf %800, %801 : vector<8x32xf32>
    %803 = math.tanh %802 : vector<8x32xf32>
    %804 = arith.mulf %799, %803 : vector<8x32xf32>
    %805 = vector.extract_strided_slice %804 {offsets = [0, 0], sizes = [1, 32], strides = [1, 1]} : vector<8x32xf32> to vector<1x32xf32>
    %c4_253 = arith.constant 4 : index
    %c32_254 = arith.constant 32 : index
    %806 = vector.load %arg6[%c4_253, %c32_254] : memref<16x64xf32, #tpu.memory_space<vmem>>, vector<1x32xf32>
    tpu.vector_store %arg6[%c4_253, %c32_254], %805 {strides = array<i32>} : memref<16x64xf32, #tpu.memory_space<vmem>>, vector<1x32xf32>,
    %807 = vector.extract_strided_slice %58 {offsets = [3, 0], sizes = [1, 128], strides = [1, 1]} : vector<16x128xf32> to vector<1x128xf32>
    %cst_255 = arith.constant dense<0.000000e+00> : vector<8x128xf32>
    %808 = tpu.matmul %804, %508, %cst_255 {dimension_numbers = #tpu.dot_dimension_numbers<[1], [0], [0], [1], [0, 0, 1, 1], [], []>} : vector<8x32xf32>, vector<32x128xf32>, vector<8x128xf32> -> vector<8x128xf32>
    %809 = vector.broadcast %807 : vector<1x128xf32> to vector<8x128xf32>
    %810 = arith.addf %809, %808 : vector<8x128xf32>
    %811 = vector.extract_strided_slice %810 {offsets = [0, 0], sizes = [8, 32], strides = [1, 1]} : vector<8x128xf32> to vector<8x32xf32>
    %cst_256 = arith.constant 0.000000e+00 : f32
    %812 = vector.broadcast %cst_256 : f32 to vector<8x32xf32>
    %813 = arith.subf %812, %811 : vector<8x32xf32>
    %814 = math.exp %813 : vector<8x32xf32>
    %cst_257 = arith.constant 1.000000e+00 : f32
    %815 = vector.broadcast %cst_257 : f32 to vector<8x32xf32>
    %816 = arith.addf %815, %814 : vector<8x32xf32>
    %cst_258 = arith.constant 1.000000e+00 : f32
    %817 = vector.broadcast %cst_258 : f32 to vector<8x32xf32>
    %818 = arith.divf %817, %816 : vector<8x32xf32>
    %819 = vector.extract_strided_slice %810 {offsets = [0, 32], sizes = [8, 32], strides = [1, 1]} : vector<8x128xf32> to vector<8x32xf32>
    %cst_259 = arith.constant 0.000000e+00 : f32
    %820 = vector.broadcast %cst_259 : f32 to vector<8x32xf32>
    %821 = arith.subf %820, %819 : vector<8x32xf32>
    %822 = math.exp %821 : vector<8x32xf32>
    %cst_260 = arith.constant 1.000000e+00 : f32
    %823 = vector.broadcast %cst_260 : f32 to vector<8x32xf32>
    %824 = arith.addf %823, %822 : vector<8x32xf32>
    %cst_261 = arith.constant 1.000000e+00 : f32
    %825 = vector.broadcast %cst_261 : f32 to vector<8x32xf32>
    %826 = arith.divf %825, %824 : vector<8x32xf32>
    %827 = vector.extract_strided_slice %810 {offsets = [0, 64], sizes = [8, 32], strides = [1, 1]} : vector<8x128xf32> to vector<8x32xf32>
    %828 = math.tanh %827 : vector<8x32xf32>
    %829 = vector.extract_strided_slice %810 {offsets = [0, 96], sizes = [8, 32], strides = [1, 1]} : vector<8x128xf32> to vector<8x32xf32>
    %cst_262 = arith.constant 0.000000e+00 : f32
    %830 = vector.broadcast %cst_262 : f32 to vector<8x32xf32>
    %831 = arith.subf %830, %829 : vector<8x32xf32>
    %832 = math.exp %831 : vector<8x32xf32>
    %cst_263 = arith.constant 1.000000e+00 : f32
    %833 = vector.broadcast %cst_263 : f32 to vector<8x32xf32>
    %834 = arith.addf %833, %832 : vector<8x32xf32>
    %cst_264 = arith.constant 1.000000e+00 : f32
    %835 = vector.broadcast %cst_264 : f32 to vector<8x32xf32>
    %836 = arith.divf %835, %834 : vector<8x32xf32>
    %837 = arith.mulf %826, %802 : vector<8x32xf32>
    %838 = arith.mulf %818, %828 : vector<8x32xf32>
    %839 = arith.addf %837, %838 : vector<8x32xf32>
    %840 = math.tanh %839 : vector<8x32xf32>
    %841 = arith.mulf %836, %840 : vector<8x32xf32>
    %842 = vector.extract_strided_slice %841 {offsets = [0, 0], sizes = [1, 32], strides = [1, 1]} : vector<8x32xf32> to vector<1x32xf32>
    %c3_265 = arith.constant 3 : index
    %c32_266 = arith.constant 32 : index
    %843 = vector.load %arg6[%c3_265, %c32_266] : memref<16x64xf32, #tpu.memory_space<vmem>>, vector<1x32xf32>
    tpu.vector_store %arg6[%c3_265, %c32_266], %842 {strides = array<i32>} : memref<16x64xf32, #tpu.memory_space<vmem>>, vector<1x32xf32>,
    %844 = vector.extract_strided_slice %58 {offsets = [2, 0], sizes = [1, 128], strides = [1, 1]} : vector<16x128xf32> to vector<1x128xf32>
    %cst_267 = arith.constant dense<0.000000e+00> : vector<8x128xf32>
    %845 = tpu.matmul %841, %508, %cst_267 {dimension_numbers = #tpu.dot_dimension_numbers<[1], [0], [0], [1], [0, 0, 1, 1], [], []>} : vector<8x32xf32>, vector<32x128xf32>, vector<8x128xf32> -> vector<8x128xf32>
    %846 = vector.broadcast %844 : vector<1x128xf32> to vector<8x128xf32>
    %847 = arith.addf %846, %845 : vector<8x128xf32>
    %848 = vector.extract_strided_slice %847 {offsets = [0, 0], sizes = [8, 32], strides = [1, 1]} : vector<8x128xf32> to vector<8x32xf32>
    %cst_268 = arith.constant 0.000000e+00 : f32
    %849 = vector.broadcast %cst_268 : f32 to vector<8x32xf32>
    %850 = arith.subf %849, %848 : vector<8x32xf32>
    %851 = math.exp %850 : vector<8x32xf32>
    %cst_269 = arith.constant 1.000000e+00 : f32
    %852 = vector.broadcast %cst_269 : f32 to vector<8x32xf32>
    %853 = arith.addf %852, %851 : vector<8x32xf32>
    %cst_270 = arith.constant 1.000000e+00 : f32
    %854 = vector.broadcast %cst_270 : f32 to vector<8x32xf32>
    %855 = arith.divf %854, %853 : vector<8x32xf32>
    %856 = vector.extract_strided_slice %847 {offsets = [0, 32], sizes = [8, 32], strides = [1, 1]} : vector<8x128xf32> to vector<8x32xf32>
    %cst_271 = arith.constant 0.000000e+00 : f32
    %857 = vector.broadcast %cst_271 : f32 to vector<8x32xf32>
    %858 = arith.subf %857, %856 : vector<8x32xf32>
    %859 = math.exp %858 : vector<8x32xf32>
    %cst_272 = arith.constant 1.000000e+00 : f32
    %860 = vector.broadcast %cst_272 : f32 to vector<8x32xf32>
    %861 = arith.addf %860, %859 : vector<8x32xf32>
    %cst_273 = arith.constant 1.000000e+00 : f32
    %862 = vector.broadcast %cst_273 : f32 to vector<8x32xf32>
    %863 = arith.divf %862, %861 : vector<8x32xf32>
    %864 = vector.extract_strided_slice %847 {offsets = [0, 64], sizes = [8, 32], strides = [1, 1]} : vector<8x128xf32> to vector<8x32xf32>
    %865 = math.tanh %864 : vector<8x32xf32>
    %866 = vector.extract_strided_slice %847 {offsets = [0, 96], sizes = [8, 32], strides = [1, 1]} : vector<8x128xf32> to vector<8x32xf32>
    %cst_274 = arith.constant 0.000000e+00 : f32
    %867 = vector.broadcast %cst_274 : f32 to vector<8x32xf32>
    %868 = arith.subf %867, %866 : vector<8x32xf32>
    %869 = math.exp %868 : vector<8x32xf32>
    %cst_275 = arith.constant 1.000000e+00 : f32
    %870 = vector.broadcast %cst_275 : f32 to vector<8x32xf32>
    %871 = arith.addf %870, %869 : vector<8x32xf32>
    %cst_276 = arith.constant 1.000000e+00 : f32
    %872 = vector.broadcast %cst_276 : f32 to vector<8x32xf32>
    %873 = arith.divf %872, %871 : vector<8x32xf32>
    %874 = arith.mulf %863, %839 : vector<8x32xf32>
    %875 = arith.mulf %855, %865 : vector<8x32xf32>
    %876 = arith.addf %874, %875 : vector<8x32xf32>
    %877 = math.tanh %876 : vector<8x32xf32>
    %878 = arith.mulf %873, %877 : vector<8x32xf32>
    %879 = vector.extract_strided_slice %878 {offsets = [0, 0], sizes = [1, 32], strides = [1, 1]} : vector<8x32xf32> to vector<1x32xf32>
    %c2_277 = arith.constant 2 : index
    %c32_278 = arith.constant 32 : index
    %880 = vector.load %arg6[%c2_277, %c32_278] : memref<16x64xf32, #tpu.memory_space<vmem>>, vector<1x32xf32>
    tpu.vector_store %arg6[%c2_277, %c32_278], %879 {strides = array<i32>} : memref<16x64xf32, #tpu.memory_space<vmem>>, vector<1x32xf32>,
    %881 = vector.extract_strided_slice %58 {offsets = [1, 0], sizes = [1, 128], strides = [1, 1]} : vector<16x128xf32> to vector<1x128xf32>
    %cst_279 = arith.constant dense<0.000000e+00> : vector<8x128xf32>
    %882 = tpu.matmul %878, %508, %cst_279 {dimension_numbers = #tpu.dot_dimension_numbers<[1], [0], [0], [1], [0, 0, 1, 1], [], []>} : vector<8x32xf32>, vector<32x128xf32>, vector<8x128xf32> -> vector<8x128xf32>
    %883 = vector.broadcast %881 : vector<1x128xf32> to vector<8x128xf32>
    %884 = arith.addf %883, %882 : vector<8x128xf32>
    %885 = vector.extract_strided_slice %884 {offsets = [0, 0], sizes = [8, 32], strides = [1, 1]} : vector<8x128xf32> to vector<8x32xf32>
    %cst_280 = arith.constant 0.000000e+00 : f32
    %886 = vector.broadcast %cst_280 : f32 to vector<8x32xf32>
    %887 = arith.subf %886, %885 : vector<8x32xf32>
    %888 = math.exp %887 : vector<8x32xf32>
    %cst_281 = arith.constant 1.000000e+00 : f32
    %889 = vector.broadcast %cst_281 : f32 to vector<8x32xf32>
    %890 = arith.addf %889, %888 : vector<8x32xf32>
    %cst_282 = arith.constant 1.000000e+00 : f32
    %891 = vector.broadcast %cst_282 : f32 to vector<8x32xf32>
    %892 = arith.divf %891, %890 : vector<8x32xf32>
    %893 = vector.extract_strided_slice %884 {offsets = [0, 32], sizes = [8, 32], strides = [1, 1]} : vector<8x128xf32> to vector<8x32xf32>
    %cst_283 = arith.constant 0.000000e+00 : f32
    %894 = vector.broadcast %cst_283 : f32 to vector<8x32xf32>
    %895 = arith.subf %894, %893 : vector<8x32xf32>
    %896 = math.exp %895 : vector<8x32xf32>
    %cst_284 = arith.constant 1.000000e+00 : f32
    %897 = vector.broadcast %cst_284 : f32 to vector<8x32xf32>
    %898 = arith.addf %897, %896 : vector<8x32xf32>
    %cst_285 = arith.constant 1.000000e+00 : f32
    %899 = vector.broadcast %cst_285 : f32 to vector<8x32xf32>
    %900 = arith.divf %899, %898 : vector<8x32xf32>
    %901 = vector.extract_strided_slice %884 {offsets = [0, 64], sizes = [8, 32], strides = [1, 1]} : vector<8x128xf32> to vector<8x32xf32>
    %902 = math.tanh %901 : vector<8x32xf32>
    %903 = vector.extract_strided_slice %884 {offsets = [0, 96], sizes = [8, 32], strides = [1, 1]} : vector<8x128xf32> to vector<8x32xf32>
    %cst_286 = arith.constant 0.000000e+00 : f32
    %904 = vector.broadcast %cst_286 : f32 to vector<8x32xf32>
    %905 = arith.subf %904, %903 : vector<8x32xf32>
    %906 = math.exp %905 : vector<8x32xf32>
    %cst_287 = arith.constant 1.000000e+00 : f32
    %907 = vector.broadcast %cst_287 : f32 to vector<8x32xf32>
    %908 = arith.addf %907, %906 : vector<8x32xf32>
    %cst_288 = arith.constant 1.000000e+00 : f32
    %909 = vector.broadcast %cst_288 : f32 to vector<8x32xf32>
    %910 = arith.divf %909, %908 : vector<8x32xf32>
    %911 = arith.mulf %900, %876 : vector<8x32xf32>
    %912 = arith.mulf %892, %902 : vector<8x32xf32>
    %913 = arith.addf %911, %912 : vector<8x32xf32>
    %914 = math.tanh %913 : vector<8x32xf32>
    %915 = arith.mulf %910, %914 : vector<8x32xf32>
    %916 = vector.extract_strided_slice %915 {offsets = [0, 0], sizes = [1, 32], strides = [1, 1]} : vector<8x32xf32> to vector<1x32xf32>
    %c1_289 = arith.constant 1 : index
    %c32_290 = arith.constant 32 : index
    %917 = vector.load %arg6[%c1_289, %c32_290] : memref<16x64xf32, #tpu.memory_space<vmem>>, vector<1x32xf32>
    tpu.vector_store %arg6[%c1_289, %c32_290], %916 {strides = array<i32>} : memref<16x64xf32, #tpu.memory_space<vmem>>, vector<1x32xf32>,
    %918 = vector.extract_strided_slice %58 {offsets = [0, 0], sizes = [1, 128], strides = [1, 1]} : vector<16x128xf32> to vector<1x128xf32>
    %cst_291 = arith.constant dense<0.000000e+00> : vector<8x128xf32>
    %919 = tpu.matmul %915, %508, %cst_291 {dimension_numbers = #tpu.dot_dimension_numbers<[1], [0], [0], [1], [0, 0, 1, 1], [], []>} : vector<8x32xf32>, vector<32x128xf32>, vector<8x128xf32> -> vector<8x128xf32>
    %920 = vector.broadcast %918 : vector<1x128xf32> to vector<8x128xf32>
    %921 = arith.addf %920, %919 : vector<8x128xf32>
    %922 = vector.extract_strided_slice %921 {offsets = [0, 0], sizes = [8, 32], strides = [1, 1]} : vector<8x128xf32> to vector<8x32xf32>
    %cst_292 = arith.constant 0.000000e+00 : f32
    %923 = vector.broadcast %cst_292 : f32 to vector<8x32xf32>
    %924 = arith.subf %923, %922 : vector<8x32xf32>
    %925 = math.exp %924 : vector<8x32xf32>
    %cst_293 = arith.constant 1.000000e+00 : f32
    %926 = vector.broadcast %cst_293 : f32 to vector<8x32xf32>
    %927 = arith.addf %926, %925 : vector<8x32xf32>
    %cst_294 = arith.constant 1.000000e+00 : f32
    %928 = vector.broadcast %cst_294 : f32 to vector<8x32xf32>
    %929 = arith.divf %928, %927 : vector<8x32xf32>
    %930 = vector.extract_strided_slice %921 {offsets = [0, 32], sizes = [8, 32], strides = [1, 1]} : vector<8x128xf32> to vector<8x32xf32>
    %cst_295 = arith.constant 0.000000e+00 : f32
    %931 = vector.broadcast %cst_295 : f32 to vector<8x32xf32>
    %932 = arith.subf %931, %930 : vector<8x32xf32>
    %933 = math.exp %932 : vector<8x32xf32>
    %cst_296 = arith.constant 1.000000e+00 : f32
    %934 = vector.broadcast %cst_296 : f32 to vector<8x32xf32>
    %935 = arith.addf %934, %933 : vector<8x32xf32>
    %cst_297 = arith.constant 1.000000e+00 : f32
    %936 = vector.broadcast %cst_297 : f32 to vector<8x32xf32>
    %937 = arith.divf %936, %935 : vector<8x32xf32>
    %938 = vector.extract_strided_slice %921 {offsets = [0, 64], sizes = [8, 32], strides = [1, 1]} : vector<8x128xf32> to vector<8x32xf32>
    %939 = math.tanh %938 : vector<8x32xf32>
    %940 = vector.extract_strided_slice %921 {offsets = [0, 96], sizes = [8, 32], strides = [1, 1]} : vector<8x128xf32> to vector<8x32xf32>
    %cst_298 = arith.constant 0.000000e+00 : f32
    %941 = vector.broadcast %cst_298 : f32 to vector<8x32xf32>
    %942 = arith.subf %941, %940 : vector<8x32xf32>
    %943 = math.exp %942 : vector<8x32xf32>
    %cst_299 = arith.constant 1.000000e+00 : f32
    %944 = vector.broadcast %cst_299 : f32 to vector<8x32xf32>
    %945 = arith.addf %944, %943 : vector<8x32xf32>
    %cst_300 = arith.constant 1.000000e+00 : f32
    %946 = vector.broadcast %cst_300 : f32 to vector<8x32xf32>
    %947 = arith.divf %946, %945 : vector<8x32xf32>
    %948 = arith.mulf %937, %913 : vector<8x32xf32>
    %949 = arith.mulf %929, %939 : vector<8x32xf32>
    %950 = arith.addf %948, %949 : vector<8x32xf32>
    %951 = math.tanh %950 : vector<8x32xf32>
    %952 = arith.mulf %947, %951 : vector<8x32xf32>
    %953 = vector.extract_strided_slice %952 {offsets = [0, 0], sizes = [1, 32], strides = [1, 1]} : vector<8x32xf32> to vector<1x32xf32>
    %c0_301 = arith.constant 0 : index
    %c32_302 = arith.constant 32 : index
    %954 = vector.load %arg6[%c0_301, %c32_302] : memref<16x64xf32, #tpu.memory_space<vmem>>, vector<1x32xf32>
    tpu.vector_store %arg6[%c0_301, %c32_302], %953 {strides = array<i32>} : memref<16x64xf32, #tpu.memory_space<vmem>>, vector<1x32xf32>,
    %c0_303 = arith.constant 0 : index
    %c0_304 = arith.constant 0 : index
    %955 = vector.load %arg6[%c0_303, %c0_304] : memref<16x64xf32, #tpu.memory_space<vmem>>, vector<16x64xf32>
    %c312 = arith.constant 312 : index
    %c0_305 = arith.constant 0 : index
    %956 = vector.load %arg4[%c312, %c0_305] : memref<648x128xf32, #tpu.memory_space<vmem>>, vector<64x32xf32>
    %c376 = arith.constant 376 : index
    %c0_306 = arith.constant 0 : index
    %957 = vector.load %arg4[%c376, %c0_306] : memref<648x128xf32, #tpu.memory_space<vmem>>, vector<32x1xf32>
    %cst_307 = arith.constant dense<0.000000e+00> : vector<16x32xf32>
    %958 = tpu.matmul %955, %956, %cst_307 {dimension_numbers = #tpu.dot_dimension_numbers<[1], [0], [0], [1], [0, 0, 1, 1], [], []>} : vector<16x64xf32>, vector<64x32xf32>, vector<16x32xf32> -> vector<16x32xf32>
    %959 = vector.extract_strided_slice %1 {offsets = [0, 16], sizes = [1, 32], strides = [1, 1]} : vector<1x128xf32> to vector<1x32xf32>
    %960 = vector.broadcast %959 : vector<1x32xf32> to vector<16x32xf32>
    %961 = arith.addf %958, %960 : vector<16x32xf32>
    %cst_308 = arith.constant 0.000000e+00 : f32
    %962 = vector.broadcast %cst_308 : f32 to vector<16x32xf32>
    %963 = arith.maximumf %961, %962 : vector<16x32xf32>
    %cst_309 = arith.constant dense<0.000000e+00> : vector<16x1xf32>
    %964 = tpu.matmul %963, %957, %cst_309 {dimension_numbers = #tpu.dot_dimension_numbers<[1], [0], [0], [1], [0, 0, 1, 1], [], []>} : vector<16x32xf32>, vector<32x1xf32>, vector<16x1xf32> -> vector<16x1xf32>
    %965 = vector.extract_strided_slice %1 {offsets = [0, 48], sizes = [1, 1], strides = [1, 1]} : vector<1x128xf32> to vector<1x1xf32>
    %966 = vector.broadcast %965 : vector<1x1xf32> to vector<16x1xf32>
    %967 = arith.addf %964, %966 : vector<16x1xf32>
    %968 = tpu.iota {dimensions = array<i32: 0>} : vector<16x1xi32>
    %c12_i32 = arith.constant 12 : i32
    %969 = vector.broadcast %c12_i32 : i32 to vector<16x1xi32>
    %970 = arith.cmpi slt, %968, %969 : vector<16x1xi32>
    %cst_310 = arith.constant -1.000000e+30 : f32
    %971 = vector.broadcast %cst_310 : f32 to vector<16x1xf32>
    %972 = arith.select %970, %967, %971 : vector<16x1xi1>, vector<16x1xf32>
    %cst_311 = arith.constant dense<0xFF800000> : vector<1xf32>
    %973 = vector.multi_reduction <maximumf>, %972, %cst_311 [0] : vector<16x1xf32> to vector<1xf32>
    %974 = vector.shape_cast %973 : vector<1xf32> to vector<1x1xf32>
    %975 = vector.broadcast %974 : vector<1x1xf32> to vector<16x1xf32>
    %976 = arith.subf %972, %975 : vector<16x1xf32>
    %977 = math.exp %976 : vector<16x1xf32>
    %c16 = arith.constant 16 : index
    %c0_312 = arith.constant 0 : index
    %978 = vector.load %arg2[%c16, %c0_312] : memref<24x16xf32, #tpu.memory_space<vmem>>, vector<8x16xf32>
    %979 = vector.broadcast %977 : vector<16x1xf32> to vector<16x64xf32>
    %980 = arith.mulf %979, %0 : vector<16x64xf32>
    %cst_313 = arith.constant dense<0.000000e+00> : vector<8x64xf32>
    %981 = tpu.matmul %978, %980, %cst_313 {dimension_numbers = #tpu.dot_dimension_numbers<[1], [0], [0], [1], [0, 0, 1, 1], [], []>} : vector<8x16xf32>, vector<16x64xf32>, vector<8x64xf32> -> vector<8x64xf32>
    %cst_314 = arith.constant dense<0.000000e+00> : vector<8x1xf32>
    %982 = tpu.matmul %978, %977, %cst_314 {dimension_numbers = #tpu.dot_dimension_numbers<[1], [0], [0], [1], [0, 0, 1, 1], [], []>} : vector<8x16xf32>, vector<16x1xf32>, vector<8x1xf32> -> vector<8x1xf32>
    %cst_315 = arith.constant 1.000000e-30 : f32
    %983 = vector.broadcast %cst_315 : f32 to vector<8x1xf32>
    %984 = arith.maximumf %982, %983 : vector<8x1xf32>
    %985 = tpu.reciprocal %984 {approx = true} : vector<8x1xf32> -> vector<8x1xf32>
    %986 = vector.broadcast %985 : vector<8x1xf32> to vector<8x64xf32>
    %987 = arith.mulf %981, %986 : vector<8x64xf32>
    %c0_316 = arith.constant 0 : index
    %c0_317 = arith.constant 0 : index
    %988 = vector.load %arg2[%c0_316, %c0_317] : memref<24x16xf32, #tpu.memory_space<vmem>>, vector<8x16xf32>
    %cst_318 = arith.constant dense<0.000000e+00> : vector<8x64xf32>
    %989 = tpu.matmul %988, %955, %cst_318 {dimension_numbers = #tpu.dot_dimension_numbers<[1], [0], [0], [1], [0, 0, 1, 1], [], []>} : vector<8x16xf32>, vector<16x64xf32>, vector<8x64xf32> -> vector<8x64xf32>
    %c8_319 = arith.constant 8 : index
    %c0_320 = arith.constant 0 : index
    %990 = vector.load %arg2[%c8_319, %c0_320] : memref<24x16xf32, #tpu.memory_space<vmem>>, vector<8x16xf32>
    %cst_321 = arith.constant dense<0.000000e+00> : vector<8x64xf32>
    %991 = tpu.matmul %990, %955, %cst_321 {dimension_numbers = #tpu.dot_dimension_numbers<[1], [0], [0], [1], [0, 0, 1, 1], [], []>} : vector<8x16xf32>, vector<16x64xf32>, vector<8x64xf32> -> vector<8x64xf32>
    %c408 = arith.constant 408 : index
    %c0_322 = arith.constant 0 : index
    %992 = vector.load %arg4[%c408, %c0_322] : memref<648x128xf32, #tpu.memory_space<vmem>>, vector<64x64xf32>
    %cst_323 = arith.constant dense<0.000000e+00> : vector<8x64xf32>
    %993 = tpu.matmul %989, %992, %cst_323 {dimension_numbers = #tpu.dot_dimension_numbers<[1], [0], [0], [1], [0, 0, 1, 1], [], []>} : vector<8x64xf32>, vector<64x64xf32>, vector<8x64xf32> -> vector<8x64xf32>
    %c472 = arith.constant 472 : index
    %c0_324 = arith.constant 0 : index
    %994 = vector.load %arg4[%c472, %c0_324] : memref<648x128xf32, #tpu.memory_space<vmem>>, vector<64x64xf32>
    %cst_325 = arith.constant dense<0.000000e+00> : vector<8x64xf32>
    %995 = tpu.matmul %991, %994, %cst_325 {dimension_numbers = #tpu.dot_dimension_numbers<[1], [0], [0], [1], [0, 0, 1, 1], [], []>} : vector<8x64xf32>, vector<64x64xf32>, vector<8x64xf32> -> vector<8x64xf32>
    %996 = arith.addf %993, %995 : vector<8x64xf32>
    %c536 = arith.constant 536 : index
    %c0_326 = arith.constant 0 : index
    %997 = vector.load %arg4[%c536, %c0_326] : memref<648x128xf32, #tpu.memory_space<vmem>>, vector<64x64xf32>
    %cst_327 = arith.constant dense<0.000000e+00> : vector<8x64xf32>
    %998 = tpu.matmul %987, %997, %cst_327 {dimension_numbers = #tpu.dot_dimension_numbers<[1], [0], [0], [1], [0, 0, 1, 1], [], []>} : vector<8x64xf32>, vector<64x64xf32>, vector<8x64xf32> -> vector<8x64xf32>
    %999 = arith.addf %996, %998 : vector<8x64xf32>
    %c0_328 = arith.constant 0 : index
    %c0_329 = arith.constant 0 : index
    %1000 = vector.load %arg3[%c0_328, %c0_329] : memref<8x32xf32, #tpu.memory_space<vmem>>, vector<8x32xf32>
    %c600 = arith.constant 600 : index
    %c0_330 = arith.constant 0 : index
    %1001 = vector.load %arg4[%c600, %c0_330] : memref<648x128xf32, #tpu.memory_space<vmem>>, vector<32x64xf32>
    %cst_331 = arith.constant dense<0.000000e+00> : vector<8x64xf32>
    %1002 = tpu.matmul %1000, %1001, %cst_331 {dimension_numbers = #tpu.dot_dimension_numbers<[1], [0], [0], [1], [0, 0, 1, 1], [], []>} : vector<8x32xf32>, vector<32x64xf32>, vector<8x64xf32> -> vector<8x64xf32>
    %1003 = arith.addf %999, %1002 : vector<8x64xf32>
    %c304 = arith.constant 304 : index
    %c0_332 = arith.constant 0 : index
    %1004 = vector.load %arg4[%c304, %c0_332] : memref<648x128xf32, #tpu.memory_space<vmem>>, vector<1x64xf32>
    %1005 = vector.broadcast %1004 : vector<1x64xf32> to vector<8x64xf32>
    %1006 = arith.addf %1003, %1005 : vector<8x64xf32>
    %c632 = arith.constant 632 : index
    %c0_333 = arith.constant 0 : index
    %1007 = vector.load %arg4[%c632, %c0_333] : memref<648x128xf32, #tpu.memory_space<vmem>>, vector<16x64xf32>
    %cst_334 = arith.constant dense<0.000000e+00> : vector<8x16xf32>
    %1008 = tpu.matmul %1006, %1007, %cst_334 {dimension_numbers = #tpu.dot_dimension_numbers<[1], [1], [0], [0], [0, 0, 1, 0], [], []>} : vector<8x64xf32>, vector<16x64xf32>, vector<8x16xf32> -> vector<8x16xf32>
    %cst_335 = arith.constant dense<0xFF800000> : vector<8xf32>
    %1009 = vector.multi_reduction <maximumf>, %1008, %cst_335 [1] : vector<8x16xf32> to vector<8xf32>
    %1010 = vector.shape_cast %1009 : vector<8xf32> to vector<8x1xf32>
    %1011 = vector.broadcast %1010 : vector<8x1xf32> to vector<8x16xf32>
    %1012 = arith.subf %1008, %1011 : vector<8x16xf32>
    %1013 = math.exp %1012 : vector<8x16xf32>
    %cst_336 = arith.constant dense<0.000000e+00> : vector<8xf32>
    %1014 = vector.multi_reduction <add>, %1013, %cst_336 [1] : vector<8x16xf32> to vector<8xf32>
    %1015 = vector.shape_cast %1014 : vector<8xf32> to vector<8x1xf32>
    %1016 = math.log %1015 : vector<8x1xf32>
    %1017 = arith.addf %1010, %1016 : vector<8x1xf32>
    %cst_337 = arith.constant 0.000000e+00 : f32
    %1018 = vector.broadcast %cst_337 : f32 to vector<8x111xf32>
    %1019 = tpu.concatenate %1008, %1017, %1018 in 1 : vector<8x16xf32>, vector<8x1xf32>, vector<8x111xf32> -> vector<8x128xf32>
    %c0_338 = arith.constant 0 : index
    %c0_339 = arith.constant 0 : index
    %1020 = vector.load %arg5[%c0_338, %c0_339] : memref<8x128xf32, #tpu.memory_space<vmem>>, vector<8x128xf32>
    tpu.vector_store %arg5[%c0_338, %c0_339], %1019 {strides = array<i32>} : memref<8x128xf32, #tpu.memory_space<vmem>>, vector<8x128xf32>,
    return
  }
}

</mosaic_0001>

<bundles_post_ra>
// kernel: _lambda_.1
= control target key start
LH: loop header
LB: loop body
LE: loop exit
PB: predicated region body
PF: predicated region fallthrough
CT: control target
= control target key end

     0   :  { %s2596_s28 = smov 40   ;;  %vm32_vm0 = vcmask 457728   ;;  %s2597_s12 = smov 88   ;;  %vm157_vm1 = vcmask 523264   ;;  %vm127_vm2 = vcmask 64512   ;;  %v2603_v43 = vmov 0.0   ;;  %s3404_s4 = inlined_call_operand.vmem [shape: f32[648,128], index: 4, kind: input, shape index: {}]   ;;  %s3405_s1 = inlined_call_operand.vmem [shape: f32[16,56], index: 1, kind: input, shape index: {}]   ;;  %s3406_s0 = inlined_call_operand.vmem [shape: f32[16,64], index: 0, kind: input, shape index: {}]   ;;  %s3407_s2 = inlined_call_operand.vmem [shape: f32[24,16], index: 2, kind: input, shape index: {}]   ;;  %s3408_s3 = inlined_call_operand.vmem [shape: f32[8,32], index: 3, kind: input, shape index: {}]   ;;  %s3409_s5 = inlined_call_operand.vmem [shape: f32[8,128], index: 5, kind: output, shape index: {}]  }
   0x1   :  { %v31_v0 = vld [vmem:[%s3404_s4 + $0x30] sm:$0xff]  ;;  %v30_v1 = vld [vmem:[%s3404_s4 + $0x28] sm:$0xff]  ;;  %v29_v2 = vld [vmem:[%s3404_s4 + $0x20] sm:$0xff]  ;;  %s2598_s13 = smov 104   ;;  %s2599_s14 = smov 120   ;;  %311 = vst.msk [vmem:[#allocation2] sm:$0xff] %vm157_vm1, %v2603_v43 }
   0x2   :  { %48 = vmatpush.msra.mxu0 %v31_v0  ;;  %v2649_v3 = vld [vmem:[%s3404_s4 + $0x128] ss:$0 sm:$0xff]  ;;  %v28_v4 = vld [vmem:[%s3404_s4 + $0x18] sm:$0xff]  ;;  %v27_v5 = vld [vmem:[%s3404_s4 + $0x10] sm:$0xff]  ;;  %s2600_s15 = smov 96   ;;  %s2601_s16 = smov 112  }
   0x3   :  { %110 = vrot.lane.b32.xlu2 %v2649_v3, %s2596_s28  ;;  %v26_v6 = vld [vmem:[%s3404_s4 + $0x8] sm:$0xff]  ;;  %v25_v7 = vld [vmem:[%s3404_s4] sm:$0xff]  ;;  %v124_v10 = vld [vmem:[%s3404_s4 + $0x70] sm:$0xff]  ;;  %s2602_s28 = smov 80   ;;  %312 = vst.msk [vmem:[#allocation2 + $0x8] sm:$0xff] %vm157_vm1, %v2603_v43  ;;  %s2604_s10 = smov 64  }
   0x4   :  { %49 = vmatpush.msra.mxu0 %v30_v1  ;;  %v23_v8 = vld [vmem:[%s3405_s1] sm:$0xff]  ;;  %172 = vmatpush.msra.mxu2 %v124_v10  ;;  %v123_v11 = vld [vmem:[%s3404_s4 + $0x68] sm:$0xff]  ;;  %v121_v13 = vld [vmem:[%s3404_s4 + $0x58] sm:$0xff]  ;;  %vm384_vm7 = vcmask 253952   ;;  %vm317_vm8 = vcmask 261120  }
   0x5   :  { %v122_v12 = vld [vmem:[%s3404_s4 + $0x60] sm:$0xff]  ;;  %v120_v14 = vld [vmem:[%s3404_s4 + $0x50] sm:$0xff]  ;;  %v119_v15 = vld [vmem:[%s3404_s4 + $0x48] sm:$0xff] }
   0x6   :  { %50 = vmatpush.msra.mxu0 %v29_v2  ;;  %173 = vmatpush.msra.mxu2 %v123_v11  ;;  %v118_v16 = vld [vmem:[%s3404_s4 + $0x40] sm:$0xff]  ;;  %v117_v17 = vld [vmem:[%s3404_s4 + $0x38] sm:$0xff]  ;;  %v24_v20 = vld [vmem:[%s3405_s1 + $0x8] sm:$0xff] }
   0x7   :  { %v2700_v18 = vld [vmem:[%s3406_s0] sm:$0xff]  ;;  %v125_v19 = vld [vmem:[%s3404_s4 + $0x78] sm:$0xff]  ;;  %v2718_v22 = vld [vmem:[%s3406_s0 + $0x8] sm:$0xff] }
   0x8   :  { %51 = vmatpush.msra.mxu0 %v28_v4  ;;  %174 = vmatpush.msra.mxu2 %v122_v12  ;;  %v2713_v21 = vld [vmem:[%s3404_s4 + $0xa0] sm:$0xff]  ;;  %v235_v24 = vld [vmem:[%s3404_s4 + $0xf0] sm:$0xff]  ;;  %v2731_v25 = vld [vmem:[%s3404_s4 + $0x98] sm:$0xff] }
   0x9   :  { %149 = vmatpush.msra.mxu1 %v125_v19  ;;  %v126_v23 = vld [vmem:[%s3404_s4 + $0x80] sm:$0xff]  ;;  %v2752_v41 = vld [vmem:[%s3404_s4 + $0x90] sm:$0xff]  ;;  %v2757_v42 = vld [vmem:[%s3404_s4 + $0x88] sm:$0xff] }
   0xa   :  { %52 = vmatpush.msra.mxu0 %v27_v5  ;;  %175 = vmatpush.msra.mxu2 %v121_v13  ;;  %v2787_v49 = vld [vmem:[%s3404_s4 + $0x118] ss:$0 sm:$0xff] }
   0xb   :  { %212 = vmatpush.msra.mxu3 %v126_v23 }
   0xc   :  { %53 = vmatpush.msra.mxu0 %v26_v6  ;;  %176 = vmatpush.msra.mxu2 %v120_v14 }
   0xe   :  { %54 = vmatpush.msra.mxu0 %v25_v7  ;;  %177 = vmatpush.msra.mxu2 %v119_v15  ;;  %v234_v15 = vld [vmem:[%s3404_s4 + $0xe8] sm:$0xff] }
   0xf   :  { %2322 = vmatmul.msk.f32.vlgmr.msra.gmra.mxu0 %vm32_vm0, %v23_v8  ;;  %251 = vmatpush.msrb.mxu1 %v234_v15 }
  0x10   :  { %178 = vmatpush.msra.mxu2 %v118_v16  ;;  %297 = vmatpush.msrb.mxu0 %v235_v24 }
  0x12   :  { %179 = vmatpush.msra.mxu2 %v117_v17  ;;  %730 = vmatpush.msra.mxu0 %v2713_v21 }
  0x13   :  { %2326 = vmatmul.msk.f32.vlgmr.msra.gmra.mxu2 %vm157_vm1, %v2700_v18 }
  0x14   :  { %333 = vmatpush.msrb.mxu2 %v2713_v21  ;;  %731 = vmatpush.msra.mxu0 %v2731_v25 }
  0x16   :  { %334 = vmatpush.msrb.mxu2 %v2731_v25  ;;  %732 = vmatpush.msra.mxu0 %v2752_v41 }
  0x17   :  { %2323 = vmatmul.msk.f32.gmra.mxu0 %vm32_vm0, %v24_v20 }
  0x18   :  { %335 = vmatpush.msrb.mxu2 %v2752_v41  ;;  %733 = vmatpush.msra.mxu0 %v2757_v42 }
  0x1a   :  { %336 = vmatpush.msrb.mxu2 %v2757_v42 }
  0x1b   :  { %2327 = vmatmul.msk.f32.gmra.mxu2 %vm157_vm1, %v2718_v22 }
  0x1c   :  { %532 = vmatpush.msra.mxu2 %v2713_v21 }
  0x1e   :  { %533 = vmatpush.msra.mxu2 %v2731_v25 }
  0x20   :  { %534 = vmatpush.msra.mxu2 %v2752_v41 }
  0x22   :  { %535 = vmatpush.msra.mxu2 %v2757_v42 }
  0x23   :  { %337 = vmatmul.f32.vlgmr.msrb.gmra.mxu2 %v2603_v43 }
  0x24   :  { %796 = vmatpush.msrb.mxu2 %v2713_v21 }
  0x26   :  { %797 = vmatpush.msrb.mxu2 %v2731_v25 }
  0x28   :  { %798 = vmatpush.msrb.mxu2 %v2752_v41 }
  0x2a   :  { %799 = vmatpush.msrb.mxu2 %v2757_v42 }
  0x5d   :  { %v2738_v28 = vpop.permute.xlu2 %110 }
  0x8c   :  { %v56_v9 = vpop.f32.mrf.mxu0 }
  0x8d   :  { %96 = vrot.lane.b32.xlu2 %v56_v9, %s2597_s12  ;;  %80 = vrot.lane.b32.xlu1 %v56_v9, %s2598_s13 }
  0x8e   :  { %64 = vrot.lane.b32.xlu0 %v56_v9, %s2599_s14 }
  0x94   :  { %v59_v57 = vpop.f32.mrf.mxu0 }
  0x95   :  { %88 = vrot.lane.b32.xlu1 %v56_v9, %s2600_s15 }
  0x96   :  { %72 = vrot.lane.b32.xlu0 %v56_v9, %s2601_s16  ;;  %v181_v45 = vpop.f32.mrf.mxu2 }
  0x9e   :  { %v2782_v46 = vpop.f32.mrf.mxu2 }
  0xa6   :  { %v338_v53 = vpop.f32.mrf.mxu2 }
  0xe7   :  { %v97_v35 = vpop.permute.xlu2 %96 }
  0xff   :  { %v81_v27 = vpop.permute.xlu1 %80 }
 0x100   :  { %v65_v26 = vpop.permute.xlu0 %64 }
 0x101   :  { %v70_v29 = vmax.f32 %v56_v9, %v65_v26 }
 0x107   :  { %v89_v33 = vpop.permute.xlu1 %88 }
 0x108   :  { %v73_v30 = vpop.permute.xlu0 %72 }
 0x109   :  { %v78_v31 = vmax.f32 %v70_v29, %v73_v30 }
 0x10b   :  { %v86_v32 = vmax.f32 %v78_v31, %v81_v27 }
 0x10d   :  { %v94_v34 = vmax.f32 %v86_v32, %v89_v33 }
 0x10f   :  { %v113_v36 = vadd.f32 %v2738_v28, %v94_v34  ;;  %v102_v37 = vmax.f32 %v94_v34, %v97_v35 }
 0x111   :  { %v115_v38 = vmax.f32 %v113_v36, 0.0  ;;  %v2742_v39 = vadd.f32 %v2649_v3, %v102_v37 }
 0x113   :  { %189 = vrot.lane.b32.xlu0 %v115_v38, %s2602_s28  ;;  %v107_v40 = vmax.f32 %v2742_v39, 0.0 }
 0x115   :  { %2324 = vmatmul.msk.f32.vlgmr.msra.gmra.mxu1 %vm127_vm2, %v107_v40 }
 0x116   :  { %400 = vmatpush.msra.mxu1 %v2713_v21 }
 0x118   :  { %401 = vmatpush.msra.mxu1 %v2731_v25 }
 0x11a   :  { %402 = vmatpush.msra.mxu1 %v2752_v41 }
 0x11c   :  { %403 = vmatpush.msra.mxu1 %v2757_v42 }
 0x185   :  { %v190_v44 = vpop.permute.xlu0 %189 }
 0x186   :  { %2328 = vmatmul.msk.f32.vlgmr.msra.gmra.mxu3 %vm127_vm2, %v190_v44  ;;  %2334 = vmatmul.msk.f32.vlgmr.msrb.gmra.mxu0 %vm127_vm2, %v190_v44 }
 0x187   :  { %994 = vmatpush.msrb.mxu0 %v2713_v21 }
 0x189   :  { %995 = vmatpush.msrb.mxu0 %v2731_v25 }
 0x18b   :  { %996 = vmatpush.msrb.mxu0 %v2752_v41 }
 0x18d   :  { %997 = vmatpush.msrb.mxu0 %v2757_v42 }
 0x192   :  { %v151_v47 = vpop.f32.mrf.mxu1 }
 0x193   :  { %v182_v48 = vadd.f32 %v181_v45, %v151_v47 }
 0x209   :  { %v214_v50 = vpop.f32.mrf.mxu3 }
 0x20a   :  { %v220_v51 = vadd.f32 %v214_v50, %v182_v48 }
 0x20c   :  { %v2790_v52 = vadd.f32 %v2787_v49, %v220_v51 }
 0x20e   :  { %v341_v54 = vperm.slane %v2790_v52, 0  ;;  %v408_v38 = vperm.slane %v2790_v52, 1 }
 0x210   :  { %v342_v55 = vadd.f32 %v341_v54, %v338_v53  ;;  %v233_v54 = vld [vmem:[%s3404_s4 + $0xe0] sm:$0xff] }
 0x211   :  { %267 = vmatpush.msrb.mxu3 %v233_v54 }
 0x212   :  { %2391 = vtanh.f32 %v342_v55  ;;  %v343_v58 = vsub.f32 0.0, %v342_v55  ;;  %v232_v55 = vld [vmem:[%s3404_s4 + $0xd8] sm:$0xff] }
 0x213   :  { %268 = vmatpush.msrb.mxu3 %v232_v55 }
 0x214   :  { %v344_v59 = vmul.f32 1.442695, %v343_v58  ;;  %v228_v58 = vld [vmem:[%s3404_s4 + $0xb8] sm:$0xff] }
 0x216   :  { %2393 = vpow2.f32 %v344_v59 }
 0x218   :  { %v2392_v56 = vpop.eup %2391 }
 0x219   :  { %365 = vrot.lane.b32.xlu1 %v2392_v56, %s2604_s10  ;;  %v230_v56 = vld [vmem:[%s3404_s4 + $0xc8] sm:$0xff] }
 0x21c   :  { %v2394_v60 = vpop.eup %2393 }
 0x21d   :  { %v346_v61 = vadd.f32 1.0, %v2394_v60  ;;  %v227_v60 = vld [vmem:[%s3404_s4 + $0xb0] sm:$0xff] }
 0x21f   :  { %2395 = vrcp.f32 %v346_v61  ;;  %v358_v4 = vand.u32 2147483648, %v346_v61  ;;  %vm352_vm4 = vweird.f32 %v346_v61  ;;  %v356_v5 = vand.u32 2147483647, %v346_v61 }
 0x221   :  { %66 = vrot.lane.b32.xlu1 %v59_v57, %s2599_s14  ;;  %v359_v7 = vor.u32 1.1754944e-38, %v358_v4  ;;  %vm357_vm6 = vcmp.eq.f32.partialorder %v356_v5, 8.507059e+37  ;;  %s2605_s14 = smov 32  }
 0x225   :  { %v2396_v62 = vpop.eup %2395 }
 0x226   :  { %v348_v63 = vmul.f32 %v2396_v62, %v346_v61  ;;  %vm353_vm3 = vweird.f32 %v2396_v62 }
 0x227   :  { %vm354_vm5 = vmor %vm352_vm4, %vm353_vm3 }
 0x228   :  { %v349_v0 = vsub.f32 1.0, %v348_v63 }
 0x229   :  { %90 = vrot.lane.b32.xlu1 %v59_v57, %s2600_s15 }
 0x22a   :  { %v350_v1 = vmul.f32 %v2396_v62, %v349_v0 }
 0x22c   :  { %v351_v2 = vadd.f32 %v2396_v62, %v350_v1 }
 0x22e   :  { %v355_v6 = vsel %vm354_vm5, %v2396_v62, %v351_v2  ;;  %v226_v62 = vld [vmem:[%s3404_s4 + $0xa8] sm:$0xff] }
 0x22f   :  { %v360_v9 = vsel %vm357_vm6, %v359_v7, %v355_v6 }
 0x230   :  { %v363_v11 = vmul.f32 0.0, %v360_v9 }
 0x28b   :  { %v366_v8 = vpop.permute.xlu1 %365 }
 0x28c   :  { %v368_v10 = vmul.f32 %v366_v8, %v360_v9 }
 0x28e   :  { %370 = vrot.lane.b32.xlu2 %v368_v10, %s2605_s14 }
 0x293   :  { %v67_v16 = vpop.permute.xlu1 %66 }
 0x294   :  { %v71_v23 = vmax.f32 %v59_v57, %v67_v16 }
 0x296   :  { %74 = vrot.lane.b32.xlu2 %v59_v57, %s2601_s16 }
 0x29b   :  { %v91_v27 = vpop.permute.xlu1 %90 }
 0x29e   :  { %98 = vrot.lane.b32.xlu2 %v59_v57, %s2597_s12 }
 0x2e8   :  { %v371_v12 = vpop.permute.xlu2 %370 }
 0x2e9   :  { %v2799_v13 = vadd.f32 %v371_v12, %v363_v11 }
 0x2eb   :  { %2397 = vtanh.f32 %v2799_v13 }
 0x2f0   :  { %v75_v20 = vpop.permute.xlu2 %74 }
 0x2f1   :  { %v2398_v14 = vpop.eup %2397  ;;  %v79_v24 = vmax.f32 %v71_v23, %v75_v20 }
 0x2f2   :  { %376 = vrot.lane.b32.xlu0 %v2398_v14, %s2604_s10 }
 0x2f8   :  { %v99_v30 = vpop.permute.xlu2 %98 }
 0x2fa   :  { %82 = vrot.lane.b32.xlu0 %v59_v57, %s2598_s13  ;;  %v229_v57 = vld [vmem:[%s3404_s4 + $0xc0] sm:$0xff] }
 0x364   :  { %v377_v17 = vpop.permute.xlu0 %376 }
 0x365   :  { %v379_v19 = vmul.f32 %v377_v17, %v360_v9 }
 0x367   :  { %381 = vrot.lane.b32.xlu0 %v379_v19, %s2605_s14 }
 0x36c   :  { %v83_v26 = vpop.permute.xlu0 %82 }
 0x36d   :  { %v87_v29 = vmax.f32 %v79_v24, %v83_v26 }
 0x36f   :  { %v95_v31 = vmax.f32 %v87_v29, %v91_v27 }
 0x371   :  { %v103_v32 = vmax.f32 %v95_v31, %v99_v30  ;;  %v114_v45 = vadd.f32 %v2738_v28, %v95_v31  ;;  %v231_v28 = vld [vmem:[%s3404_s4 + $0xd0] sm:$0xff]  ;;  %v474_v30 = vperm.slane %v2790_v52, 2 }
 0x372   :  { %269 = vmatpush.msrb.mxu3 %v231_v28 }
 0x373   :  { %v106_v33 = vadd.f32 %v2649_v3, %v103_v32  ;;  %v116_v47 = vmax.f32 %v114_v45, 0.0 }
 0x374   :  { %270 = vmatpush.msrb.mxu3 %v230_v56 }
 0x375   :  { %v108_v34 = vmax.f32 %v106_v33, 0.0 }
 0x376   :  { %271 = vmatpush.msrb.mxu3 %v229_v57 }
 0x377   :  { %2325 = vmatmul.msk.f32.gmra.mxu1 %vm127_vm2, %v108_v34 }
 0x378   :  { %272 = vmatpush.msrb.mxu3 %v228_v58 }
 0x37a   :  { %273 = vmatpush.msrb.mxu3 %v227_v60 }
 0x37c   :  { %274 = vmatpush.msrb.mxu3 %v226_v62  ;;  %v540_v62 = vperm.slane %v2790_v52, 3 }
 0x37e   :  { %466 = vmatpush.msra.mxu3 %v2713_v21 }
 0x37f   :  { %2330 = vmatmul.msk.f32.vlgmr.msrb.gmra.mxu1 %vm127_vm2, %v107_v40 }
 0x380   :  { %598 = vmatpush.msrb.mxu1 %v2713_v21  ;;  %467 = vmatpush.msra.mxu3 %v2731_v25 }
 0x382   :  { %599 = vmatpush.msrb.mxu1 %v2731_v25  ;;  %468 = vmatpush.msra.mxu3 %v2752_v41 }
 0x384   :  { %600 = vmatpush.msrb.mxu1 %v2752_v41  ;;  %469 = vmatpush.msra.mxu3 %v2757_v42 }
 0x386   :  { %601 = vmatpush.msrb.mxu1 %v2757_v42 }
 0x387   :  { %2331 = vmatmul.msk.f32.gmra.mxu1 %vm127_vm2, %v108_v34 }
 0x3d9   :  { %v382_v3 = vpop.permute.xlu0 %381 }
 0x3da   :  { %385 = vst.msk [vmem:[#allocation2] sm:$0x1] %vm384_vm7, %v382_v3  ;;  %2336 = vmatmul.msk.f32.vlgmr.msra.gmra.mxu1 %vm317_vm8, %v382_v3 }
 0x3db   :  { %862 = vmatpush.msra.mxu1 %v2713_v21 }
 0x3dd   :  { %863 = vmatpush.msra.mxu1 %v2731_v25 }
 0x3df   :  { %864 = vmatpush.msra.mxu1 %v2752_v41 }
 0x3e1   :  { %865 = vmatpush.msra.mxu1 %v2757_v42 }
 0x3f4   :  { %v2828_v35 = vpop.f32.mrf.mxu1 }
 0x3fc   :  { %v2830_v36 = vpop.f32.mrf.mxu1 }
 0x404   :  { %v2832_v37 = vpop.f32.mrf.mxu1 }
 0x457   :  { %v405_v39 = vpop.f32.mrf.mxu1 }
 0x458   :  { %v409_v40 = vadd.f32 %v408_v38, %v405_v39 }
 0x45a   :  { %2399 = vtanh.f32 %v409_v40  ;;  %v410_v48 = vsub.f32 0.0, %v409_v40 }
 0x45c   :  { %v411_v50 = vmul.f32 1.442695, %v410_v48 }
 0x45e   :  { %2401 = vpow2.f32 %v411_v50 }
 0x460   :  { %v2400_v44 = vpop.eup %2399 }
 0x461   :  { %432 = vrot.lane.b32.xlu1 %v2400_v44, %s2604_s10 }
 0x464   :  { %v2402_v51 = vpop.eup %2401 }
 0x465   :  { %v413_v53 = vadd.f32 1.0, %v2402_v51 }
 0x467   :  { %2403 = vrcp.f32 %v413_v53  ;;  %v425_v2 = vand.u32 2147483648, %v413_v53  ;;  %vm419_vm10 = vweird.f32 %v413_v53  ;;  %v423_v4 = vand.u32 2147483647, %v413_v53 }
 0x469   :  { %191 = vrot.lane.b32.xlu1 %v116_v47, %s2602_s28  ;;  %v426_v6 = vor.u32 1.1754944e-38, %v425_v2  ;;  %vm424_vm12 = vcmp.eq.f32.partialorder %v423_v4, 8.507059e+37 }
 0x46d   :  { %v2404_v59 = vpop.eup %2403 }
 0x46e   :  { %v415_v61 = vmul.f32 %v2404_v59, %v413_v53  ;;  %vm420_vm9 = vweird.f32 %v2404_v59 }
 0x46f   :  { %vm421_vm11 = vmor %vm419_vm10, %vm420_vm9 }
 0x470   :  { %v416_v63 = vsub.f32 1.0, %v415_v61 }
 0x472   :  { %v417_v0 = vmul.f32 %v2404_v59, %v416_v63 }
 0x474   :  { %v418_v1 = vadd.f32 %v2404_v59, %v417_v0 }
 0x476   :  { %v422_v5 = vsel %vm421_vm11, %v2404_v59, %v418_v1 }
 0x477   :  { %v427_v8 = vsel %vm424_vm12, %v426_v6, %v422_v5 }
 0x478   :  { %v430_v11 = vmul.f32 %v427_v8, %v2799_v13  ;;  %v299_v13 = vpop.f32.mrf.mxu0 }
 0x4d3   :  { %v433_v7 = vpop.permute.xlu1 %432 }
 0x4d4   :  { %v435_v9 = vmul.f32 %v433_v7, %v427_v8 }
 0x4d6   :  { %437 = vrot.lane.b32.xlu2 %v435_v9, %s2605_s14 }
 0x4db   :  { %v192_v10 = vpop.permute.xlu1 %191 }
 0x4dc   :  { %2329 = vmatmul.msk.f32.gmra.mxu3 %vm127_vm2, %v192_v10  ;;  %2335 = vmatmul.msk.f32.gmra.mxu0 %vm127_vm2, %v192_v10 }
 0x4e4   :  { %2332 = vmatmul.msk.f32.vlgmr.msrb.gmra.mxu3 %vm157_vm1, %v2700_v18  ;;  %v185_v18 = vadd.f32 %v2782_v46, %v2828_v35 }
 0x4e5   :  { %664 = vmatpush.msrb.mxu3 %v2713_v21 }
 0x4e7   :  { %665 = vmatpush.msrb.mxu3 %v2731_v25 }
 0x4e9   :  { %666 = vmatpush.msrb.mxu3 %v2752_v41 }
 0x4eb   :  { %667 = vmatpush.msrb.mxu3 %v2757_v42 }
 0x4ec   :  { %2333 = vmatmul.msk.f32.gmra.mxu3 %vm157_vm1, %v2718_v22  ;;  %v2887_v22 = vld [vmem:[%s3404_s4 + $0x120] ss:$0 sm:$0xff] }
 0x530   :  { %v438_v12 = vpop.permute.xlu2 %437 }
 0x531   :  { %v440_v14 = vadd.f32 %v438_v12, %v430_v11 }
 0x533   :  { %2405 = vtanh.f32 %v440_v14 }
 0x539   :  { %v2406_v15 = vpop.eup %2405 }
 0x53a   :  { %443 = vrot.lane.b32.xlu0 %v2406_v15, %s2604_s10 }
 0x55f   :  { %v217_v16 = vpop.f32.mrf.mxu3 }
 0x560   :  { %v2881_v17 = vadd.f32 %v217_v16, %v185_v18 }
 0x567   :  { %v276_v19 = vpop.f32.mrf.mxu3 }
 0x568   :  { %v277_v20 = vadd.f32 %v276_v19, %v2830_v36 }
 0x56a   :  { %v305_v23 = vadd.f32 %v299_v13, %v277_v20 }
 0x56c   :  { %v2890_v24 = vadd.f32 %v2887_v22, %v305_v23 }
 0x56f   :  { %v2899_v29 = vpop.f32.mrf.mxu3 }
 0x5ac   :  { %v444_v26 = vpop.permute.xlu0 %443 }
 0x5ad   :  { %v446_v27 = vmul.f32 %v444_v26, %v427_v8 }
 0x5af   :  { %448 = vrot.lane.b32.xlu2 %v446_v27, %s2605_s14  ;;  %v606_v27 = vperm.slane %v2790_v52, 4 }
 0x609   :  { %v449_v46 = vpop.permute.xlu2 %448 }
 0x60a   :  { %451 = vst.msk [vmem:[#allocation2 + $0x1] sm:$0x1] %vm384_vm7, %v449_v46  ;;  %2337 = vmatmul.msk.f32.vlgmr.msra.gmra.mxu3 %vm317_vm8, %v449_v46 }
 0x60b   :  { %928 = vmatpush.msra.mxu3 %v2713_v21 }
 0x60d   :  { %929 = vmatpush.msra.mxu3 %v2731_v25 }
 0x60f   :  { %930 = vmatpush.msra.mxu3 %v2752_v41 }
 0x611   :  { %931 = vmatpush.msra.mxu3 %v2757_v42 }
 0x68d   :  { %v471_v31 = vpop.f32.mrf.mxu3 }
 0x68e   :  { %v475_v32 = vadd.f32 %v474_v30, %v471_v31 }
 0x690   :  { %2407 = vtanh.f32 %v475_v32  ;;  %v476_v34 = vsub.f32 0.0, %v475_v32 }
 0x692   :  { %v477_v3 = vmul.f32 1.442695, %v476_v34 }
 0x694   :  { %2409 = vpow2.f32 %v477_v3 }
 0x696   :  { %v2408_v33 = vpop.eup %2407 }
 0x697   :  { %498 = vrot.lane.b32.xlu0 %v2408_v33, %s2604_s10 }
 0x69a   :  { %v2410_v35 = vpop.eup %2409 }
 0x69b   :  { %v479_v36 = vadd.f32 1.0, %v2410_v35 }
 0x69d   :  { %2411 = vrcp.f32 %v479_v36  ;;  %v491_v47 = vand.u32 2147483648, %v479_v36  ;;  %vm485_vm14 = vweird.f32 %v479_v36  ;;  %v489_v48 = vand.u32 2147483647, %v479_v36 }
 0x69f   :  { %v492_v51 = vor.u32 1.1754944e-38, %v491_v47  ;;  %vm490_vm0 = vcmp.eq.f32.partialorder %v489_v48, 8.507059e+37 }
 0x6a3   :  { %v2412_v38 = vpop.eup %2411 }
 0x6a4   :  { %v481_v39 = vmul.f32 %v2412_v38, %v479_v36  ;;  %vm486_vm13 = vweird.f32 %v2412_v38 }
 0x6a5   :  { %vm487_vm15 = vmor %vm485_vm14, %vm486_vm13 }
 0x6a6   :  { %v482_v40 = vsub.f32 1.0, %v481_v39 }
 0x6a8   :  { %v483_v44 = vmul.f32 %v2412_v38, %v482_v40 }
 0x6aa   :  { %v484_v45 = vadd.f32 %v2412_v38, %v483_v44 }
 0x6ac   :  { %v488_v50 = vsel %vm487_vm15, %v2412_v38, %v484_v45 }
 0x6ad   :  { %v493_v54 = vsel %vm490_vm0, %v492_v51, %v488_v50 }
 0x6ae   :  { %v496_v28 = vmul.f32 %v493_v54, %v440_v14 }
 0x709   :  { %v499_v53 = vpop.permute.xlu0 %498 }
 0x70a   :  { %v501_v55 = vmul.f32 %v499_v53, %v493_v54 }
 0x70c   :  { %503 = vrot.lane.b32.xlu1 %v501_v55, %s2605_s14 }
 0x77e   :  { %v504_v56 = vpop.permute.xlu1 %503 }
 0x77f   :  { %v506_v57 = vadd.f32 %v504_v56, %v496_v28 }
 0x781   :  { %2413 = vtanh.f32 %v506_v57 }
 0x787   :  { %v2414_v58 = vpop.eup %2413 }
 0x788   :  { %509 = vrot.lane.b32.xlu2 %v2414_v58, %s2604_s10 }
 0x7e2   :  { %v510_v59 = vpop.permute.xlu2 %509 }
 0x7e3   :  { %v512_v60 = vmul.f32 %v510_v59, %v493_v54 }
 0x7e5   :  { %514 = vrot.lane.b32.xlu0 %v512_v60, %s2605_s14  ;;  %v672_v60 = vperm.slane %v2790_v52, 5 }
 0x857   :  { %v515_v61 = vpop.permute.xlu0 %514 }
 0x858   :  { %517 = vst.msk [vmem:[#allocation2 + $0x2] sm:$0x1] %vm384_vm7, %v515_v61  ;;  %2338 = vmatmul.msk.f32.vlgmr.msra.gmra.mxu2 %vm317_vm8, %v515_v61 }
 0x859   :  { %1060 = vmatpush.msra.mxu2 %v2713_v21 }
 0x85b   :  { %1061 = vmatpush.msra.mxu2 %v2731_v25 }
 0x85d   :  { %1062 = vmatpush.msra.mxu2 %v2752_v41 }
 0x85f   :  { %1063 = vmatpush.msra.mxu2 %v2757_v42 }
 0x8db   :  { %v537_v63 = vpop.f32.mrf.mxu2 }
 0x8dc   :  { %v541_v0 = vadd.f32 %v540_v62, %v537_v63 }
 0x8de   :  { %2415 = vtanh.f32 %v541_v0  ;;  %v542_v2 = vsub.f32 0.0, %v541_v0 }
 0x8e0   :  { %v543_v4 = vmul.f32 1.442695, %v542_v2 }
 0x8e2   :  { %2417 = vpow2.f32 %v543_v4 }
 0x8e4   :  { %v2416_v1 = vpop.eup %2415 }
 0x8e5   :  { %564 = vrot.lane.b32.xlu1 %v2416_v1, %s2604_s10 }
 0x8e8   :  { %v2418_v5 = vpop.eup %2417 }
 0x8e9   :  { %v545_v6 = vadd.f32 1.0, %v2418_v5 }
 0x8eb   :  { %2419 = vrcp.f32 %v545_v6  ;;  %v557_v42 = vand.u32 2147483648, %v545_v6  ;;  %vm551_vm3 = vweird.f32 %v545_v6  ;;  %v555_v9 = vand.u32 2147483647, %v545_v6 }
 0x8ed   :  { %v558_v11 = vor.u32 1.1754944e-38, %v557_v42  ;;  %vm556_vm5 = vcmp.eq.f32.partialorder %v555_v9, 8.507059e+37 }
 0x8f1   :  { %v2420_v21 = vpop.eup %2419 }
 0x8f2   :  { %v547_v25 = vmul.f32 %v2420_v21, %v545_v6  ;;  %vm552_vm2 = vweird.f32 %v2420_v21 }
 0x8f3   :  { %vm553_vm4 = vmor %vm551_vm3, %vm552_vm2 }
 0x8f4   :  { %v548_v7 = vsub.f32 1.0, %v547_v25 }
 0x8f6   :  { %v549_v41 = vmul.f32 %v2420_v21, %v548_v7 }
 0x8f8   :  { %v550_v8 = vadd.f32 %v2420_v21, %v549_v41 }
 0x8fa   :  { %v554_v10 = vsel %vm553_vm4, %v2420_v21, %v550_v8 }
 0x8fb   :  { %v559_v14 = vsel %vm556_vm5, %v558_v11, %v554_v10 }
 0x8fc   :  { %v562_v18 = vmul.f32 %v559_v14, %v506_v57 }
 0x957   :  { %v565_v12 = vpop.permute.xlu1 %564 }
 0x958   :  { %v567_v15 = vmul.f32 %v565_v12, %v559_v14 }
 0x95a   :  { %569 = vrot.lane.b32.xlu2 %v567_v15, %s2605_s14 }
 0x9b4   :  { %v570_v16 = vpop.permute.xlu2 %569 }
 0x9b5   :  { %v572_v19 = vadd.f32 %v570_v16, %v562_v18 }
 0x9b7   :  { %2421 = vtanh.f32 %v572_v19 }
 0x9bd   :  { %v2422_v20 = vpop.eup %2421 }
 0x9be   :  { %575 = vrot.lane.b32.xlu0 %v2422_v20, %s2604_s10 }
 0xa30   :  { %v576_v13 = vpop.permute.xlu0 %575 }
 0xa31   :  { %v578_v23 = vmul.f32 %v576_v13, %v559_v14 }
 0xa33   :  { %580 = vrot.lane.b32.xlu1 %v578_v23, %s2605_s14  ;;  %v2933_v23 = vpop.f32.mrf.mxu0 }
 0xaa5   :  { %v581_v26 = vpop.permute.xlu1 %580 }
 0xaa6   :  { %583 = vst.msk [vmem:[#allocation2 + $0x3] sm:$0x1] %vm384_vm7, %v581_v26  ;;  %2339 = vmatmul.msk.f32.vlgmr.msrb.gmra.mxu1 %vm317_vm8, %v581_v26  ;;  %v738_v26 = vperm.slane %v2790_v52, 6 }
 0xb23   :  { %v603_v46 = vpop.f32.mrf.mxu1 }
 0xb24   :  { %v607_v30 = vadd.f32 %v606_v27, %v603_v46 }
 0xb26   :  { %2423 = vtanh.f32 %v607_v30  ;;  %v608_v32 = vsub.f32 0.0, %v607_v30 }
 0xb28   :  { %v609_v33 = vmul.f32 1.442695, %v608_v32 }
 0xb2a   :  { %2425 = vpow2.f32 %v609_v33 }
 0xb2c   :  { %v2424_v31 = vpop.eup %2423 }
 0xb2d   :  { %630 = vrot.lane.b32.xlu2 %v2424_v31, %s2604_s10 }
 0xb30   :  { %v2426_v34 = vpop.eup %2425 }
 0xb31   :  { %v611_v3 = vadd.f32 1.0, %v2426_v34 }
 0xb33   :  { %2427 = vrcp.f32 %v611_v3  ;;  %v623_v44 = vand.u32 2147483648, %v611_v3  ;;  %vm617_vm9 = vweird.f32 %v611_v3  ;;  %v621_v45 = vand.u32 2147483647, %v611_v3 }
 0xb35   :  { %v624_v48 = vor.u32 1.1754944e-38, %v623_v44  ;;  %vm622_vm11 = vcmp.eq.f32.partialorder %v621_v45, 8.507059e+37 }
 0xb39   :  { %v2428_v35 = vpop.eup %2427 }
 0xb3a   :  { %v613_v36 = vmul.f32 %v2428_v35, %v611_v3  ;;  %vm618_vm6 = vweird.f32 %v2428_v35 }
 0xb3b   :  { %vm619_vm10 = vmor %vm617_vm9, %vm618_vm6 }
 0xb3c   :  { %v614_v38 = vsub.f32 1.0, %v613_v36 }
 0xb3e   :  { %v615_v39 = vmul.f32 %v2428_v35, %v614_v38 }
 0xb40   :  { %v616_v40 = vadd.f32 %v2428_v35, %v615_v39 }
 0xb42   :  { %v620_v47 = vsel %vm619_vm10, %v2428_v35, %v616_v40 }
 0xb43   :  { %v625_v51 = vsel %vm622_vm11, %v624_v48, %v620_v47 }
 0xb44   :  { %v628_v54 = vmul.f32 %v625_v51, %v572_v19 }
 0xb87   :  { %v631_v50 = vpop.permute.xlu2 %630 }
 0xb88   :  { %v633_v53 = vmul.f32 %v631_v50, %v625_v51 }
 0xb8a   :  { %635 = vrot.lane.b32.xlu0 %v633_v53, %s2605_s14 }
 0xbfc   :  { %v636_v55 = vpop.permute.xlu0 %635 }
 0xbfd   :  { %v638_v28 = vadd.f32 %v636_v55, %v628_v54 }
 0xbff   :  { %2429 = vtanh.f32 %v638_v28 }
 0xc05   :  { %v2430_v56 = vpop.eup %2429 }
 0xc06   :  { %641 = vrot.lane.b32.xlu1 %v2430_v56, %s2604_s10 }
 0xc78   :  { %v642_v57 = vpop.permute.xlu1 %641 }
 0xc79   :  { %v644_v58 = vmul.f32 %v642_v57, %v625_v51 }
 0xc7b   :  { %646 = vrot.lane.b32.xlu2 %v644_v58, %s2605_s14 }
 0xcd5   :  { %v647_v59 = vpop.permute.xlu2 %646 }
 0xcd6   :  { %649 = vst.msk [vmem:[#allocation2 + $0x4] sm:$0x1] %vm384_vm7, %v647_v59  ;;  %2340 = vmatmul.msk.f32.vlgmr.msrb.gmra.mxu3 %vm317_vm8, %v647_v59  ;;  %v804_v59 = vperm.slane %v2790_v52, 7 }
 0xd59   :  { %v669_v61 = vpop.f32.mrf.mxu3 }
 0xd5a   :  { %v673_v62 = vadd.f32 %v672_v60, %v669_v61 }
 0xd5c   :  { %2431 = vtanh.f32 %v673_v62  ;;  %v674_v0 = vsub.f32 0.0, %v673_v62 }
 0xd5e   :  { %v675_v1 = vmul.f32 1.442695, %v674_v0 }
 0xd60   :  { %2433 = vpow2.f32 %v675_v1 }
 0xd62   :  { %v2432_v63 = vpop.eup %2431 }
 0xd63   :  { %696 = vrot.lane.b32.xlu0 %v2432_v63, %s2604_s10 }
 0xd66   :  { %v2434_v2 = vpop.eup %2433 }
 0xd67   :  { %v677_v4 = vadd.f32 1.0, %v2434_v2 }
 0xd69   :  { %2435 = vrcp.f32 %v677_v4  ;;  %v689_v41 = vand.u32 2147483648, %v677_v4  ;;  %vm683_vm13 = vweird.f32 %v677_v4  ;;  %v687_v8 = vand.u32 2147483647, %v677_v4 }
 0xd6b   :  { %v690_v9 = vor.u32 1.1754944e-38, %v689_v41  ;;  %vm688_vm15 = vcmp.eq.f32.partialorder %v687_v8, 8.507059e+37 }
 0xd6f   :  { %v2436_v5 = vpop.eup %2435 }
 0xd70   :  { %v679_v6 = vmul.f32 %v2436_v5, %v677_v4  ;;  %vm684_vm12 = vweird.f32 %v2436_v5 }
 0xd71   :  { %vm685_vm14 = vmor %vm683_vm13, %vm684_vm12 }
 0xd72   :  { %v680_v21 = vsub.f32 1.0, %v679_v6 }
 0xd74   :  { %v681_v25 = vmul.f32 %v2436_v5, %v680_v21 }
 0xd76   :  { %v682_v7 = vadd.f32 %v2436_v5, %v681_v25 }
 0xd78   :  { %v686_v42 = vsel %vm685_vm14, %v2436_v5, %v682_v7 }
 0xd79   :  { %v691_v11 = vsel %vm688_vm15, %v690_v9, %v686_v42 }
 0xd7a   :  { %v694_v14 = vmul.f32 %v691_v11, %v638_v28 }
 0xdd5   :  { %v697_v10 = vpop.permute.xlu0 %696 }
 0xdd6   :  { %v699_v12 = vmul.f32 %v697_v10, %v691_v11 }
 0xdd8   :  { %701 = vrot.lane.b32.xlu1 %v699_v12, %s2605_s14 }
 0xe4a   :  { %v702_v15 = vpop.permute.xlu1 %701 }
 0xe4b   :  { %v704_v18 = vadd.f32 %v702_v15, %v694_v14 }
 0xe4d   :  { %2437 = vtanh.f32 %v704_v18 }
 0xe53   :  { %v2438_v16 = vpop.eup %2437 }
 0xe54   :  { %707 = vrot.lane.b32.xlu2 %v2438_v16, %s2604_s10 }
 0xeae   :  { %v708_v19 = vpop.permute.xlu2 %707 }
 0xeaf   :  { %v710_v20 = vmul.f32 %v708_v19, %v691_v11  ;;  %v2953_v19 = vld [vmem:[%s3404_s4 + $0x110] sm:$0xff] }
 0xeb0   :  { %1128 = vmatpush.msrb.mxu1 %v2953_v19  ;;  %1197 = vmatpush.msrb.mxu3 %v2953_v19 }
 0xeb1   :  { %712 = vrot.lane.b32.xlu0 %v710_v20, %s2605_s14  ;;  %v2958_v20 = vld [vmem:[%s3404_s4 + $0x108] sm:$0xff] }
 0xeb2   :  { %1129 = vmatpush.msrb.mxu1 %v2958_v20  ;;  %1198 = vmatpush.msrb.mxu3 %v2958_v20 }
 0xf23   :  { %v713_v13 = vpop.permute.xlu0 %712 }
 0xf24   :  { %715 = vst.msk [vmem:[#allocation2 + $0x5] sm:$0x1] %vm384_vm7, %v713_v13  ;;  %2341 = vmatmul.msk.f32.vlgmr.msra.gmra.mxu0 %vm317_vm8, %v713_v13  ;;  %v2965_v13 = vld [vmem:[%s3404_s4 + $0x100] sm:$0xff] }
 0xf25   :  { %1265 = vmatpush.msra.mxu0 %v2953_v19  ;;  %1130 = vmatpush.msrb.mxu1 %v2965_v13 }
 0xf26   :  { %1199 = vmatpush.msrb.mxu3 %v2965_v13 }
 0xf27   :  { %1266 = vmatpush.msra.mxu0 %v2958_v20 }
 0xf29   :  { %1267 = vmatpush.msra.mxu0 %v2965_v13 }
 0xfa1   :  { %v735_v27 = vpop.f32.mrf.mxu0 }
 0xfa2   :  { %v739_v46 = vadd.f32 %v738_v26, %v735_v27  ;;  %v2974_v26 = vld [vmem:[%s3404_s4 + $0xf8] sm:$0xff] }
 0xfa3   :  { %1131 = vmatpush.msrb.mxu1 %v2974_v26  ;;  %1200 = vmatpush.msrb.mxu3 %v2974_v26 }
 0xfa4   :  { %2439 = vtanh.f32 %v739_v46  ;;  %v740_v31 = vsub.f32 0.0, %v739_v46  ;;  %1268 = vmatpush.msra.mxu0 %v2974_v26  ;;  %v2999_v46 = vadd.f32 %v2787_v49, %v2881_v17 }
 0xfa6   :  { %v741_v32 = vmul.f32 1.442695, %v740_v31 }
 0xfa8   :  { %2441 = vpow2.f32 %v741_v32  ;;  %v870_v32 = vperm.slane %v2999_v46, 0 }
 0xfaa   :  { %v2440_v30 = vpop.eup %2439 }
 0xfab   :  { %762 = vrot.lane.b32.xlu1 %v2440_v30, %s2604_s10  ;;  %v280_v30 = vadd.f32 %v2899_v29, %v2832_v37 }
 0xfad   :  { %v306_v31 = vadd.f32 %v2933_v23, %v280_v30 }
 0xfae   :  { %v2442_v33 = vpop.eup %2441 }
 0xfaf   :  { %v743_v34 = vadd.f32 1.0, %v2442_v33 }
 0xfb1   :  { %2443 = vrcp.f32 %v743_v34  ;;  %v755_v40 = vand.u32 2147483648, %v743_v34  ;;  %vm749_vm2 = vweird.f32 %v743_v34  ;;  %v753_v44 = vand.u32 2147483647, %v743_v34 }
 0xfb3   :  { %v756_v47 = vor.u32 1.1754944e-38, %v755_v40  ;;  %vm754_vm4 = vcmp.eq.f32.partialorder %v753_v44, 8.507059e+37 }
 0xfb7   :  { %v2444_v3 = vpop.eup %2443 }
 0xfb8   :  { %v745_v35 = vmul.f32 %v2444_v3, %v743_v34  ;;  %vm750_vm0 = vweird.f32 %v2444_v3  ;;  %v3006_v34 = vadd.f32 %v2887_v22, %v306_v31 }
 0xfb9   :  { %vm751_vm3 = vmor %vm749_vm2, %vm750_vm0 }
 0xfba   :  { %v746_v36 = vsub.f32 1.0, %v745_v35 }
 0xfbc   :  { %v747_v38 = vmul.f32 %v2444_v3, %v746_v36 }
 0xfbe   :  { %v748_v39 = vadd.f32 %v2444_v3, %v747_v38 }
 0xfc0   :  { %v752_v45 = vsel %vm751_vm3, %v2444_v3, %v748_v39  ;;  %v1136_v3 = vperm.slane %v3006_v34, 3 }
 0xfc1   :  { %v757_v50 = vsel %vm754_vm4, %v756_v47, %v752_v45 }
 0xfc2   :  { %v760_v53 = vmul.f32 %v757_v50, %v704_v18 }
0x101d   :  { %v763_v48 = vpop.permute.xlu1 %762 }
0x101e   :  { %v765_v51 = vmul.f32 %v763_v48, %v757_v50 }
0x1020   :  { %767 = vrot.lane.b32.xlu2 %v765_v51, %s2605_s14 }
0x107a   :  { %v768_v54 = vpop.permute.xlu2 %767 }
0x107b   :  { %v770_v55 = vadd.f32 %v768_v54, %v760_v53 }
0x107d   :  { %2445 = vtanh.f32 %v770_v55 }
0x1083   :  { %v2446_v28 = vpop.eup %2445 }
0x1084   :  { %773 = vrot.lane.b32.xlu0 %v2446_v28, %s2604_s10 }
0x10f6   :  { %v774_v56 = vpop.permute.xlu0 %773 }
0x10f7   :  { %v776_v57 = vmul.f32 %v774_v56, %v757_v50 }
0x10f9   :  { %778 = vrot.lane.b32.xlu1 %v776_v57, %s2605_s14 }
0x116b   :  { %v779_v58 = vpop.permute.xlu1 %778 }
0x116c   :  { %781 = vst.msk [vmem:[#allocation2 + $0x6] sm:$0x1] %vm384_vm7, %v779_v58  ;;  %2342 = vmatmul.msk.f32.vlgmr.msrb.gmra.mxu2 %vm317_vm8, %v779_v58 }
0x116d   :  { %1333 = vmatpush.msrb.mxu2 %v2953_v19 }
0x116f   :  { %1334 = vmatpush.msrb.mxu2 %v2958_v20 }
0x1171   :  { %1335 = vmatpush.msrb.mxu2 %v2965_v13 }
0x1173   :  { %1336 = vmatpush.msrb.mxu2 %v2974_v26 }
0x11ef   :  { %v801_v60 = vpop.f32.mrf.mxu2 }
0x11f0   :  { %v805_v61 = vadd.f32 %v804_v59, %v801_v60 }
0x11f2   :  { %2447 = vtanh.f32 %v805_v61  ;;  %v806_v63 = vsub.f32 0.0, %v805_v61 }
0x11f4   :  { %v807_v0 = vmul.f32 1.442695, %v806_v63 }
0x11f6   :  { %2449 = vpow2.f32 %v807_v0 }
0x11f8   :  { %v2448_v62 = vpop.eup %2447 }
0x11f9   :  { %828 = vrot.lane.b32.xlu2 %v2448_v62, %s2604_s10 }
0x11fc   :  { %v2450_v1 = vpop.eup %2449 }
0x11fd   :  { %v809_v2 = vadd.f32 1.0, %v2450_v1 }
0x11ff   :  { %2451 = vrcp.f32 %v809_v2  ;;  %v821_v7 = vand.u32 2147483648, %v809_v2  ;;  %vm815_vm6 = vweird.f32 %v809_v2  ;;  %v819_v52 = vand.u32 2147483647, %v809_v2 }
0x1201   :  { %v822_v8 = vor.u32 1.1754944e-38, %v821_v7  ;;  %vm820_vm10 = vcmp.eq.f32.partialorder %v819_v52, 8.507059e+37 }
0x1205   :  { %v2452_v4 = vpop.eup %2451 }
0x1206   :  { %v811_v5 = vmul.f32 %v2452_v4, %v809_v2  ;;  %vm816_vm5 = vweird.f32 %v2452_v4 }
0x1207   :  { %vm817_vm9 = vmor %vm815_vm6, %vm816_vm5 }
0x1208   :  { %v812_v6 = vsub.f32 1.0, %v811_v5 }
0x120a   :  { %v813_v21 = vmul.f32 %v2452_v4, %v812_v6 }
0x120c   :  { %v814_v25 = vadd.f32 %v2452_v4, %v813_v21 }
0x120e   :  { %v818_v41 = vsel %vm817_vm9, %v2452_v4, %v814_v25 }
0x120f   :  { %v823_v9 = vsel %vm820_vm10, %v822_v8, %v818_v41 }
0x1210   :  { %v826_v11 = vmul.f32 %v823_v9, %v770_v55 }
0x1253   :  { %v829_v42 = vpop.permute.xlu2 %828 }
0x1254   :  { %v831_v10 = vmul.f32 %v829_v42, %v823_v9 }
0x1256   :  { %833 = vrot.lane.b32.xlu0 %v831_v10, %s2605_s14 }
0x12c8   :  { %v834_v12 = vpop.permute.xlu0 %833 }
0x12c9   :  { %v2945_v14 = vadd.f32 %v834_v12, %v826_v11 }
0x12cb   :  { %2453 = vtanh.f32 %v2945_v14 }
0x12d1   :  { %v2454_v15 = vpop.eup %2453 }
0x12d2   :  { %839 = vrot.lane.b32.xlu1 %v2454_v15, %s2604_s10 }
0x1344   :  { %v840_v18 = vpop.permute.xlu1 %839 }
0x1345   :  { %v842_v16 = vmul.f32 %v840_v18, %v823_v9 }
0x1347   :  { %844 = vrot.lane.b32.xlu2 %v842_v16, %s2605_s14 }
0x13a1   :  { %v845_v27 = vpop.permute.xlu2 %844 }
0x13a2   :  { %847 = vst.msk [vmem:[#allocation2 + $0x7] sm:$0x1] %vm384_vm7, %v845_v27  ;;  %2343 = vmatmul.msk.f32.vlgmr.msra.gmra.mxu1 %vm317_vm8, %v845_v27  ;;  %v936_v27 = vperm.slane %v2999_v46, 1 }
0x13a3   :  { %1401 = vmatpush.msra.mxu1 %v2953_v19 }
0x13a5   :  { %1402 = vmatpush.msra.mxu1 %v2958_v20 }
0x13a7   :  { %1403 = vmatpush.msra.mxu1 %v2965_v13 }
0x13a9   :  { %1404 = vmatpush.msra.mxu1 %v2974_v26 }
0x13aa   :  { %1132 = vmatmul.f32.vlgmr.msrb.gmra.mxu1 %v2603_v43 }
0x13ab   :  { %1673 = vmatpush.msrb.mxu1 %v2953_v19 }
0x13ad   :  { %1674 = vmatpush.msrb.mxu1 %v2958_v20 }
0x13af   :  { %1675 = vmatpush.msrb.mxu1 %v2965_v13 }
0x13b1   :  { %1676 = vmatpush.msrb.mxu1 %v2974_v26 }
0x141f   :  { %v867_v43 = vpop.f32.mrf.mxu1 }
0x1420   :  { %v871_v33 = vadd.f32 %v870_v32, %v867_v43  ;;  %v1205_v32 = vperm.slane %v3006_v34, 2 }
0x1422   :  { %2455 = vtanh.f32 %v871_v33  ;;  %v872_v37 = vsub.f32 0.0, %v871_v33 }
0x1424   :  { %v873_v17 = vmul.f32 1.442695, %v872_v37 }
0x1427   :  { %v1133_v35 = vpop.f32.mrf.mxu1 }
0x1428   :  { %v2456_v36 = vpop.eup %2455  ;;  %v1137_v38 = vadd.f32 %v1136_v3, %v1133_v35 }
0x1429   :  { %894 = vrot.lane.b32.xlu0 %v2456_v36, %s2604_s10 }
0x142a   :  { %2457 = vtanh.f32 %v1137_v38  ;;  %v1138_v29 = vsub.f32 0.0, %v1137_v38 }
0x142b   :  { %2459 = vpow2.f32 %v873_v17 }
0x142c   :  { %v1139_v23 = vmul.f32 1.442695, %v1138_v29 }
0x142e   :  { %2461 = vpow2.f32 %v1139_v23 }
0x1430   :  { %v2458_v49 = vpop.eup %2457 }
0x1431   :  { %1160 = vrot.lane.b32.xlu1 %v2458_v49, %s2604_s10  ;;  %v2460_v39 = vpop.eup %2459 }
0x1432   :  { %v875_v22 = vadd.f32 1.0, %v2460_v39 }
0x1434   :  { %2463 = vrcp.f32 %v875_v22  ;;  %v2462_v40 = vpop.eup %2461  ;;  %v887_v28 = vand.u32 2147483648, %v875_v22  ;;  %vm881_vm12 = vweird.f32 %v875_v22  ;;  %v885_v56 = vand.u32 2147483647, %v875_v22 }
0x1435   :  { %v1141_v44 = vadd.f32 1.0, %v2462_v40 }
0x1436   :  { %v888_v59 = vor.u32 1.1754944e-38, %v887_v28  ;;  %vm886_vm14 = vcmp.eq.f32.partialorder %v885_v56, 8.507059e+37 }
0x1437   :  { %2465 = vrcp.f32 %v1141_v44  ;;  %v1153_v0 = vand.u32 2147483648, %v1141_v44  ;;  %vm1147_vm0 = vweird.f32 %v1141_v44  ;;  %v1151_v1 = vand.u32 2147483647, %v1141_v44 }
0x1439   :  { %v1154_v4 = vor.u32 1.1754944e-38, %v1153_v0  ;;  %vm1152_vm3 = vcmp.eq.f32.partialorder %v1151_v1, 8.507059e+37 }
0x143a   :  { %v2464_v45 = vpop.eup %2463 }
0x143b   :  { %v877_v47 = vmul.f32 %v2464_v45, %v875_v22  ;;  %vm882_vm11 = vweird.f32 %v2464_v45 }
0x143c   :  { %vm883_vm13 = vmor %vm881_vm12, %vm882_vm11 }
0x143d   :  { %v878_v48 = vsub.f32 1.0, %v877_v47  ;;  %v2466_v50 = vpop.eup %2465 }
0x143e   :  { %v1143_v53 = vmul.f32 %v2466_v50, %v1141_v44  ;;  %vm1148_vm15 = vweird.f32 %v2466_v50 }
0x143f   :  { %v879_v51 = vmul.f32 %v2464_v45, %v878_v48  ;;  %vm1149_vm2 = vmor %vm1147_vm0, %vm1148_vm15 }
0x1440   :  { %v1144_v55 = vsub.f32 1.0, %v1143_v53 }
0x1441   :  { %v880_v54 = vadd.f32 %v2464_v45, %v879_v51 }
0x1442   :  { %v1145_v58 = vmul.f32 %v2466_v50, %v1144_v55 }
0x1443   :  { %v884_v57 = vsel %vm883_vm13, %v2464_v45, %v880_v54 }
0x1444   :  { %v889_v61 = vsel %vm886_vm14, %v888_v59, %v884_v57  ;;  %v1146_v63 = vadd.f32 %v2466_v50, %v1145_v58 }
0x1445   :  { %v892_v25 = vmul.f32 %v889_v61, %v2945_v14 }
0x1446   :  { %v1150_v2 = vsel %vm1149_vm2, %v2466_v50, %v1146_v63 }
0x1447   :  { %v1155_v6 = vsel %vm1152_vm3, %v1154_v4, %v1150_v2 }
0x1448   :  { %v1158_v8 = vmul.f32 0.0, %v1155_v6 }
0x149b   :  { %v895_v60 = vpop.permute.xlu0 %894 }
0x149c   :  { %v897_v62 = vmul.f32 %v895_v60, %v889_v61 }
0x149e   :  { %899 = vrot.lane.b32.xlu2 %v897_v62, %s2605_s14 }
0x14a3   :  { %v1161_v5 = vpop.permute.xlu1 %1160 }
0x14a4   :  { %v1163_v21 = vmul.f32 %v1161_v5, %v1155_v6 }
0x14a6   :  { %1165 = vrot.lane.b32.xlu0 %v1163_v21, %s2605_s14 }
0x14f8   :  { %v900_v7 = vpop.permute.xlu2 %899 }
0x14f9   :  { %v3014_v52 = vadd.f32 %v900_v7, %v892_v25 }
0x14fb   :  { %2467 = vtanh.f32 %v3014_v52 }
0x1501   :  { %v2468_v41 = vpop.eup %2467 }
0x1502   :  { %905 = vrot.lane.b32.xlu1 %v2468_v41, %s2604_s10 }
0x1518   :  { %v1166_v42 = vpop.permute.xlu0 %1165 }
0x1519   :  { %v3018_v9 = vadd.f32 %v1166_v42, %v1158_v8 }
0x151b   :  { %2469 = vtanh.f32 %v3018_v9 }
0x1521   :  { %v2470_v10 = vpop.eup %2469 }
0x1522   :  { %1171 = vrot.lane.b32.xlu2 %v2470_v10, %s2604_s10 }
0x1574   :  { %v906_v11 = vpop.permute.xlu1 %905 }
0x1575   :  { %v908_v12 = vmul.f32 %v906_v11, %v889_v61 }
0x1577   :  { %910 = vrot.lane.b32.xlu0 %v908_v12, %s2605_s14 }
0x157c   :  { %v1172_v14 = vpop.permute.xlu2 %1171 }
0x157d   :  { %v3023_v15 = vmul.f32 %v1172_v14, %v1155_v6 }
0x157f   :  { %1181 = vrot.lane.b32.xlu1 %v3023_v15, %s2605_s14 }
0x15e9   :  { %v911_v18 = vpop.permute.xlu0 %910 }
0x15ea   :  { %913 = vst.msk [vmem:[#allocation2 + $0x8] sm:$0x1] %vm384_vm7, %v911_v18  ;;  %2344 = vmatmul.msk.f32.vlgmr.msra.gmra.mxu3 %vm317_vm8, %v911_v18  ;;  %v1002_v18 = vperm.slane %v2999_v46, 2 }
0x15eb   :  { %1469 = vmatpush.msra.mxu3 %v2953_v19 }
0x15ed   :  { %1470 = vmatpush.msra.mxu3 %v2958_v20 }
0x15ef   :  { %1471 = vmatpush.msra.mxu3 %v2965_v13 }
0x15f1   :  { %v1182_v16 = vpop.permute.xlu1 %1181  ;;  %1472 = vmatpush.msra.mxu3 %v2974_v26 }
0x15f2   :  { %2347 = vmatmul.msk.f32.vlgmr.msrb.gmra.mxu3 %vm317_vm8, %v1182_v16 }
0x15f3   :  { %1741 = vmatpush.msrb.mxu3 %v2953_v19 }
0x15f5   :  { %1742 = vmatpush.msrb.mxu3 %v2958_v20 }
0x15f7   :  { %1743 = vmatpush.msrb.mxu3 %v2965_v13 }
0x15f9   :  { %1744 = vmatpush.msrb.mxu3 %v2974_v26 }
0x166d   :  { %v933_v30 = vpop.f32.mrf.mxu3 }
0x166e   :  { %v937_v31 = vadd.f32 %v936_v27, %v933_v30 }
0x1670   :  { %2471 = vtanh.f32 %v937_v31  ;;  %v938_v36 = vsub.f32 0.0, %v937_v31  ;;  %v1273_v31 = vperm.slane %v3006_v34, 1 }
0x1672   :  { %v939_v38 = vmul.f32 1.442695, %v938_v36 }
0x1675   :  { %v1202_v43 = vpop.f32.mrf.mxu3 }
0x1676   :  { %v2472_v33 = vpop.eup %2471  ;;  %v1206_v3 = vadd.f32 %v1205_v32, %v1202_v43 }
0x1677   :  { %960 = vrot.lane.b32.xlu2 %v2472_v33, %s2604_s10 }
0x1678   :  { %2473 = vtanh.f32 %v1206_v3  ;;  %v1207_v23 = vsub.f32 0.0, %v1206_v3 }
0x1679   :  { %2475 = vpow2.f32 %v939_v38 }
0x167a   :  { %v1208_v22 = vmul.f32 1.442695, %v1207_v23 }
0x167e   :  { %v2474_v35 = vpop.eup %2473 }
0x167f   :  { %1229 = vrot.lane.b32.xlu0 %v2474_v35, %s2604_s10  ;;  %v2476_v49 = vpop.eup %2475 }
0x1680   :  { %v941_v37 = vadd.f32 1.0, %v2476_v49 }
0x1682   :  { %2477 = vrcp.f32 %v941_v37  ;;  %v953_v45 = vand.u32 2147483648, %v941_v37  ;;  %vm947_vm5 = vweird.f32 %v941_v37  ;;  %v951_v47 = vand.u32 2147483647, %v941_v37 }
0x1683   :  { %2479 = vpow2.f32 %v1208_v22 }
0x1684   :  { %v954_v51 = vor.u32 1.1754944e-38, %v953_v45  ;;  %vm952_vm9 = vcmp.eq.f32.partialorder %v951_v47, 8.507059e+37 }
0x1688   :  { %v2478_v17 = vpop.eup %2477 }
0x1689   :  { %v943_v29 = vmul.f32 %v2478_v17, %v941_v37  ;;  %vm948_vm4 = vweird.f32 %v2478_v17  ;;  %v2480_v48 = vpop.eup %2479 }
0x168a   :  { %vm949_vm6 = vmor %vm947_vm5, %vm948_vm4  ;;  %v1210_v53 = vadd.f32 1.0, %v2480_v48 }
0x168b   :  { %v944_v39 = vsub.f32 1.0, %v943_v29 }
0x168c   :  { %2481 = vrcp.f32 %v1210_v53  ;;  %v1222_v61 = vand.u32 2147483648, %v1210_v53  ;;  %vm1216_vm11 = vweird.f32 %v1210_v53  ;;  %v1220_v62 = vand.u32 2147483647, %v1210_v53 }
0x168d   :  { %v945_v40 = vmul.f32 %v2478_v17, %v944_v39 }
0x168e   :  { %v1223_v0 = vor.u32 1.1754944e-38, %v1222_v61  ;;  %vm1221_vm13 = vcmp.eq.f32.partialorder %v1220_v62, 8.507059e+37 }
0x168f   :  { %v946_v44 = vadd.f32 %v2478_v17, %v945_v40 }
0x1691   :  { %v950_v50 = vsel %vm949_vm6, %v2478_v17, %v946_v44 }
0x1692   :  { %v955_v55 = vsel %vm952_vm9, %v954_v51, %v950_v50  ;;  %v2482_v56 = vpop.eup %2481 }
0x1693   :  { %v1212_v57 = vmul.f32 %v2482_v56, %v1210_v53  ;;  %vm1217_vm10 = vweird.f32 %v2482_v56  ;;  %v958_v5 = vmul.f32 %v955_v55, %v3014_v52 }
0x1694   :  { %vm1218_vm12 = vmor %vm1216_vm11, %vm1217_vm10 }
0x1695   :  { %v1213_v58 = vsub.f32 1.0, %v1212_v57 }
0x1697   :  { %v1214_v59 = vmul.f32 %v2482_v56, %v1213_v58 }
0x1699   :  { %v1215_v60 = vadd.f32 %v2482_v56, %v1214_v59 }
0x169b   :  { %v1219_v63 = vsel %vm1218_vm12, %v2482_v56, %v1215_v60 }
0x169c   :  { %v1224_v2 = vsel %vm1221_vm13, %v1223_v0, %v1219_v63 }
0x169d   :  { %v1227_v25 = vmul.f32 %v1224_v2, %v3018_v9 }
0x16d1   :  { %v961_v54 = vpop.permute.xlu2 %960 }
0x16d2   :  { %v963_v28 = vmul.f32 %v961_v54, %v955_v55 }
0x16d4   :  { %965 = vrot.lane.b32.xlu1 %v963_v28, %s2605_s14 }
0x16f1   :  { %v1230_v1 = vpop.permute.xlu0 %1229 }
0x16f2   :  { %v1232_v4 = vmul.f32 %v1230_v1, %v1224_v2 }
0x16f4   :  { %1234 = vrot.lane.b32.xlu2 %v1232_v4, %s2605_s14 }
0x1746   :  { %v966_v6 = vpop.permute.xlu1 %965 }
0x1747   :  { %v3045_v21 = vadd.f32 %v966_v6, %v958_v5 }
0x1749   :  { %2483 = vtanh.f32 %v3045_v21 }
0x174e   :  { %v1235_v7 = vpop.permute.xlu2 %1234 }
0x174f   :  { %v2484_v41 = vpop.eup %2483  ;;  %v3049_v8 = vadd.f32 %v1235_v7, %v1227_v25 }
0x1750   :  { %971 = vrot.lane.b32.xlu0 %v2484_v41, %s2604_s10 }
0x1751   :  { %2485 = vtanh.f32 %v3049_v8 }
0x1757   :  { %v2486_v42 = vpop.eup %2485 }
0x1758   :  { %1240 = vrot.lane.b32.xlu1 %v2486_v42, %s2604_s10 }
0x17c2   :  { %v972_v10 = vpop.permute.xlu0 %971 }
0x17c3   :  { %v974_v52 = vmul.f32 %v972_v10, %v955_v55 }
0x17c5   :  { %976 = vrot.lane.b32.xlu2 %v974_v52, %s2605_s14 }
0x17ca   :  { %v1241_v11 = vpop.permute.xlu1 %1240 }
0x17cb   :  { %v3055_v12 = vmul.f32 %v1241_v11, %v1224_v2 }
0x17cd   :  { %1249 = vrot.lane.b32.xlu0 %v3055_v12, %s2605_s14 }
0x181f   :  { %v977_v9 = vpop.permute.xlu2 %976 }
0x1820   :  { %979 = vst.msk [vmem:[#allocation2 + $0x9] sm:$0x1] %vm384_vm7, %v977_v9  ;;  %2345 = vmatmul.msk.f32.vlgmr.msrb.gmra.mxu0 %vm317_vm8, %v977_v9 }
0x1821   :  { %1537 = vmatpush.msrb.mxu0 %v2953_v19 }
0x1823   :  { %1538 = vmatpush.msrb.mxu0 %v2958_v20 }
0x1825   :  { %1539 = vmatpush.msrb.mxu0 %v2965_v13 }
0x1827   :  { %1540 = vmatpush.msrb.mxu0 %v2974_v26 }
0x183f   :  { %v1250_v14 = vpop.permute.xlu0 %1249 }
0x1840   :  { %2348 = vmatmul.msk.f32.vlgmr.msra.gmra.mxu0 %vm317_vm8, %v1250_v14  ;;  %v1068_v14 = vperm.slane %v2999_v46, 3 }
0x1841   :  { %1809 = vmatpush.msra.mxu0 %v2953_v19 }
0x1843   :  { %1810 = vmatpush.msra.mxu0 %v2958_v20 }
0x1845   :  { %1811 = vmatpush.msra.mxu0 %v2965_v13 }
0x1847   :  { %1812 = vmatpush.msra.mxu0 %v2974_v26 }
0x189d   :  { %v999_v16 = vpop.f32.mrf.mxu0 }
0x189e   :  { %v1003_v27 = vadd.f32 %v1002_v18, %v999_v16 }
0x18a0   :  { %2487 = vtanh.f32 %v1003_v27  ;;  %v1004_v3 = vsub.f32 0.0, %v1003_v27  ;;  %v1341_v27 = vperm.slane %v3006_v34, 0 }
0x18a2   :  { %v1005_v35 = vmul.f32 1.442695, %v1004_v3 }
0x18a6   :  { %v2488_v30 = vpop.eup %2487 }
0x18a7   :  { %1026 = vrot.lane.b32.xlu1 %v2488_v30, %s2604_s10 }
0x18bd   :  { %v1270_v32 = vpop.f32.mrf.mxu0 }
0x18be   :  { %v1274_v43 = vadd.f32 %v1273_v31, %v1270_v32 }
0x18c0   :  { %2489 = vtanh.f32 %v1274_v43  ;;  %v1275_v36 = vsub.f32 0.0, %v1274_v43 }
0x18c1   :  { %2491 = vpow2.f32 %v1005_v35 }
0x18c2   :  { %v1276_v38 = vmul.f32 1.442695, %v1275_v36 }
0x18c4   :  { %2493 = vpow2.f32 %v1276_v38 }
0x18c6   :  { %v2490_v33 = vpop.eup %2489 }
0x18c7   :  { %1297 = vrot.lane.b32.xlu2 %v2490_v33, %s2604_s10  ;;  %v2492_v49 = vpop.eup %2491 }
0x18c8   :  { %v1007_v37 = vadd.f32 1.0, %v2492_v49 }
0x18ca   :  { %2495 = vrcp.f32 %v1007_v37  ;;  %v2494_v17 = vpop.eup %2493  ;;  %v1019_v50 = vand.u32 2147483648, %v1007_v37  ;;  %vm1013_vm15 = vweird.f32 %v1007_v37  ;;  %v1017_v51 = vand.u32 2147483647, %v1007_v37 }
0x18cb   :  { %v1278_v29 = vadd.f32 1.0, %v2494_v17 }
0x18cc   :  { %v1020_v55 = vor.u32 1.1754944e-38, %v1019_v50  ;;  %vm1018_vm2 = vcmp.eq.f32.partialorder %v1017_v51, 8.507059e+37 }
0x18cd   :  { %2497 = vrcp.f32 %v1278_v29  ;;  %v1290_v59 = vand.u32 2147483648, %v1278_v29  ;;  %vm1284_vm4 = vweird.f32 %v1278_v29  ;;  %v1288_v60 = vand.u32 2147483647, %v1278_v29 }
0x18cf   :  { %v1291_v62 = vor.u32 1.1754944e-38, %v1290_v59  ;;  %vm1289_vm6 = vcmp.eq.f32.partialorder %v1288_v60, 8.507059e+37 }
0x18d0   :  { %v2496_v23 = vpop.eup %2495 }
0x18d1   :  { %v1009_v39 = vmul.f32 %v2496_v23, %v1007_v37  ;;  %vm1014_vm14 = vweird.f32 %v2496_v23 }
0x18d2   :  { %vm1015_vm0 = vmor %vm1013_vm15, %vm1014_vm14 }
0x18d3   :  { %v1010_v22 = vsub.f32 1.0, %v1009_v39  ;;  %v2498_v40 = vpop.eup %2497 }
0x18d4   :  { %v1280_v45 = vmul.f32 %v2498_v40, %v1278_v29  ;;  %vm1285_vm3 = vweird.f32 %v2498_v40 }
0x18d5   :  { %v1011_v44 = vmul.f32 %v2496_v23, %v1010_v22  ;;  %vm1286_vm5 = vmor %vm1284_vm4, %vm1285_vm3 }
0x18d6   :  { %v1281_v48 = vsub.f32 1.0, %v1280_v45 }
0x18d7   :  { %v1012_v47 = vadd.f32 %v2496_v23, %v1011_v44 }
0x18d8   :  { %v1282_v54 = vmul.f32 %v2498_v40, %v1281_v48  ;;  %v1409_v48 = vperm.slane %v2890_v24, 7 }
0x18d9   :  { %v1016_v53 = vsel %vm1015_vm0, %v2496_v23, %v1012_v47 }
0x18da   :  { %v1021_v28 = vsel %vm1018_vm2, %v1020_v55, %v1016_v53  ;;  %v1283_v58 = vadd.f32 %v2498_v40, %v1282_v54 }
0x18db   :  { %v1024_v2 = vmul.f32 %v1021_v28, %v3045_v21 }
0x18dc   :  { %v1287_v61 = vsel %vm1286_vm5, %v2498_v40, %v1283_v58 }
0x18dd   :  { %v1292_v0 = vsel %vm1289_vm6, %v1291_v62, %v1287_v61 }
0x18de   :  { %v1295_v6 = vmul.f32 %v1292_v0, %v3049_v8 }
0x1919   :  { %v1027_v56 = vpop.permute.xlu1 %1026 }
0x191a   :  { %v1029_v57 = vmul.f32 %v1027_v56, %v1021_v28 }
0x191c   :  { %1031 = vrot.lane.b32.xlu0 %v1029_v57, %s2605_s14 }
0x1921   :  { %v1298_v63 = vpop.permute.xlu2 %1297 }
0x1922   :  { %v1300_v1 = vmul.f32 %v1298_v63, %v1292_v0 }
0x1924   :  { %1302 = vrot.lane.b32.xlu1 %v1300_v1, %s2605_s14 }
0x198e   :  { %v1032_v4 = vpop.permute.xlu0 %1031 }
0x198f   :  { %v3077_v5 = vadd.f32 %v1032_v4, %v1024_v2 }
0x1991   :  { %2499 = vtanh.f32 %v3077_v5 }
0x1996   :  { %v1303_v25 = vpop.permute.xlu1 %1302 }
0x1997   :  { %v2500_v7 = vpop.eup %2499  ;;  %v1305_v41 = vadd.f32 %v1303_v25, %v1295_v6 }
0x1998   :  { %1037 = vrot.lane.b32.xlu2 %v2500_v7, %s2604_s10 }
0x1999   :  { %2501 = vtanh.f32 %v1305_v41 }
0x199f   :  { %v2502_v42 = vpop.eup %2501 }
0x19a0   :  { %1308 = vrot.lane.b32.xlu0 %v2502_v42, %s2604_s10 }
0x19f2   :  { %v1038_v10 = vpop.permute.xlu2 %1037 }
0x19f3   :  { %v1040_v52 = vmul.f32 %v1038_v10, %v1021_v28 }
0x19f5   :  { %1042 = vrot.lane.b32.xlu1 %v1040_v52, %s2605_s14 }
0x1a12   :  { %v1309_v21 = vpop.permute.xlu0 %1308 }
0x1a13   :  { %v3084_v11 = vmul.f32 %v1309_v21, %v1292_v0 }
0x1a15   :  { %1317 = vrot.lane.b32.xlu2 %v3084_v11, %s2605_s14 }
0x1a67   :  { %v1043_v8 = vpop.permute.xlu1 %1042 }
0x1a68   :  { %1045 = vst.msk [vmem:[#allocation2 + $0xa] sm:$0x1] %vm384_vm7, %v1043_v8  ;;  %2346 = vmatmul.msk.f32.vlgmr.msra.gmra.mxu2 %vm317_vm8, %v1043_v8  ;;  %v1477_v8 = vperm.slane %v2890_v24, 6 }
0x1a69   :  { %1605 = vmatpush.msra.mxu2 %v2953_v19 }
0x1a6b   :  { %1606 = vmatpush.msra.mxu2 %v2958_v20 }
0x1a6d   :  { %1607 = vmatpush.msra.mxu2 %v2965_v13 }
0x1a6f   :  { %v1318_v9 = vpop.permute.xlu2 %1317  ;;  %1608 = vmatpush.msra.mxu2 %v2974_v26 }
0x1a70   :  { %2349 = vmatmul.msk.f32.vlgmr.msrb.gmra.mxu2 %vm317_vm8, %v1318_v9 }
0x1a71   :  { %1877 = vmatpush.msrb.mxu2 %v2953_v19 }
0x1a73   :  { %1878 = vmatpush.msrb.mxu2 %v2958_v20 }
0x1a75   :  { %1879 = vmatpush.msrb.mxu2 %v2965_v13 }
0x1a77   :  { %1880 = vmatpush.msrb.mxu2 %v2974_v26 }
0x1aeb   :  { %v1065_v18 = vpop.f32.mrf.mxu2 }
0x1aec   :  { %v3100_v16 = vadd.f32 %v1068_v14, %v1065_v18 }
0x1af3   :  { %v1338_v30 = vpop.f32.mrf.mxu2 }
0x1af4   :  { %v1342_v31 = vadd.f32 %v1341_v27, %v1338_v30 }
0x1af6   :  { %2503 = vtanh.f32 %v1342_v31  ;;  %v1343_v19 = vsub.f32 0.0, %v1342_v31 }
0x1af8   :  { %v1344_v43 = vmul.f32 1.442695, %v1343_v19 }
0x1afa   :  { %2505 = vpow2.f32 %v1344_v43 }
0x1afc   :  { %v2504_v32 = vpop.eup %2503 }
0x1afd   :  { %1365 = vrot.lane.b32.xlu0 %v2504_v32, %s2604_s10 }
0x1b00   :  { %v2506_v20 = vpop.eup %2505 }
0x1b01   :  { %v1346_v13 = vadd.f32 1.0, %v2506_v20 }
0x1b03   :  { %2507 = vrcp.f32 %v1346_v13  ;;  %v1358_v36 = vand.u32 2147483648, %v1346_v13  ;;  %vm1352_vm10 = vweird.f32 %v1346_v13  ;;  %v1356_v34 = vand.u32 2147483647, %v1346_v13 }
0x1b05   :  { %v1359_v49 = vor.u32 1.1754944e-38, %v1358_v36  ;;  %vm1357_vm12 = vcmp.eq.f32.partialorder %v1356_v34, 8.507059e+37 }
0x1b09   :  { %v2508_v26 = vpop.eup %2507 }
0x1b0a   :  { %v1348_v33 = vmul.f32 %v2508_v26, %v1346_v13  ;;  %vm1353_vm9 = vweird.f32 %v2508_v26 }
0x1b0b   :  { %vm1354_vm11 = vmor %vm1352_vm10, %vm1353_vm9 }
0x1b0c   :  { %v1349_v46 = vsub.f32 1.0, %v1348_v33 }
0x1b0e   :  { %v1350_v3 = vmul.f32 %v2508_v26, %v1349_v46 }
0x1b10   :  { %v1351_v35 = vadd.f32 %v2508_v26, %v1350_v3 }
0x1b12   :  { %v1355_v38 = vsel %vm1354_vm11, %v2508_v26, %v1351_v35 }
0x1b13   :  { %v1360_v17 = vsel %vm1357_vm12, %v1359_v49, %v1355_v38 }
0x1b14   :  { %v1363_v23 = vmul.f32 %v1360_v17, %v1305_v41 }
0x1b6f   :  { %v1366_v37 = vpop.permute.xlu0 %1365 }
0x1b70   :  { %v1368_v29 = vmul.f32 %v1366_v37, %v1360_v17 }
0x1b72   :  { %1370 = vrot.lane.b32.xlu1 %v1368_v29, %s2605_s14 }
0x1be4   :  { %v1371_v39 = vpop.permute.xlu1 %1370 }
0x1be5   :  { %v1373_v22 = vadd.f32 %v1371_v39, %v1363_v23 }
0x1be7   :  { %2509 = vtanh.f32 %v1373_v22 }
0x1bed   :  { %v2510_v40 = vpop.eup %2509 }
0x1bee   :  { %1376 = vrot.lane.b32.xlu2 %v2510_v40, %s2604_s10  ;;  %v1545_v40 = vperm.slane %v2890_v24, 5 }
0x1c48   :  { %v1377_v44 = vpop.permute.xlu2 %1376 }
0x1c49   :  { %v3106_v45 = vmul.f32 %v1377_v44, %v1360_v17 }
0x1c4b   :  { %1385 = vrot.lane.b32.xlu0 %v3106_v45, %s2605_s14 }
0x1cbd   :  { %v1386_v47 = vpop.permute.xlu0 %1385 }
0x1cbe   :  { %2350 = vmatmul.msk.f32.vlgmr.msra.gmra.mxu1 %vm317_vm8, %v1386_v47 }
0x1d3b   :  { %v1406_v50 = vpop.f32.mrf.mxu1 }
0x1d3c   :  { %v1410_v51 = vadd.f32 %v1409_v48, %v1406_v50 }
0x1d3e   :  { %2511 = vtanh.f32 %v1410_v51  ;;  %v1411_v54 = vsub.f32 0.0, %v1410_v51 }
0x1d40   :  { %v1412_v55 = vmul.f32 1.442695, %v1411_v54 }
0x1d42   :  { %2513 = vpow2.f32 %v1412_v55 }
0x1d44   :  { %v2512_v53 = vpop.eup %2511 }
0x1d45   :  { %1433 = vrot.lane.b32.xlu1 %v2512_v53, %s2604_s10 }
0x1d48   :  { %v2514_v28 = vpop.eup %2513 }
0x1d49   :  { %v1414_v56 = vadd.f32 1.0, %v2514_v28 }
0x1d4b   :  { %2515 = vrcp.f32 %v1414_v56  ;;  %v1426_v62 = vand.u32 2147483648, %v1414_v56  ;;  %vm1420_vm14 = vweird.f32 %v1414_v56  ;;  %v1424_v63 = vand.u32 2147483647, %v1414_v56 }
0x1d4d   :  { %v1427_v1 = vor.u32 1.1754944e-38, %v1426_v62  ;;  %vm1425_vm0 = vcmp.eq.f32.partialorder %v1424_v63, 8.507059e+37 }
0x1d51   :  { %v2516_v57 = vpop.eup %2515 }
0x1d52   :  { %v1416_v58 = vmul.f32 %v2516_v57, %v1414_v56  ;;  %vm1421_vm13 = vweird.f32 %v2516_v57 }
0x1d53   :  { %vm1422_vm15 = vmor %vm1420_vm14, %vm1421_vm13 }
0x1d54   :  { %v1417_v59 = vsub.f32 1.0, %v1416_v58 }
0x1d56   :  { %v1418_v60 = vmul.f32 %v2516_v57, %v1417_v59 }
0x1d58   :  { %v1419_v61 = vadd.f32 %v2516_v57, %v1418_v60 }
0x1d5a   :  { %v1423_v0 = vsel %vm1422_vm15, %v2516_v57, %v1419_v61 }
0x1d5b   :  { %v1428_v4 = vsel %vm1425_vm0, %v1427_v1, %v1423_v0 }
0x1d5c   :  { %v1431_v25 = vmul.f32 %v1428_v4, %v1373_v22 }
0x1db7   :  { %v1434_v2 = vpop.permute.xlu1 %1433 }
0x1db8   :  { %v1436_v6 = vmul.f32 %v1434_v2, %v1428_v4 }
0x1dba   :  { %1438 = vrot.lane.b32.xlu2 %v1436_v6, %s2605_s14 }
0x1e14   :  { %v1439_v7 = vpop.permute.xlu2 %1438 }
0x1e15   :  { %v1441_v41 = vadd.f32 %v1439_v7, %v1431_v25 }
0x1e17   :  { %2517 = vtanh.f32 %v1441_v41 }
0x1e1d   :  { %v2518_v42 = vpop.eup %2517 }
0x1e1e   :  { %1444 = vrot.lane.b32.xlu0 %v2518_v42, %s2604_s10 }
0x1e90   :  { %v1445_v10 = vpop.permute.xlu0 %1444 }
0x1e91   :  { %v3115_v52 = vmul.f32 %v1445_v10, %v1428_v4  ;;  %v1613_v10 = vperm.slane %v2890_v24, 4 }
0x1e93   :  { %1453 = vrot.lane.b32.xlu1 %v3115_v52, %s2605_s14 }
0x1f05   :  { %v1454_v21 = vpop.permute.xlu1 %1453 }
0x1f06   :  { %2351 = vmatmul.msk.f32.vlgmr.msra.gmra.mxu3 %vm317_vm8, %v1454_v21 }
0x1f89   :  { %v1474_v9 = vpop.f32.mrf.mxu3 }
0x1f8a   :  { %v1478_v14 = vadd.f32 %v1477_v8, %v1474_v9 }
0x1f8c   :  { %2519 = vtanh.f32 %v1478_v14  ;;  %v1479_v27 = vsub.f32 0.0, %v1478_v14 }
0x1f8e   :  { %v1480_v30 = vmul.f32 1.442695, %v1479_v27 }
0x1f90   :  { %2521 = vpow2.f32 %v1480_v30 }
0x1f92   :  { %v2520_v18 = vpop.eup %2519 }
0x1f93   :  { %1501 = vrot.lane.b32.xlu2 %v2520_v18, %s2604_s10 }
0x1f96   :  { %v2522_v31 = vpop.eup %2521 }
0x1f97   :  { %v1482_v32 = vadd.f32 1.0, %v2522_v31 }
0x1f99   :  { %2523 = vrcp.f32 %v1482_v32  ;;  %v1494_v33 = vand.u32 2147483648, %v1482_v32  ;;  %vm1488_vm3 = vweird.f32 %v1482_v32  ;;  %v1492_v46 = vand.u32 2147483647, %v1482_v32 }
0x1f9b   :  { %v1495_v35 = vor.u32 1.1754944e-38, %v1494_v33  ;;  %vm1493_vm5 = vcmp.eq.f32.partialorder %v1492_v46, 8.507059e+37 }
0x1f9f   :  { %v2524_v19 = vpop.eup %2523 }
0x1fa0   :  { %v1484_v43 = vmul.f32 %v2524_v19, %v1482_v32  ;;  %vm1489_vm2 = vweird.f32 %v2524_v19 }
0x1fa1   :  { %vm1490_vm4 = vmor %vm1488_vm3, %vm1489_vm2 }
0x1fa2   :  { %v1485_v20 = vsub.f32 1.0, %v1484_v43 }
0x1fa4   :  { %v1486_v13 = vmul.f32 %v2524_v19, %v1485_v20 }
0x1fa6   :  { %v1487_v26 = vadd.f32 %v2524_v19, %v1486_v13 }
0x1fa8   :  { %v1491_v3 = vsel %vm1490_vm4, %v2524_v19, %v1487_v26 }
0x1fa9   :  { %v1496_v34 = vsel %vm1493_vm5, %v1495_v35, %v1491_v3 }
0x1faa   :  { %v1499_v49 = vmul.f32 %v1496_v34, %v1441_v41 }
0x1fed   :  { %v1502_v36 = vpop.permute.xlu2 %1501 }
0x1fee   :  { %v1504_v38 = vmul.f32 %v1502_v36, %v1496_v34 }
0x1ff0   :  { %1506 = vrot.lane.b32.xlu0 %v1504_v38, %s2605_s14 }
0x2062   :  { %v1507_v37 = vpop.permute.xlu0 %1506 }
0x2063   :  { %v1509_v17 = vadd.f32 %v1507_v37, %v1499_v49 }
0x2065   :  { %2525 = vtanh.f32 %v1509_v17 }
0x206b   :  { %v2526_v29 = vpop.eup %2525 }
0x206c   :  { %1512 = vrot.lane.b32.xlu1 %v2526_v29, %s2604_s10 }
0x20de   :  { %v1513_v23 = vpop.permute.xlu1 %1512 }
0x20df   :  { %v3124_v39 = vmul.f32 %v1513_v23, %v1496_v34 }
0x20e1   :  { %1521 = vrot.lane.b32.xlu2 %v3124_v39, %s2605_s14 }
0x213b   :  { %v1522_v22 = vpop.permute.xlu2 %1521 }
0x213c   :  { %2352 = vmatmul.msk.f32.vlgmr.msrb.gmra.mxu0 %vm317_vm8, %v1522_v22  ;;  %v1681_v22 = vperm.slane %v2890_v24, 3 }
0x21b9   :  { %v1542_v44 = vpop.f32.mrf.mxu0 }
0x21ba   :  { %v1546_v47 = vadd.f32 %v1545_v40, %v1542_v44 }
0x21bc   :  { %2527 = vtanh.f32 %v1546_v47  ;;  %v1547_v50 = vsub.f32 0.0, %v1546_v47 }
0x21be   :  { %v1548_v51 = vmul.f32 1.442695, %v1547_v50 }
0x21c0   :  { %2529 = vpow2.f32 %v1548_v51 }
0x21c2   :  { %v2528_v48 = vpop.eup %2527 }
0x21c3   :  { %1569 = vrot.lane.b32.xlu0 %v2528_v48, %s2604_s10 }
0x21c6   :  { %v2530_v53 = vpop.eup %2529 }
0x21c7   :  { %v1550_v54 = vadd.f32 1.0, %v2530_v53 }
0x21c9   :  { %2531 = vrcp.f32 %v1550_v54  ;;  %v1562_v59 = vand.u32 2147483648, %v1550_v54  ;;  %vm1556_vm9 = vweird.f32 %v1550_v54  ;;  %v1560_v60 = vand.u32 2147483647, %v1550_v54 }
0x21cb   :  { %v1563_v62 = vor.u32 1.1754944e-38, %v1562_v59  ;;  %vm1561_vm11 = vcmp.eq.f32.partialorder %v1560_v60, 8.507059e+37 }
0x21cf   :  { %v2532_v55 = vpop.eup %2531 }
0x21d0   :  { %v1552_v28 = vmul.f32 %v2532_v55, %v1550_v54  ;;  %vm1557_vm6 = vweird.f32 %v2532_v55 }
0x21d1   :  { %vm1558_vm10 = vmor %vm1556_vm9, %vm1557_vm6 }
0x21d2   :  { %v1553_v56 = vsub.f32 1.0, %v1552_v28 }
0x21d4   :  { %v1554_v57 = vmul.f32 %v2532_v55, %v1553_v56 }
0x21d6   :  { %v1555_v58 = vadd.f32 %v2532_v55, %v1554_v57 }
0x21d8   :  { %v1559_v61 = vsel %vm1558_vm10, %v2532_v55, %v1555_v58 }
0x21d9   :  { %v1564_v0 = vsel %vm1561_vm11, %v1563_v62, %v1559_v61 }
0x21da   :  { %v1567_v2 = vmul.f32 %v1564_v0, %v1509_v17 }
0x2235   :  { %v1570_v63 = vpop.permute.xlu0 %1569 }
0x2236   :  { %v1572_v1 = vmul.f32 %v1570_v63, %v1564_v0 }
0x2238   :  { %1574 = vrot.lane.b32.xlu1 %v1572_v1, %s2605_s14 }
0x22aa   :  { %v1575_v4 = vpop.permute.xlu1 %1574 }
0x22ab   :  { %v1577_v6 = vadd.f32 %v1575_v4, %v1567_v2 }
0x22ad   :  { %2533 = vtanh.f32 %v1577_v6 }
0x22b3   :  { %v2534_v25 = vpop.eup %2533 }
0x22b4   :  { %1580 = vrot.lane.b32.xlu2 %v2534_v25, %s2604_s10 }
0x230e   :  { %v1581_v7 = vpop.permute.xlu2 %1580 }
0x230f   :  { %v3133_v41 = vmul.f32 %v1581_v7, %v1564_v0 }
0x2311   :  { %1589 = vrot.lane.b32.xlu0 %v3133_v41, %s2605_s14 }
0x2383   :  { %v1590_v42 = vpop.permute.xlu0 %1589 }
0x2384   :  { %2353 = vmatmul.msk.f32.vlgmr.msra.gmra.mxu2 %vm317_vm8, %v1590_v42 }
0x2407   :  { %v1610_v21 = vpop.f32.mrf.mxu2 }
0x2408   :  { %v1614_v8 = vadd.f32 %v1613_v10, %v1610_v21  ;;  %v1749_v10 = vperm.slane %v2890_v24, 2 }
0x240a   :  { %2535 = vtanh.f32 %v1614_v8  ;;  %v1615_v14 = vsub.f32 0.0, %v1614_v8 }
0x240c   :  { %v1616_v18 = vmul.f32 1.442695, %v1615_v14 }
0x240e   :  { %2537 = vpow2.f32 %v1616_v18 }
0x2410   :  { %v2536_v9 = vpop.eup %2535 }
0x2411   :  { %1637 = vrot.lane.b32.xlu1 %v2536_v9, %s2604_s10 }
0x2414   :  { %v2538_v27 = vpop.eup %2537 }
0x2415   :  { %v1618_v30 = vadd.f32 1.0, %v2538_v27 }
0x2417   :  { %2539 = vrcp.f32 %v1618_v30  ;;  %v1630_v13 = vand.u32 2147483648, %v1618_v30  ;;  %vm1624_vm13 = vweird.f32 %v1618_v30  ;;  %v1628_v26 = vand.u32 2147483647, %v1618_v30 }
0x2419   :  { %v1631_v46 = vor.u32 1.1754944e-38, %v1630_v13  ;;  %vm1629_vm15 = vcmp.eq.f32.partialorder %v1628_v26, 8.507059e+37 }
0x241d   :  { %v2540_v31 = vpop.eup %2539 }
0x241e   :  { %v1620_v32 = vmul.f32 %v2540_v31, %v1618_v30  ;;  %vm1625_vm12 = vweird.f32 %v2540_v31 }
0x241f   :  { %vm1626_vm14 = vmor %vm1624_vm13, %vm1625_vm12 }
0x2420   :  { %v1621_v19 = vsub.f32 1.0, %v1620_v32 }
0x2422   :  { %v1622_v43 = vmul.f32 %v2540_v31, %v1621_v19 }
0x2424   :  { %v1623_v20 = vadd.f32 %v2540_v31, %v1622_v43 }
0x2426   :  { %v1627_v33 = vsel %vm1626_vm14, %v2540_v31, %v1623_v20 }
0x2427   :  { %v1632_v35 = vsel %vm1629_vm15, %v1631_v46, %v1627_v33 }
0x2428   :  { %v1635_v34 = vmul.f32 %v1632_v35, %v1577_v6 }
0x2483   :  { %v1638_v3 = vpop.permute.xlu1 %1637 }
0x2484   :  { %v1640_v36 = vmul.f32 %v1638_v3, %v1632_v35 }
0x2486   :  { %1642 = vrot.lane.b32.xlu2 %v1640_v36, %s2605_s14 }
0x24e0   :  { %v1643_v38 = vpop.permute.xlu2 %1642 }
0x24e1   :  { %v1645_v49 = vadd.f32 %v1643_v38, %v1635_v34 }
0x24e3   :  { %2541 = vtanh.f32 %v1645_v49 }
0x24e9   :  { %v2542_v37 = vpop.eup %2541 }
0x24ea   :  { %1648 = vrot.lane.b32.xlu0 %v2542_v37, %s2604_s10 }
0x255c   :  { %v1649_v17 = vpop.permute.xlu0 %1648 }
0x255d   :  { %v3142_v29 = vmul.f32 %v1649_v17, %v1632_v35 }
0x255f   :  { %1657 = vrot.lane.b32.xlu1 %v3142_v29, %s2605_s14 }
0x25d1   :  { %v1658_v23 = vpop.permute.xlu1 %1657 }
0x25d2   :  { %2354 = vmatmul.msk.f32.vlgmr.msrb.gmra.mxu1 %vm317_vm8, %v1658_v23 }
0x264f   :  { %v1678_v40 = vpop.f32.mrf.mxu1 }
0x2650   :  { %v1682_v44 = vadd.f32 %v1681_v22, %v1678_v40  ;;  %v1817_v40 = vperm.slane %v2890_v24, 1 }
0x2652   :  { %2543 = vtanh.f32 %v1682_v44  ;;  %v1683_v48 = vsub.f32 0.0, %v1682_v44 }
0x2654   :  { %v1684_v50 = vmul.f32 1.442695, %v1683_v48 }
0x2656   :  { %2545 = vpow2.f32 %v1684_v50 }
0x2658   :  { %v2544_v47 = vpop.eup %2543 }
0x2659   :  { %1705 = vrot.lane.b32.xlu2 %v2544_v47, %s2604_s10 }
0x265c   :  { %v2546_v51 = vpop.eup %2545 }
0x265d   :  { %v1686_v53 = vadd.f32 1.0, %v2546_v51 }
0x265f   :  { %2547 = vrcp.f32 %v1686_v53  ;;  %v1698_v58 = vand.u32 2147483648, %v1686_v53  ;;  %vm1692_vm2 = vweird.f32 %v1686_v53  ;;  %v1696_v59 = vand.u32 2147483647, %v1686_v53 }
0x2661   :  { %v1699_v61 = vor.u32 1.1754944e-38, %v1698_v58  ;;  %vm1697_vm4 = vcmp.eq.f32.partialorder %v1696_v59, 8.507059e+37 }
0x2665   :  { %v2548_v54 = vpop.eup %2547 }
0x2666   :  { %v1688_v55 = vmul.f32 %v2548_v54, %v1686_v53  ;;  %vm1693_vm0 = vweird.f32 %v2548_v54 }
0x2667   :  { %vm1694_vm3 = vmor %vm1692_vm2, %vm1693_vm0 }
0x2668   :  { %v1689_v28 = vsub.f32 1.0, %v1688_v55 }
0x266a   :  { %v1690_v56 = vmul.f32 %v2548_v54, %v1689_v28 }
0x266c   :  { %v1691_v57 = vadd.f32 %v2548_v54, %v1690_v56 }
0x266e   :  { %v1695_v60 = vsel %vm1694_vm3, %v2548_v54, %v1691_v57 }
0x266f   :  { %v1700_v63 = vsel %vm1697_vm4, %v1699_v61, %v1695_v60 }
0x2670   :  { %v1703_v1 = vmul.f32 %v1700_v63, %v1645_v49 }
0x26b3   :  { %v1706_v62 = vpop.permute.xlu2 %1705 }
0x26b4   :  { %v1708_v0 = vmul.f32 %v1706_v62, %v1700_v63 }
0x26b6   :  { %1710 = vrot.lane.b32.xlu0 %v1708_v0, %s2605_s14 }
0x2728   :  { %v1711_v2 = vpop.permute.xlu0 %1710 }
0x2729   :  { %v1713_v4 = vadd.f32 %v1711_v2, %v1703_v1 }
0x272b   :  { %2549 = vtanh.f32 %v1713_v4 }
0x2731   :  { %v2550_v6 = vpop.eup %2549 }
0x2732   :  { %1716 = vrot.lane.b32.xlu1 %v2550_v6, %s2604_s10 }
0x27a4   :  { %v1717_v25 = vpop.permute.xlu1 %1716 }
0x27a5   :  { %v3151_v7 = vmul.f32 %v1717_v25, %v1700_v63 }
0x27a7   :  { %1725 = vrot.lane.b32.xlu2 %v3151_v7, %s2605_s14 }
0x2801   :  { %v1726_v42 = vpop.permute.xlu2 %1725 }
0x2802   :  { %2355 = vmatmul.msk.f32.vlgmr.msrb.gmra.mxu3 %vm317_vm8, %v1726_v42 }
0x2885   :  { %v1746_v21 = vpop.f32.mrf.mxu3 }
0x2886   :  { %v1750_v8 = vadd.f32 %v1749_v10, %v1746_v21 }
0x2888   :  { %2551 = vtanh.f32 %v1750_v8  ;;  %v1751_v14 = vsub.f32 0.0, %v1750_v8 }
0x288a   :  { %v1752_v18 = vmul.f32 1.442695, %v1751_v14 }
0x288c   :  { %2553 = vpow2.f32 %v1752_v18 }
0x288e   :  { %v2552_v9 = vpop.eup %2551 }
0x288f   :  { %1773 = vrot.lane.b32.xlu0 %v2552_v9, %s2604_s10  ;;  %v1070_v9 = vsub.f32 0.0, %v3100_v16 }
0x2891   :  { %v1071_v14 = vmul.f32 1.442695, %v1070_v9 }
0x2892   :  { %v2554_v27 = vpop.eup %2553 }
0x2893   :  { %v1754_v30 = vadd.f32 1.0, %v2554_v27 }
0x2895   :  { %2555 = vrcp.f32 %v1754_v30  ;;  %v1766_v13 = vand.u32 2147483648, %v1754_v30  ;;  %vm1760_vm6 = vweird.f32 %v1754_v30  ;;  %v1764_v26 = vand.u32 2147483647, %v1754_v30 }
0x2897   :  { %v1767_v46 = vor.u32 1.1754944e-38, %v1766_v13  ;;  %vm1765_vm10 = vcmp.eq.f32.partialorder %v1764_v26, 8.507059e+37 }
0x289b   :  { %v2556_v31 = vpop.eup %2555 }
0x289c   :  { %v1756_v32 = vmul.f32 %v2556_v31, %v1754_v30  ;;  %vm1761_vm5 = vweird.f32 %v2556_v31 }
0x289d   :  { %vm1762_vm9 = vmor %vm1760_vm6, %vm1761_vm5 }
0x289e   :  { %v1757_v19 = vsub.f32 1.0, %v1756_v32  ;;  %v1885_v32 = vperm.slane %v2890_v24, 0 }
0x28a0   :  { %v1758_v43 = vmul.f32 %v2556_v31, %v1757_v19 }
0x28a2   :  { %v1759_v20 = vadd.f32 %v2556_v31, %v1758_v43 }
0x28a4   :  { %v1763_v33 = vsel %vm1762_vm9, %v2556_v31, %v1759_v20 }
0x28a5   :  { %v1768_v35 = vsel %vm1765_vm10, %v1767_v46, %v1763_v33  ;;  %vm1179_vm10 = vcmask 516352  }
0x28a6   :  { %v1771_v34 = vmul.f32 %v1768_v35, %v1713_v4 }
0x2901   :  { %v1774_v3 = vpop.permute.xlu0 %1773 }
0x2902   :  { %v1776_v36 = vmul.f32 %v1774_v3, %v1768_v35 }
0x2904   :  { %1778 = vrot.lane.b32.xlu1 %v1776_v36, %s2605_s14 }
0x2976   :  { %v1779_v38 = vpop.permute.xlu1 %1778 }
0x2977   :  { %v1781_v49 = vadd.f32 %v1779_v38, %v1771_v34 }
0x2979   :  { %2557 = vtanh.f32 %v1781_v49 }
0x297f   :  { %v2558_v37 = vpop.eup %2557 }
0x2980   :  { %1784 = vrot.lane.b32.xlu2 %v2558_v37, %s2604_s10 }
0x29da   :  { %v1785_v17 = vpop.permute.xlu2 %1784 }
0x29db   :  { %v3160_v23 = vmul.f32 %v1785_v17, %v1768_v35 }
0x29dd   :  { %1793 = vrot.lane.b32.xlu0 %v3160_v23, %s2605_s14 }
0x2a4f   :  { %v1794_v22 = vpop.permute.xlu0 %1793 }
0x2a50   :  { %2356 = vmatmul.msk.f32.vlgmr.msra.gmra.mxu0 %vm317_vm8, %v1794_v22 }
0x2acd   :  { %v1814_v44 = vpop.f32.mrf.mxu0 }
0x2ace   :  { %v1818_v47 = vadd.f32 %v1817_v40, %v1814_v44 }
0x2ad0   :  { %2559 = vtanh.f32 %v1818_v47  ;;  %v1819_v50 = vsub.f32 0.0, %v1818_v47 }
0x2ad2   :  { %v1820_v51 = vmul.f32 1.442695, %v1819_v50 }
0x2ad4   :  { %2561 = vpow2.f32 %v1820_v51 }
0x2ad6   :  { %v2560_v48 = vpop.eup %2559 }
0x2ad7   :  { %1841 = vrot.lane.b32.xlu1 %v2560_v48, %s2604_s10 }
0x2ada   :  { %v2562_v53 = vpop.eup %2561 }
0x2adb   :  { %v1822_v54 = vadd.f32 1.0, %v2562_v53 }
0x2add   :  { %2563 = vrcp.f32 %v1822_v54  ;;  %v1834_v59 = vand.u32 2147483648, %v1822_v54  ;;  %vm1828_vm12 = vweird.f32 %v1822_v54  ;;  %v1832_v60 = vand.u32 2147483647, %v1822_v54 }
0x2adf   :  { %v1835_v62 = vor.u32 1.1754944e-38, %v1834_v59  ;;  %vm1833_vm14 = vcmp.eq.f32.partialorder %v1832_v60, 8.507059e+37 }
0x2ae3   :  { %v2564_v55 = vpop.eup %2563 }
0x2ae4   :  { %v1824_v28 = vmul.f32 %v2564_v55, %v1822_v54  ;;  %vm1829_vm11 = vweird.f32 %v2564_v55 }
0x2ae5   :  { %vm1830_vm13 = vmor %vm1828_vm12, %vm1829_vm11  ;;  %vm2016_vm11 = vcmask 7168   ;;  %vm2045_vm12 = vcmask 130048  }
0x2ae6   :  { %v1825_v56 = vsub.f32 1.0, %v1824_v28 }
0x2ae8   :  { %v1826_v57 = vmul.f32 %v2564_v55, %v1825_v56 }
0x2aea   :  { %v1827_v58 = vadd.f32 %v2564_v55, %v1826_v57 }
0x2aec   :  { %v1831_v61 = vsel %vm1830_vm13, %v2564_v55, %v1827_v58 }
0x2aed   :  { %v1836_v0 = vsel %vm1833_vm14, %v1835_v62, %v1831_v61 }
0x2aee   :  { %v1839_v2 = vmul.f32 %v1836_v0, %v1781_v49 }
0x2b49   :  { %v1842_v63 = vpop.permute.xlu1 %1841 }
0x2b4a   :  { %v1844_v1 = vmul.f32 %v1842_v63, %v1836_v0 }
0x2b4c   :  { %1846 = vrot.lane.b32.xlu2 %v1844_v1, %s2605_s14 }
0x2ba6   :  { %v1847_v4 = vpop.permute.xlu2 %1846 }
0x2ba7   :  { %v3168_v6 = vadd.f32 %v1847_v4, %v1839_v2  ;;  %v2593_v4 = vld [vmem:[%s3404_s4 + $0x128] ss:$0 sm:$0xff] }
0x2ba9   :  { %2565 = vtanh.f32 %v3168_v6 }
0x2baa   :  { %2567 = vtanh.f32 %v3100_v16 }
0x2bab   :  { %2569 = vpow2.f32 %v1071_v14  ;;  %v1934_v14 = vld [vmem:[%s3404_s4 + $0x150] sm:$0xff] }
0x2baf   :  { %v2566_v25 = vpop.eup %2565 }
0x2bb0   :  { %1852 = vrot.lane.b32.xlu0 %v2566_v25, %s2604_s10  ;;  %v2568_v42 = vpop.eup %2567 }
0x2bb1   :  { %v2570_v18 = vpop.eup %2569 }
0x2bb2   :  { %v1073_v27 = vadd.f32 1.0, %v2570_v18  ;;  %v1933_v18 = vld [vmem:[%s3404_s4 + $0x148] sm:$0xff] }
0x2bb4   :  { %2571 = vrcp.f32 %v1073_v27  ;;  %v1085_v46 = vand.u32 2147483648, %v1073_v27  ;;  %vm1079_vm0 = vweird.f32 %v1073_v27  ;;  %v1083_v16 = vand.u32 2147483647, %v1073_v27 }
0x2bb6   :  { %v1086_v36 = vor.u32 1.1754944e-38, %v1085_v46  ;;  %vm1084_vm3 = vcmp.eq.f32.partialorder %v1083_v16, 8.507059e+37 }
0x2bb8   :  { %1092 = vrot.lane.b32.xlu0 %v2568_v42, %s2604_s10 }
0x2bba   :  { %v2572_v30 = vpop.eup %2571 }
0x2bbb   :  { %v1075_v31 = vmul.f32 %v2572_v30, %v1073_v27  ;;  %vm1080_vm15 = vweird.f32 %v2572_v30  ;;  %v1931_v27 = vld [vmem:[%s3404_s4 + $0x138] sm:$0xff] }
0x2bbc   :  { %vm1081_vm2 = vmor %vm1079_vm0, %vm1080_vm15 }
0x2bbd   :  { %v1076_v19 = vsub.f32 1.0, %v1075_v31  ;;  %v1941_v31 = vld [vmem:[%s3404_s4 + $0x188] sm:$0xff] }
0x2bbf   :  { %v1077_v13 = vmul.f32 %v2572_v30, %v1076_v19 }
0x2bc1   :  { %v1078_v26 = vadd.f32 %v2572_v30, %v1077_v13  ;;  %v1940_v13 = vld [vmem:[%s3404_s4 + $0x180] sm:$0xff] }
0x2bc3   :  { %v1082_v3 = vsel %vm1081_vm2, %v2572_v30, %v1078_v26  ;;  %v1942_v30 = vld [vmem:[%s3404_s4 + $0x190] sm:$0xff]  ;;  %v1939_v26 = vld [vmem:[%s3404_s4 + $0x178] sm:$0xff] }
0x2bc4   :  { %v1087_v34 = vsel %vm1084_vm3, %v1086_v36, %v1082_v3  ;;  %1998 = vmatpush.msra.mxu3 %v1942_v30  ;;  %v2149_v30 = vld [vmem:[%s3404_s4 + $0x1b8] sm:$0xff] }
0x2bc5   :  { %v1090_v54 = vmul.f32 %v1087_v34, %v3077_v5 }
0x2bc6   :  { %1999 = vmatpush.msra.mxu3 %v1941_v31  ;;  %v2212_v31 = vld [vmem:[%s3404_s4 + $0x240] sm:$0xff] }
0x2bc8   :  { %2000 = vmatpush.msra.mxu3 %v1940_v13  ;;  %v2242_v13 = vld [vmem:[%s3404_s4 + $0x268] sm:$0xff] }
0x2bca   :  { %2001 = vmatpush.msra.mxu3 %v1939_v26  ;;  %v2147_v26 = vld [vmem:[%s3404_s4 + $0x1a8] sm:$0xff] }
0x2c22   :  { %v1853_v10 = vpop.permute.xlu0 %1852 }
0x2c23   :  { %v1855_v21 = vmul.f32 %v1853_v10, %v1836_v0 }
0x2c25   :  { %1861 = vrot.lane.b32.xlu1 %v1855_v21, %s2605_s14 }
0x2c2a   :  { %v1093_v35 = vpop.permute.xlu0 %1092 }
0x2c2b   :  { %v1095_v24 = vmul.f32 %v1093_v35, %v1087_v34 }
0x2c97   :  { %v1862_v8 = vpop.permute.xlu1 %1861 }
0x2c98   :  { %2357 = vmatmul.msk.f32.vlgmr.msrb.gmra.mxu2 %vm317_vm8, %v1862_v8 }
0x2d1b   :  { %v1882_v43 = vpop.f32.mrf.mxu2 }
0x2d1c   :  { %v1886_v20 = vadd.f32 %v1885_v32, %v1882_v43 }
0x2d1e   :  { %2573 = vtanh.f32 %v1886_v20  ;;  %v1887_v38 = vsub.f32 0.0, %v1886_v20 }
0x2d20   :  { %v1888_v49 = vmul.f32 1.442695, %v1887_v38 }
0x2d22   :  { %2575 = vpow2.f32 %v1888_v49 }
0x2d24   :  { %v2574_v33 = vpop.eup %2573 }
0x2d25   :  { %1909 = vrot.lane.b32.xlu2 %v2574_v33, %s2604_s10 }
0x2d28   :  { %v2576_v37 = vpop.eup %2575 }
0x2d29   :  { %v1890_v17 = vadd.f32 1.0, %v2576_v37  ;;  %v2606_v37 = vmov 0  }
0x2d2a   :  { %2385 = vset.pattern.permute.xlu0 %v2606_v37  ;;  %2384 = vset.pattern.permute.xlu2 %v2606_v37 }
0x2d2b   :  { %2577 = vrcp.f32 %v1890_v17  ;;  %vm1896_vm5 = vweird.f32 %v1890_v17  ;;  %v1900_v48 = vand.u32 2147483647, %v1890_v17  ;;  %2386 = vset.pattern.permute.xlu1 %v2606_v37 }
0x2d2d   :  { %1097 = vrot.lane.b32.xlu2 %v1095_v24, %s2605_s14  ;;  %vm1901_vm9 = vcmp.eq.f32.partialorder %v1900_v48, 8.507059e+37  ;;  %v2009_v24 = vlaneseq }
0x2d2f   :  { %v2010_v49 = vshrl.u32 %v2009_v24, 7  ;;  %v2145_v24 = vld [vmem:[%s3404_s4 + $0x198] sm:$0xff] }
0x2d31   :  { %v2578_v22 = vpop.eup %2577 }
0x2d32   :  { %v1892_v40 = vmul.f32 %v2578_v22, %v1890_v17  ;;  %vm1897_vm4 = vweird.f32 %v2578_v22 }
0x2d33   :  { %vm1898_vm6 = vmor %vm1896_vm5, %vm1897_vm4 }
0x2d35   :  { %1449 = vrot.lane.b32.xlu2 %v3115_v52, %s2604_s10  ;;  %v1893_v52 = vsub.f32 1.0, %v1892_v40 }
0x2d37   :  { %v1894_v44 = vmul.f32 %v2578_v22, %v1893_v52 }
0x2d39   :  { %v1895_v47 = vadd.f32 %v2578_v22, %v1894_v44 }
0x2d3d   :  { %1653 = vrot.lane.b32.xlu2 %v3142_v29, %s2604_s10  ;;  %v1902_v29 = vand.u32 2147483648, %v1890_v17  ;;  %v2011_v17 = vadd.s32 8, %v2010_v49  ;;  %v2207_v49 = vld [vmem:[%s3404_s4 + $0x218] sm:$0xff] }
0x2d3f   :  { %v1903_v50 = vor.u32 1.1754944e-38, %v1902_v29 }
0x2d45   :  { %1857 = vrot.lane.b32.xlu2 %v1855_v21, %s2604_s10 }
0x2d4d   :  { %1176 = vrot.lane.b32.xlu2 %v3023_v15, %s2604_s10  ;;  %v1899_v15 = vsel %vm1898_vm6, %v2578_v22, %v1895_v47 }
0x2d4e   :  { %v1904_v53 = vsel %vm1901_vm9, %v1903_v50, %v1899_v15 }
0x2d4f   :  { %v1907_v61 = vmul.f32 %v1904_v53, %v3168_v6  ;;  %v1935_v6 = vld [vmem:[%s3404_s4 + $0x158] sm:$0xff] }
0x2d55   :  { %1381 = vrot.lane.b32.xlu2 %v3106_v45, %s2604_s10 }
0x2d7f   :  { %v1910_v51 = vpop.permute.xlu2 %1909 }
0x2d80   :  { %v1912_v45 = vmul.f32 %v1910_v51, %v1904_v53 }
0x2d82   :  { %1914 = vrot.lane.b32.xlu1 %v1912_v45, %s2605_s14 }
0x2d87   :  { %v1098_v55 = vpop.permute.xlu2 %1097 }
0x2d88   :  { %v1100_v28 = vadd.f32 %v1098_v55, %v1090_v54 }
0x2d8a   :  { %2579 = vtanh.f32 %v1100_v28 }
0x2d8f   :  { %v1450_v56 = vpop.permute.xlu2 %1449 }
0x2d90   :  { %v2580_v57 = vpop.eup %2579  ;;  %1452 = vst.msk [vmem:[#allocation2 + $0x7] sm:$0x1] %vm1179_vm10, %v1450_v56 }
0x2d91   :  { %1103 = vrot.lane.b32.xlu1 %v2580_v57, %s2604_s10 }
0x2d97   :  { %v1654_v58 = vpop.permute.xlu2 %1653 }
0x2d98   :  { %1656 = vst.msk [vmem:[#allocation2 + $0x4] sm:$0x1] %vm1179_vm10, %v1654_v58 }
0x2d99   :  { %1585 = vrot.lane.b32.xlu1 %v3133_v41, %s2604_s10 }
0x2d9f   :  { %v1858_v59 = vpop.permute.xlu2 %1857 }
0x2da0   :  { %1860 = vst.msk [vmem:[#allocation2 + $0x1] sm:$0x1] %vm1179_vm10, %v1858_v59 }
0x2da1   :  { %1789 = vrot.lane.b32.xlu1 %v3160_v23, %s2604_s10 }
0x2da7   :  { %v1177_v5 = vpop.permute.xlu2 %1176 }
0x2daf   :  { %v1382_v60 = vpop.permute.xlu2 %1381 }
0x2db0   :  { %1384 = vst.msk [vmem:[#allocation2 + $0x8] sm:$0x1] %vm1179_vm10, %v1382_v60  ;;  %v2032_v60 = vld [vmem:[%s3407_s2 + $0x10] sm:$0xff] }
0x2df4   :  { %v1915_v62 = vpop.permute.xlu1 %1914 }
0x2df5   :  { %v1917_v63 = vadd.f32 %v1915_v62, %v1907_v61  ;;  %v2121_v61 = vld [vmem:[%s3407_s2 + $0x8] sm:$0xff] }
0x2df7   :  { %2581 = vtanh.f32 %v1917_v63  ;;  %v2594_v63 = vld [vmem:[%s3406_s0 + $0x8] sm:$0xff] }
0x2dfd   :  { %v2582_v0 = vpop.eup %2581 }
0x2dfe   :  { %1920 = vrot.lane.b32.xlu0 %v2582_v0, %s2604_s10 }
0x2e03   :  { %v1104_v1 = vpop.permute.xlu1 %1103 }
0x2e04   :  { %v1106_v41 = vmul.f32 %v1104_v1, %v1087_v34  ;;  %v2160_v1 = vld [vmem:[%s3404_s4 + $0x210] sm:$0xff] }
0x2e05   :  { %2172 = vmatpush.msrb.mxu3 %v2160_v1 }
0x2e06   :  { %1517 = vrot.lane.b32.xlu0 %v3124_v39, %s2604_s10  ;;  %1108 = vrot.lane.b32.xlu1 %v1106_v41, %s2605_s14  ;;  %v1938_v39 = vld [vmem:[%s3404_s4 + $0x170] sm:$0xff]  ;;  %v2159_v41 = vld [vmem:[%s3404_s4 + $0x208] sm:$0xff] }
0x2e07   :  { %1960 = vmatpush.msra.mxu1 %v1938_v39  ;;  %2173 = vmatpush.msrb.mxu3 %v2159_v41 }
0x2e0b   :  { %v1586_v23 = vpop.permute.xlu1 %1585 }
0x2e0c   :  { %1588 = vst.msk [vmem:[#allocation2 + $0x5] sm:$0x1] %vm1179_vm10, %v1586_v23 }
0x2e0e   :  { %1721 = vrot.lane.b32.xlu0 %v3151_v7, %s2604_s10  ;;  %1313 = vrot.lane.b32.xlu1 %v3084_v11, %s2604_s10  ;;  %v1937_v7 = vld [vmem:[%s3404_s4 + $0x168] sm:$0xff]  ;;  %v1936_v11 = vld [vmem:[%s3404_s4 + $0x160] sm:$0xff] }
0x2e0f   :  { %1961 = vmatpush.msra.mxu1 %v1937_v7  ;;  %v2158_v7 = vld [vmem:[%s3404_s4 + $0x200] sm:$0xff] }
0x2e10   :  { %2174 = vmatpush.msrb.mxu3 %v2158_v7 }
0x2e11   :  { %1962 = vmatpush.msra.mxu1 %v1936_v11  ;;  %v2151_v11 = vld [vmem:[%s3404_s4 + $0x1c8] sm:$0xff] }
0x2e13   :  { %v1790_v2 = vpop.permute.xlu1 %1789  ;;  %1963 = vmatpush.msra.mxu1 %v1935_v6  ;;  %v2150_v6 = vld [vmem:[%s3404_s4 + $0x1c0] sm:$0xff] }
0x2e14   :  { %1792 = vst.msk [vmem:[#allocation2 + $0x2] sm:$0x1] %vm1179_vm10, %v1790_v2  ;;  %v2152_v2 = vld [vmem:[%s3404_s4 + $0x1d0] sm:$0xff] }
0x2e15   :  { %1964 = vmatpush.msra.mxu1 %v1934_v14 }
0x2e16   :  { %1977 = vrot.lane.b32.xlu1 %v2593_v4, %s2602_s28 }
0x2e17   :  { %1965 = vmatpush.msra.mxu1 %v1933_v18 }
0x2e70   :  { %v1921_v25 = vpop.permute.xlu0 %1920 }
0x2e71   :  { %v1923_v42 = vmul.f32 %v1921_v25, %v1904_v53  ;;  %v2157_v25 = vld [vmem:[%s3404_s4 + $0x1f8] sm:$0xff] }
0x2e72   :  { %2175 = vmatpush.msrb.mxu3 %v2157_v25 }
0x2e73   :  { %1925 = vrot.lane.b32.xlu0 %v1923_v42, %s2604_s10  ;;  %v2214_v42 = vld [vmem:[%s3404_s4 + $0x250] sm:$0xff] }
0x2e78   :  { %v1518_v10 = vpop.permute.xlu0 %1517  ;;  %v1109_v21 = vpop.permute.xlu1 %1108 }
0x2e79   :  { %1520 = vst.msk [vmem:[#allocation2 + $0x6] sm:$0x1] %vm1179_vm10, %v1518_v10  ;;  %v2156_v10 = vld [vmem:[%s3404_s4 + $0x1f0] sm:$0xff] }
0x2e7a   :  { %1111 = vst.msk [vmem:[#allocation2 + $0xb] sm:$0x1] %vm384_vm7, %v1109_v21  ;;  %vm2013_vm7 = vcmp.lt.s32.totalorder %v2011_v17, 12  ;;  %v2213_v21 = vld [vmem:[%s3404_s4 + $0x248] sm:$0xff]  ;;  %2176 = vmatpush.msrb.mxu3 %v2156_v10 }
0x2e7b   :  { %1180 = vst.msk [vmem:[#allocation2 + $0xb] sm:$0x1] %vm1179_vm10, %v1177_v5  ;;  %1245 = vrot.lane.b32.xlu0 %v3055_v12, %s2604_s10  ;;  %v1932_v12 = vld [vmem:[%s3404_s4 + $0x140] sm:$0xff] }
0x2e7c   :  { %1966 = vmatpush.msra.mxu1 %v1932_v12 }
0x2e7e   :  { %1967 = vmatpush.msra.mxu1 %v1931_v27  ;;  %v2154_v27 = vld [vmem:[%s3404_s4 + $0x1e0] sm:$0xff] }
0x2e80   :  { %v1722_v8 = vpop.permute.xlu0 %1721  ;;  %v1314_v9 = vpop.permute.xlu1 %1313  ;;  %2195 = vmatpush.msrb.mxu1 %v2152_v2 }
0x2e81   :  { %1724 = vst.msk [vmem:[#allocation2 + $0x3] sm:$0x1] %vm1179_vm10, %v1722_v8  ;;  %v2155_v8 = vld [vmem:[%s3404_s4 + $0x1e8] sm:$0xff] }
0x2e82   :  { %1316 = vst.msk [vmem:[#allocation2 + $0x9] sm:$0x1] %vm1179_vm10, %v1314_v9  ;;  %2196 = vmatpush.msrb.mxu1 %v2151_v11  ;;  %v2097_v9 = vld [vmem:[%s3407_s2] sm:$0xff]  ;;  %2177 = vmatpush.msrb.mxu3 %v2155_v8 }
0x2e83   :  { %1943 = vrot.lane.b32.xlu0 %v2593_v4, %s2601_s16  ;;  %v2595_v4 = vld [vmem:[%s3406_s0] sm:$0xff] }
0x2e84   :  { %2197 = vmatpush.msrb.mxu1 %v2150_v6  ;;  %2178 = vmatpush.msrb.mxu3 %v2154_v27 }
0x2e86   :  { %2198 = vmatpush.msrb.mxu1 %v2149_v30 }
0x2e88   :  { %v1978_v22 = vpop.permute.xlu1 %1977 }
0x2ee5   :  { %v1926_v32 = vpop.permute.xlu0 %1925 }
0x2ee6   :  { %1928 = vst.msk [vmem:[#allocation2] sm:$0x1] %vm1179_vm10, %v1926_v32  ;;  %v2243_v32 = vld [vmem:[%s3404_s4 + $0x270] sm:$0xff] }
0x2eed   :  { %v1246_v19 = vpop.permute.xlu0 %1245  ;;  %v3255_v43 = vld [vmem:[#allocation2] sm:$0xff] }
0x2eee   :  { %1248 = vst.msk [vmem:[#allocation2 + $0xa] sm:$0x1] %vm1179_vm10, %v1246_v19  ;;  %2358 = vmatmul.msk.f32.vlgmr.msra.gmra.mxu1 %vm157_vm1, %v3255_v43  ;;  %v2153_v19 = vld [vmem:[%s3404_s4 + $0x1d8] sm:$0xff] }
0x2eef   :  { %2179 = vmatpush.msrb.mxu3 %v2153_v19 }
0x2ef5   :  { %v3260_v20 = vld [vmem:[#allocation2 + $0x8] sm:$0xff]  ;;  %v1944_v33 = vpop.permute.xlu0 %1943 }
0x2ef6   :  { %2359 = vmatmul.msk.f32.gmra.mxu1 %vm157_vm1, %v3260_v20 }
0x2f6b   :  { %v1969_v46 = vpop.f32.mrf.mxu1 }
0x2f6c   :  { %v1970_v16 = vadd.f32 %v1969_v46, %v1944_v33  ;;  %v2241_v46 = vld [vmem:[%s3404_s4 + $0x260] sm:$0xff] }
0x2f6e   :  { %v1975_v3 = vmax.f32 %v1970_v16, 0.0  ;;  %v2146_v16 = vld [vmem:[%s3404_s4 + $0x1a0] sm:$0xff] }
0x2f70   :  { %2360 = vmatmul.msk.f32.vlgmr.msra.gmra.mxu3 %vm317_vm8, %v1975_v3  ;;  %v2209_v3 = vld [vmem:[%s3404_s4 + $0x228] sm:$0xff] }
0x2f73   :  { %v1972_v35 = vpop.f32.mrf.mxu1 }
0x2f74   :  { %v1973_v36 = vadd.f32 %v1972_v35, %v1944_v33  ;;  %v2210_v33 = vld [vmem:[%s3404_s4 + $0x230] sm:$0xff]  ;;  %v2240_v35 = vld [vmem:[%s3404_s4 + $0x258] sm:$0xff] }
0x2f76   :  { %v1976_v34 = vmax.f32 %v1973_v36, 0.0  ;;  %v2239_v36 = vld [vmem:[%s3408_s3] sm:$0xff] }
0x2f78   :  { %2361 = vmatmul.msk.f32.gmra.mxu3 %vm317_vm8, %v1976_v34 }
0x2ff3   :  { %v2003_v38 = vpop.f32.mrf.mxu3 }
0x2ff4   :  { %v2004_v40 = vadd.f32 %v2003_v38, %v1978_v22  ;;  %v2208_v38 = vld [vmem:[%s3404_s4 + $0x220] sm:$0xff] }
0x2ff6   :  { %v2017_v29 = vsel %vm2016_vm11, %v2004_v40, -inf }
0x2ffb   :  { %v2006_v52 = vpop.f32.mrf.mxu3 }
0x2ffc   :  { %v2007_v44 = vadd.f32 %v2006_v52, %v1978_v22  ;;  %v2272_v52 = vld [vmem:[%s3404_s4 + $0x280] sm:$0xff] }
0x2ffd   :  { %2370 = vmatpush.xpose.msk.msra.mxu3 %vm157_vm1, %v2272_v52 }
0x2ffe   :  { %v2015_v47 = vsel %vm2013_vm7, %v2007_v44, -1e+30  ;;  %v2271_v44 = vld [vmem:[%s3404_s4 + $0x278] sm:$0xff] }
0x2fff   :  { %v2018_v48 = vsel %vm2016_vm11, %v2015_v47, -inf }
0x3000   :  { %v2019_v15 = vmax.f32 %v2017_v29, %v2018_v48 }
0x3001   :  { %2371 = vmatpush.xpose.msk.msra.mxu3 %vm157_vm1, %v2271_v44 }
0x3002   :  { %v2020_v50 = vrot.slane %v2019_v15, 4 }
0x3004   :  { %v2021_v51 = vmax.f32 %v2019_v15, %v2020_v50 }
0x3006   :  { %v2022_v53 = vrot.slane %v2021_v51, 2 }
0x3008   :  { %v2023_v45 = vmax.f32 %v2021_v51, %v2022_v53  ;;  %v2390_v53 = vld [vmem:[%s3404_s4 + $0x130] ss:$0 sm:$0xff] }
0x300a   :  { %v2024_v54 = vrot.slane %v2023_v45, 1 }
0x300c   :  { %v2025_v55 = vmax.f32 %v2023_v45, %v2024_v54 }
0x300e   :  { %v2026_v28 = vsub.f32 %v2004_v40, %v2025_v55  ;;  %v2027_v56 = vsub.f32 %v2015_v47, %v2025_v55 }
0x3010   :  { %v2028_v57 = vmul.f32 1.442695, %v2026_v28  ;;  %v2030_v58 = vmul.f32 1.442695, %v2027_v56 }
0x3012   :  { %2583 = vpow2.f32 %v2028_v57 }
0x3013   :  { %2585 = vpow2.f32 %v2030_v58 }
0x3018   :  { %v2584_v59 = vpop.eup %2583 }
0x3019   :  { %v2586_v5 = vpop.eup %2585  ;;  %2035 = vperm.xlu0 %2385, %v2584_v59  }
0x301a   :  { %2040 = vperm.xlu2 %2384, %v2586_v5   ;;  %2083 = vmatpush.msra.mxu2 %v2586_v5 }
0x301c   :  { %2084 = vmatpush.msra.mxu2 %v2584_v59 }
0x301d   :  { %2363 = vmatmul.msk.f32.vlgmr.msra.gmra.mxu2 %vm2045_vm12, %v2032_v60 }
0x301e   :  { %2139 = vmatpush.msrb.mxu2 %v3260_v20 }
0x3020   :  { %2140 = vmatpush.msrb.mxu2 %v3255_v43 }
0x3022   :  { %2259 = vmatpush.msra.mxu2 %v2243_v32 }
0x3024   :  { %2260 = vmatpush.msra.mxu2 %v2242_v13 }
0x3025   :  { %2365 = vmatmul.msk.f32.vlgmr.msrb.gmra.mxu2 %vm2045_vm12, %v2121_v61 }
0x3026   :  { %2261 = vmatpush.msra.mxu2 %v2241_v46 }
0x3028   :  { %2262 = vmatpush.msra.mxu2 %v2240_v35 }
0x302d   :  { %2369 = vmatmul.msk.f32.vlgmr.msra.gmra.mxu2 %vm317_vm8, %v2239_v36  ;;  %vm2315_vm8 = vcmask 138240  }
0x3074   :  { %v2041_v62 = vpop.permute.xlu2 %2040 }
0x3075   :  { %v2044_v0 = vmul.f32 %v2594_v63, %v2041_v62 }
0x3077   :  { %2063 = vmatpush.msrb.mxu0 %v2044_v0 }
0x308b   :  { %v2036_v23 = vpop.permute.xlu0 %2035 }
0x308c   :  { %v2043_v39 = vmul.f32 %v2595_v4, %v2036_v23 }
0x308e   :  { %2064 = vmatpush.msrb.mxu0 %v2043_v39 }
0x308f   :  { %2362 = vmatmul.msk.f32.vlgmr.msrb.gmra.mxu0 %vm2045_vm12, %v2032_v60 }
0x3090   :  { %2115 = vmatpush.msra.mxu0 %v3260_v20  ;;  %v2211_v20 = vld [vmem:[%s3404_s4 + $0x238] sm:$0xff] }
0x3092   :  { %2116 = vmatpush.msra.mxu0 %v3255_v43  ;;  %v2148_v43 = vld [vmem:[%s3404_s4 + $0x1b0] sm:$0xff] }
0x3093   :  { %2199 = vmatpush.msrb.mxu1 %v2148_v43 }
0x3094   :  { %2226 = vmatpush.msrb.mxu0 %v2214_v42 }
0x3095   :  { %2200 = vmatpush.msrb.mxu1 %v2147_v26 }
0x3096   :  { %2227 = vmatpush.msrb.mxu0 %v2213_v21 }
0x3097   :  { %2364 = vmatmul.msk.f32.vlgmr.msra.gmra.mxu0 %vm2045_vm12, %v2097_v9  ;;  %2201 = vmatpush.msrb.mxu1 %v2146_v16 }
0x3098   :  { %2228 = vmatpush.msrb.mxu0 %v2212_v31 }
0x3099   :  { %2202 = vmatpush.msrb.mxu1 %v2145_v24 }
0x309a   :  { %2229 = vmatpush.msrb.mxu0 %v2211_v20 }
0x309c   :  { %2230 = vmatpush.msrb.mxu0 %v2210_v33 }
0x309e   :  { %2231 = vmatpush.msrb.mxu0 %v2209_v3 }
0x30a0   :  { %v2086_v14 = vpop.f32.mrf.mxu2  ;;  %2232 = vmatpush.msrb.mxu0 %v2208_v38 }
0x30a1   :  { %v2089_v18 = vmax.f32 %v2086_v14, 1e-30 }
0x30a2   :  { %2233 = vmatpush.msrb.mxu0 %v2207_v49 }
0x30a3   :  { %2587 = vrcp.f32 %v2089_v18 }
0x30a8   :  { %v2142_v34 = vpop.f32.mrf.mxu2 }
0x30a9   :  { %v2588_v12 = vpop.eup %2587  ;;  %2366 = vmatmul.msk.f32.vlgmr.msrb.gmra.mxu3 %vm157_vm1, %v2142_v34 }
0x30aa   :  { %2093 = vperm.xlu1 %2386, %v2588_v12  }
0x30b0   :  { %v2264_v50 = vpop.f32.mrf.mxu2 }
0x310c   :  { %v2066_v37 = vpop.f32.mrf.mxu0 }
0x3114   :  { %v2118_v17 = vpop.f32.mrf.mxu0 }
0x3115   :  { %2367 = vmatmul.msk.f32.vlgmr.msrb.gmra.mxu1 %vm157_vm1, %v2118_v17 }
0x311c   :  { %v2094_v22 = vpop.permute.xlu1 %2093 }
0x311d   :  { %v2096_v40 = vmul.f32 %v2094_v22, %v2066_v37 }
0x311f   :  { %2368 = vmatmul.msk.f32.vlgmr.msrb.gmra.mxu0 %vm157_vm1, %v2096_v40 }
0x312c   :  { %v2181_v47 = vpop.f32.mrf.mxu3 }
0x3192   :  { %v2204_v29 = vpop.f32.mrf.mxu1 }
0x3193   :  { %v2205_v48 = vadd.f32 %v2204_v29, %v2181_v47 }
0x319c   :  { %v2235_v15 = vpop.f32.mrf.mxu0 }
0x319d   :  { %v2238_v51 = vadd.f32 %v2235_v15, %v2205_v48 }
0x319f   :  { %v2267_v45 = vadd.f32 %v2264_v50, %v2238_v51 }
0x31a1   :  { %v2270_v54 = vadd.f32 %v2390_v53, %v2267_v45 }
0x31a3   :  { %2372 = vmatmul.msk.f32.vlgmr.msra.gmra.mxu3 %vm157_vm1, %v2270_v54 }
0x3226   :  { %v2299_v55 = vpop.f32.mrf.mxu3 }
0x3227   :  { %v2302_v28 = vsel %vm2045_vm12, %v2299_v55, -inf }
0x3228   :  { %2303 = vmax.xlane.f32.xlu2 %v2302_v28 }
0x329b   :  { %v2304_v56 = vpop.xlane.xlu2 %2303 }
0x329c   :  { %v2305_v57 = vsub.f32 %v2299_v55, %v2304_v56 }
0x329e   :  { %v2306_v58 = vmul.f32 1.442695, %v2305_v57 }
0x32a0   :  { %2589 = vpow2.f32 %v2306_v58 }
0x32a6   :  { %v2590_v59 = vpop.eup %2589 }
0x32a7   :  { %v2308_v5 = vsel %vm2045_vm12, %v2590_v59, 0.0 }
0x32a8   :  { %2309 = vadd.xlane.f32.xlu1 %v2308_v5 }
0x331b   :  { %v2310_v60 = vpop.xlane.xlu1 %2309 }
0x331c   :  { %2591 = vlog2.f32 %v2310_v60 }
0x3322   :  { %v2592_v61 = vpop.eup %2591 }
0x3323   :  { %v2312_v62 = vmul.f32 0.6931472, %v2592_v61 }
0x3325   :  { %v2313_v63 = vadd.f32 %v2312_v62, %v2304_v56 }
0x3327   :  { %v2314_v0 = vsel %vm2045_vm12, %v2299_v55, %v2313_v63 }
0x3328   :  { %v2316_v1 = vsel %vm2315_vm8, %v2314_v0, 0.0 }
0x3329   :  { %2317 = vst [vmem:[%s3409_s5] sm:$0xff] %v2316_v1 }

</bundles_post_ra>
